<compile_context>
chip_gen: v7x
topology: tpu7x:2x2x1
jax: 0.10.0
libtpu: 0.0.40
codegen_flags: <defaults>
</compile_context>

<pallas_src>
from typing import NamedTuple

import jax
import jax.numpy as jnp
from jax.experimental import pallas as pl
from jax.experimental.pallas import tpu as pltpu

BN_EPS = 1e-5
_COMPUTE_DTYPE = jnp.bfloat16          # MXU input dtype (accumulation stays f32)

_SINGLE_BUFFER_WEIGHTS_OK = None       # decided on first call; False => fallback


def _round_up(n, m):
    return (n + m - 1) // m * m


def _cdiv(a, b):
    return -(-a // b)


def _vmem_capacity_bytes():
    try:
        return int(pltpu.get_tpu_info().vmem_capacity_bytes)
    except Exception:
        return 64 * 1024 * 1024        # conservative (v7x) fallback


# ----------------------------------------------------------------------------
# Kernel: grid = (batch_tiles, k_tiles).  Layer 1 accumulates over the K axis
# into an f32 scratch; layers 2/3 (dot + bias [+ ReLU]) run on the last K step.
# Dropout is identity (eval mode); BN is already folded into W/b.
# ----------------------------------------------------------------------------
def _mlp_kernel(x_ref, w1_ref, b1_ref, w2_ref, b2_ref, w3_ref, b3_ref,
                o_ref, acc_ref):
    k = pl.program_id(1)

    @pl.when(k == 0)
    def _():
        acc_ref[...] = jnp.zeros_like(acc_ref)

    acc_ref[...] += jnp.dot(x_ref[...], w1_ref[...],
                            preferred_element_type=jnp.float32)

    @pl.when(k == pl.num_programs(1) - 1)
    def _():
        h1 = jnp.maximum(acc_ref[...] + b1_ref[...], 0.0).astype(_COMPUTE_DTYPE)
        h2 = jnp.dot(h1, w2_ref[...], preferred_element_type=jnp.float32) + b2_ref[...]
        h2 = jnp.maximum(h2, 0.0).astype(_COMPUTE_DTYPE)
        out = jnp.dot(h2, w3_ref[...], preferred_element_type=jnp.float32) + b3_ref[...]
        o_ref[...] = out.astype(o_ref.dtype)


# ----------------------------------------------------------------------------
# Load-time parameter preparation (hoisted out of the per-call path).
# ----------------------------------------------------------------------------
class PreparedParams(NamedTuple):
    w1: jax.Array          # (Dp, 1024) bf16, BN-folded, zero-padded along K
    b1: jax.Array          # (1, 1024)  f32,  BN-folded
    w2: jax.Array          # (1024, 512) bf16, BN-folded
    b2: jax.Array          # (1, 512)   f32,  BN-folded
    w3: jax.Array          # (512, Cp)  bf16, zero-padded along N
    b3: jax.Array          # (1, Cp)    f32,  zero-padded
    input_dim: int
    num_classes: int
    k_tile: int            # layer-1 K tile (== Dp when W1 is fully resident)


def prepare_params(params, *, k_tile=None):
    """Fold eval-mode BatchNorm into the linears, pad to lane-dense shapes and
    cast to the MXU dtype.  Call ONCE at model-load time."""
    (w1, b1, g1, beta1, m1, v1,
     w2, b2, g2, beta2, m2, v2,
     w3, b3) = params
    D_in, H1 = w1.shape
    H2 = w2.shape[1]
    C = w3.shape[1]

    # Fold BN (running stats) into the preceding linear, in f32.
    s1 = g1 * jax.lax.rsqrt(v1 + BN_EPS)
    w1f = w1 * s1
    b1f = (b1 - m1) * s1 + beta1
    s2 = g2 * jax.lax.rsqrt(v2 + BN_EPS)
    w2f = w2 * s2
    b2f = (b2 - m2) * s2 + beta2

    Dp = _round_up(D_in, 128)
    Cp = _round_up(C, 128)

    # Layer-1 K tiling: keep W1 fully resident unless it would eat too much VMEM
    # (matters on v7x's 64 MiB); otherwise stream it in ~2048-wide K tiles.
    if k_tile is None:
        w1_budget = _vmem_capacity_bytes() // 4
        k_tile = Dp if Dp * H1 * 2 <= w1_budget else 2048
    k_tile = max(128, _round_up(min(int(k_tile), Dp), 128))
    nk = _cdiv(Dp, k_tile)
    k_tile = _round_up(_cdiv(Dp, nk), 128)     # minimize K padding
    Dp = nk * k_tile

    w1p = jnp.zeros((Dp, H1), jnp.float32).at[:D_in, :].set(w1f).astype(_COMPUTE_DTYPE)
    w2p = w2f.astype(_COMPUTE_DTYPE)
    w3p = jnp.zeros((H2, Cp), jnp.float32).at[:, :C].set(w3).astype(_COMPUTE_DTYPE)
    b3p = jnp.zeros((1, Cp), jnp.float32).at[:, :C].set(b3)

    return PreparedParams(w1p, b1f, w2p, b2f, w3p, b3p,
                          input_dim=int(D_in), num_classes=int(C),
                          k_tile=int(k_tile))


# ----------------------------------------------------------------------------
# pallas_call construction and forward wrapper.
# ----------------------------------------------------------------------------
def _build_call(bt, tk, nk, H1, H2, Cp, Bp, vmem_limit, single_buffer_weights):
    def const_spec(shape):
        # Constant index map -> never re-DMA'd; a single buffer halves its VMEM.
        if single_buffer_weights:
            return pl.BlockSpec(shape, lambda i, k: (0, 0),
                                pipeline_mode=pl.Buffered(1))
        return pl.BlockSpec(shape, lambda i, k: (0, 0))

    if nk == 1:
        w1_spec = const_spec((tk, H1))                          # fully resident
    else:
        w1_spec = pl.BlockSpec((tk, H1), lambda i, k: (k, 0))   # streamed over K

    in_specs = [
        pl.BlockSpec((bt, tk), lambda i, k: (i, k)),            # x (batch/K tiled)
        w1_spec,
        const_spec((1, H1)),
        const_spec((H1, H2)),
        const_spec((1, H2)),
        const_spec((H2, Cp)),
        const_spec((1, Cp)),
    ]
    out_spec = pl.BlockSpec((bt, Cp), lambda i, k: (i, 0))      # lane-dense output

    return pl.pallas_call(
        _mlp_kernel,
        out_shape=jax.ShapeDtypeStruct((Bp, Cp), jnp.float32),
        grid_spec=pltpu.PrefetchScalarGridSpec(
            num_scalar_prefetch=0,
            grid=(Bp // bt, nk),
            in_specs=in_specs,
            out_specs=out_spec,
            scratch_shapes=[pltpu.VMEM((bt, H1), jnp.float32)],
        ),
        compiler_params=pltpu.CompilerParams(
            dimension_semantics=("parallel", "arbitrary"),
            vmem_limit_bytes=vmem_limit,
        ),
    )


def multimodal_classifier_forward(x, prepared, *, batch_tile=512):
    """Eval-mode forward of MultimodalClassifier.  `prepared` comes from
    prepare_params() (weights already BN-folded / padded / bf16)."""
    global _SINGLE_BUFFER_WEIGHTS_OK

    assert batch_tile % 8 == 0, "batch_tile must be a multiple of 8"
    B, D_in = x.shape
    assert D_in == prepared.input_dim, "input_dim mismatch with prepared params"
    Dp, H1 = prepared.w1.shape
    H2, Cp = prepared.w3.shape
    C = prepared.num_classes
    tk = prepared.k_tile
    nk = Dp // tk

    # Batch tiling: tiny batches stay a single grid step (don't duplicate the
    # weight DMA across TensorCores); otherwise force an even number of tiles so
    # v7x's 2 TCs split the "parallel" axis evenly.
    Bp = _round_up(B, 8)
    if Bp <= batch_tile:
        bt, nb = Bp, 1
    else:
        nb = _cdiv(B, batch_tile)
        if nb % 2:
            nb += 1
        bt = _round_up(_cdiv(B, nb), 8)
        Bp = nb * bt

    # Pad/cast the activations cheaply: cast to bf16 first, then pad.
    xp = jnp.pad(x.astype(_COMPUTE_DTYPE), ((0, Bp - B), (0, Dp - D_in)))

    # Generation-aware VMEM budget: ~2x a conservative estimate, hard-capped at
    # 85% of this chip's physical VMEM.
    cap = _vmem_capacity_bytes()
    w1_bufs = 1 if nk == 1 else 2
    est = (2 * bt * tk * 2                 # x tiles, double-buffered, bf16
           + 2 * bt * Cp * 4               # out tiles, double-buffered, f32
           + w1_bufs * tk * H1 * 2         # W1 block(s), bf16
           + (H1 * H2 + H2 * Cp) * 2       # W2, W3 resident, bf16
           + (H1 + H2 + Cp) * 4            # biases, f32
           + bt * H1 * 4                   # layer-1 accumulator scratch
           + bt * (H1 + H2) * 4)           # h1/h2 intermediates headroom
    vmem_limit = min(max(2 * est, 32 * 1024 * 1024), int(0.85 * cap))

    args = (xp, prepared.w1, prepared.b1, prepared.w2, prepared.b2,
            prepared.w3, prepared.b3)

    if _SINGLE_BUFFER_WEIGHTS_OK is False:
        out = _build_call(bt, tk, nk, H1, H2, Cp, Bp, vmem_limit, False)(*args)
    else:
        try:
            out = _build_call(bt, tk, nk, H1, H2, Cp, Bp, vmem_limit, True)(*args)
            _SINGLE_BUFFER_WEIGHTS_OK = True
        except Exception:
            # pl.Buffered(1) not supported by this Pallas build: default buffering.
            _SINGLE_BUFFER_WEIGHTS_OK = False
            out = _build_call(bt, tk, nk, H1, H2, Cp, Bp, vmem_limit, False)(*args)

    return out[:B, :C]


# ----------------------------------------------------------------------------
# Parameter init (PyTorch-equivalent shapes) and plain-JAX reference.
# ----------------------------------------------------------------------------
def init_params(key, input_dim, num_classes):
    """Weights stored as (in, out); BatchNorm stats as (1, features) rows."""
    H1, H2 = 1024, 512
    k1, k2, k3 = jax.random.split(key, 3)

    def linear(k, fan_in, fan_out):
        bound = 1.0 / jnp.sqrt(fan_in)
        kw, kb = jax.random.split(k)
        w = jax.random.uniform(kw, (fan_in, fan_out), jnp.float32, -bound, bound)
        b = jax.random.uniform(kb, (1, fan_out), jnp.float32, -bound, bound)
        return w, b

    w1, b1 = linear(k1, input_dim, H1)
    w2, b2 = linear(k2, H1, H2)
    w3, b3 = linear(k3, H2, num_classes)

    def bn(features):
        gamma = jnp.ones((1, features), jnp.float32)
        beta = jnp.zeros((1, features), jnp.float32)
        running_mean = jnp.zeros((1, features), jnp.float32)
        running_var = jnp.ones((1, features), jnp.float32)
        return gamma, beta, running_mean, running_var

    g1, beta1, m1, v1 = bn(H1)
    g2, beta2, m2, v2 = bn(H2)

    return (w1, b1, g1, beta1, m1, v1,
            w2, b2, g2, beta2, m2, v2,
            w3, b3)


def reference_forward(x, params):
    """Plain-JAX f32 reference (eval-mode semantics) for verification."""
    (w1, b1, g1, beta1, m1, v1,
     w2, b2, g2, beta2, m2, v2,
     w3, b3) = params
    h = x @ w1 + b1
    h = (h - m1) / jnp.sqrt(v1 + BN_EPS) * g1 + beta1
    h = jnp.maximum(h, 0.0)
    h = h @ w2 + b2
    h = (h - m2) / jnp.sqrt(v2 + BN_EPS) * g2 + beta2
    h = jnp.maximum(h, 0.0)
    return h @ w3 + b3


if __name__ == "__main__":
    key = jax.random.PRNGKey(0)
    kp1, kx1, kp2, kx2 = jax.random.split(key, 4)

    # --- Test 1: small shapes, W1 fully resident, single grid step -----------
    batch, input_dim, num_classes = 8, 32, 16
    params = init_params(kp1, input_dim, num_classes)
    prepared = prepare_params(params)          # done ONCE, outside the call path
    x = jax.random.normal(kx1, (batch, input_dim), dtype=jnp.float32)

    out = jax.block_until_ready(multimodal_classifier_forward(x, prepared))
    ref = reference_forward(x, params)
    assert out.shape == (batch, num_classes)
    err = float(jnp.max(jnp.abs(out - ref)))
    # Tolerance reflects intentional bf16 weights/activations with f32 accumulation.
    assert jnp.allclose(out, ref, atol=3e-2, rtol=3e-2), \
        f"test1 mismatch vs reference (max abs err {err})"

    # --- Test 2: exercise the K-tiled / multi-batch-tile path at small shapes -
    batch2, input_dim2, num_classes2 = 24, 384, 10
    params2 = init_params(kp2, input_dim2, num_classes2)
    prepared2 = prepare_params(params2, k_tile=128)    # forces 3 K tiles
    x2 = jax.random.normal(kx2, (batch2, input_dim2), dtype=jnp.float32)

    out2 = jax.block_until_ready(
        multimodal_classifier_forward(x2, prepared2, batch_tile=8))  # 4 batch tiles
    ref2 = reference_forward(x2, params2)
    assert out2.shape == (batch2, num_classes2)
    err2 = float(jnp.max(jnp.abs(out2 - ref2)))
    assert jnp.allclose(out2, ref2, atol=5e-2, rtol=5e-2), \
        f"test2 mismatch vs reference (max abs err {err2})"

    print("KERNEL_OK")
</pallas_src>

<mosaic_0001>
module attributes {stable_mosaic.version = 11 : i64} {
  func.func @_mlp_kernel(%arg0: i32, %arg1: i32, %arg2: memref<8x128xbf16, #tpu.memory_space<vmem>>, %arg3: memref<128x1024xbf16, #tpu.memory_space<vmem>>, %arg4: memref<1x1024xf32, #tpu.memory_space<vmem>>, %arg5: memref<1024x512xbf16, #tpu.memory_space<vmem>>, %arg6: memref<1x512xf32, #tpu.memory_space<vmem>>, %arg7: memref<512x128xbf16, #tpu.memory_space<vmem>>, %arg8: memref<1x128xf32, #tpu.memory_space<vmem>>, %arg9: memref<8x128xf32, #tpu.memory_space<vmem>>, %arg10: memref<8x1024xf32, #tpu.memory_space<vmem>>) attributes {dimension_semantics = [#tpu.dimension_semantics<parallel>, #tpu.dimension_semantics<arbitrary>], iteration_bounds = array<i64: 1, 1>, scalar_prefetch = 0 : i64, scratch_operands = 1 : i64, tpu.core_type = #tpu.core_type<tc>, window_params = [{transform_indices = @transform_0, window_bounds = array<i64: 8, 128>}, {pipeline_mode = #tpu.pipeline_mode<synchronous>, transform_indices = @transform_1, window_bounds = array<i64: 128, 1024>}, {pipeline_mode = #tpu.pipeline_mode<synchronous>, transform_indices = @transform_2, window_bounds = array<i64: 1, 1024>}, {pipeline_mode = #tpu.pipeline_mode<synchronous>, transform_indices = @transform_3, window_bounds = array<i64: 1024, 512>}, {pipeline_mode = #tpu.pipeline_mode<synchronous>, transform_indices = @transform_4, window_bounds = array<i64: 1, 512>}, {pipeline_mode = #tpu.pipeline_mode<synchronous>, transform_indices = @transform_5, window_bounds = array<i64: 512, 128>}, {pipeline_mode = #tpu.pipeline_mode<synchronous>, transform_indices = @transform_6, window_bounds = array<i64: 1, 128>}, {transform_indices = @transform_7, window_bounds = array<i64: 8, 128>}]} {
    %c0_i32 = arith.constant 0 : i32
    %0 = arith.cmpi eq, %arg1, %c0_i32 : i32
    %1 = arith.extui %0 : i1 to i32
    %c0_i32_0 = arith.constant 0 : i32
    %2 = arith.cmpi ne, %1, %c0_i32_0 : i32
    scf.if %2 {
      %cst_10 = arith.constant 0.000000e+00 : f32
      %12 = vector.broadcast %cst_10 : f32 to vector<8x1024xf32>
      %c0_11 = arith.constant 0 : index
      %c0_12 = arith.constant 0 : index
      %13 = vector.load %arg10[%c0_11, %c0_12] : memref<8x1024xf32, #tpu.memory_space<vmem>>, vector<8x1024xf32>
      tpu.vector_store %arg10[%c0_11, %c0_12], %12 {strides = array<i32>} : memref<8x1024xf32, #tpu.memory_space<vmem>>, vector<8x1024xf32>,
    } else {
    }
    %c0 = arith.constant 0 : index
    %c0_1 = arith.constant 0 : index
    %3 = vector.load %arg10[%c0, %c0_1] : memref<8x1024xf32, #tpu.memory_space<vmem>>, vector<8x1024xf32>
    %c0_2 = arith.constant 0 : index
    %c0_3 = arith.constant 0 : index
    %4 = vector.load %arg2[%c0_2, %c0_3] : memref<8x128xbf16, #tpu.memory_space<vmem>>, vector<8x128xbf16>
    %c0_4 = arith.constant 0 : index
    %c0_5 = arith.constant 0 : index
    %5 = vector.load %arg3[%c0_4, %c0_5] : memref<128x1024xbf16, #tpu.memory_space<vmem>>, vector<128x1024xbf16>
    %cst = arith.constant dense<0.000000e+00> : vector<8x1024xf32>
    %6 = tpu.matmul %4, %5, %cst {dimension_numbers = #tpu.dot_dimension_numbers<[1], [0], [0], [1], [0, 0, 1, 1], [], []>} : vector<8x128xbf16>, vector<128x1024xbf16>, vector<8x1024xf32> -> vector<8x1024xf32>
    %7 = arith.addf %3, %6 : vector<8x1024xf32>
    %c0_6 = arith.constant 0 : index
    %c0_7 = arith.constant 0 : index
    %8 = vector.load %arg10[%c0_6, %c0_7] : memref<8x1024xf32, #tpu.memory_space<vmem>>, vector<8x1024xf32>
    tpu.vector_store %arg10[%c0_6, %c0_7], %7 {strides = array<i32>} : memref<8x1024xf32, #tpu.memory_space<vmem>>, vector<8x1024xf32>,
    %c0_i32_8 = arith.constant 0 : i32
    %9 = arith.cmpi eq, %arg1, %c0_i32_8 : i32
    %10 = arith.extui %9 : i1 to i32
    %c0_i32_9 = arith.constant 0 : i32
    %11 = arith.cmpi ne, %10, %c0_i32_9 : i32
    scf.if %11 {
      %c0_10 = arith.constant 0 : index
      %c0_11 = arith.constant 0 : index
      %12 = vector.load %arg10[%c0_10, %c0_11] : memref<8x1024xf32, #tpu.memory_space<vmem>>, vector<8x1024xf32>
      %c0_12 = arith.constant 0 : index
      %c0_13 = arith.constant 0 : index
      %13 = vector.load %arg4[%c0_12, %c0_13] : memref<1x1024xf32, #tpu.memory_space<vmem>>, vector<1x1024xf32>
      %14 = vector.broadcast %13 : vector<1x1024xf32> to vector<8x1024xf32>
      %15 = arith.addf %12, %14 : vector<8x1024xf32>
      %cst_14 = arith.constant 0.000000e+00 : f32
      %16 = vector.broadcast %cst_14 : f32 to vector<8x1024xf32>
      %17 = arith.maximumf %15, %16 : vector<8x1024xf32>
      %18 = arith.truncf %17 : vector<8x1024xf32> to vector<8x1024xbf16>
      %c0_15 = arith.constant 0 : index
      %c0_16 = arith.constant 0 : index
      %19 = vector.load %arg5[%c0_15, %c0_16] : memref<1024x512xbf16, #tpu.memory_space<vmem>>, vector<1024x512xbf16>
      %cst_17 = arith.constant dense<0.000000e+00> : vector<8x512xf32>
      %20 = tpu.matmul %18, %19, %cst_17 {dimension_numbers = #tpu.dot_dimension_numbers<[1], [0], [0], [1], [0, 0, 1, 1], [], []>} : vector<8x1024xbf16>, vector<1024x512xbf16>, vector<8x512xf32> -> vector<8x512xf32>
      %c0_18 = arith.constant 0 : index
      %c0_19 = arith.constant 0 : index
      %21 = vector.load %arg6[%c0_18, %c0_19] : memref<1x512xf32, #tpu.memory_space<vmem>>, vector<1x512xf32>
      %22 = vector.broadcast %21 : vector<1x512xf32> to vector<8x512xf32>
      %23 = arith.addf %20, %22 : vector<8x512xf32>
      %cst_20 = arith.constant 0.000000e+00 : f32
      %24 = vector.broadcast %cst_20 : f32 to vector<8x512xf32>
      %25 = arith.maximumf %23, %24 : vector<8x512xf32>
      %26 = arith.truncf %25 : vector<8x512xf32> to vector<8x512xbf16>
      %c0_21 = arith.constant 0 : index
      %c0_22 = arith.constant 0 : index
      %27 = vector.load %arg7[%c0_21, %c0_22] : memref<512x128xbf16, #tpu.memory_space<vmem>>, vector<512x128xbf16>
      %cst_23 = arith.constant dense<0.000000e+00> : vector<8x128xf32>
      %28 = tpu.matmul %26, %27, %cst_23 {dimension_numbers = #tpu.dot_dimension_numbers<[1], [0], [0], [1], [0, 0, 1, 1], [], []>} : vector<8x512xbf16>, vector<512x128xbf16>, vector<8x128xf32> -> vector<8x128xf32>
      %c0_24 = arith.constant 0 : index
      %c0_25 = arith.constant 0 : index
      %29 = vector.load %arg8[%c0_24, %c0_25] : memref<1x128xf32, #tpu.memory_space<vmem>>, vector<1x128xf32>
      %30 = vector.broadcast %29 : vector<1x128xf32> to vector<8x128xf32>
      %31 = arith.addf %28, %30 : vector<8x128xf32>
      %c0_26 = arith.constant 0 : index
      %c0_27 = arith.constant 0 : index
      %32 = vector.load %arg9[%c0_26, %c0_27] : memref<8x128xf32, #tpu.memory_space<vmem>>, vector<8x128xf32>
      tpu.vector_store %arg9[%c0_26, %c0_27], %31 {strides = array<i32>} : memref<8x128xf32, #tpu.memory_space<vmem>>, vector<8x128xf32>,
    } else {
    }
    return
  }
  func.func @transform_0(%arg0: i32, %arg1: i32) -> (i32, i32) {
    %c0_i32 = arith.constant 0 : i32
    return %arg0, %arg1 : i32, i32
  }
  func.func @transform_1(%arg0: i32, %arg1: i32) -> (i32, i32) {
    %c0_i32 = arith.constant 0 : i32
    %c0_i32_0 = arith.constant 0 : i32
    %c0_i32_1 = arith.constant 0 : i32
    return %c0_i32, %c0_i32_0 : i32, i32
  }
  func.func @transform_2(%arg0: i32, %arg1: i32) -> (i32, i32) {
    %c0_i32 = arith.constant 0 : i32
    %c0_i32_0 = arith.constant 0 : i32
    %c0_i32_1 = arith.constant 0 : i32
    return %c0_i32, %c0_i32_0 : i32, i32
  }
  func.func @transform_3(%arg0: i32, %arg1: i32) -> (i32, i32) {
    %c0_i32 = arith.constant 0 : i32
    %c0_i32_0 = arith.constant 0 : i32
    %c0_i32_1 = arith.constant 0 : i32
    return %c0_i32, %c0_i32_0 : i32, i32
  }
  func.func @transform_4(%arg0: i32, %arg1: i32) -> (i32, i32) {
    %c0_i32 = arith.constant 0 : i32
    %c0_i32_0 = arith.constant 0 : i32
    %c0_i32_1 = arith.constant 0 : i32
    return %c0_i32, %c0_i32_0 : i32, i32
  }
  func.func @transform_5(%arg0: i32, %arg1: i32) -> (i32, i32) {
    %c0_i32 = arith.constant 0 : i32
    %c0_i32_0 = arith.constant 0 : i32
    %c0_i32_1 = arith.constant 0 : i32
    return %c0_i32, %c0_i32_0 : i32, i32
  }
  func.func @transform_6(%arg0: i32, %arg1: i32) -> (i32, i32) {
    %c0_i32 = arith.constant 0 : i32
    %c0_i32_0 = arith.constant 0 : i32
    %c0_i32_1 = arith.constant 0 : i32
    return %c0_i32, %c0_i32_0 : i32, i32
  }
  func.func @transform_7(%arg0: i32, %arg1: i32) -> (i32, i32) {
    %c0_i32 = arith.constant 0 : i32
    %c0_i32_0 = arith.constant 0 : i32
    return %arg0, %c0_i32 : i32, i32
  }
}

module attributes {stable_mosaic.version = 11 : i64} {
  func.func @_mlp_kernel(%arg0: i32, %arg1: i32, %arg2: memref<8x128xbf16, #tpu.memory_space<vmem>>, %arg3: memref<128x1024xbf16, #tpu.memory_space<vmem>>, %arg4: memref<1x1024xf32, #tpu.memory_space<vmem>>, %arg5: memref<1024x512xbf16, #tpu.memory_space<vmem>>, %arg6: memref<1x512xf32, #tpu.memory_space<vmem>>, %arg7: memref<512x128xbf16, #tpu.memory_space<vmem>>, %arg8: memref<1x128xf32, #tpu.memory_space<vmem>>, %arg9: memref<8x128xf32, #tpu.memory_space<vmem>>, %arg10: memref<8x1024xf32, #tpu.memory_space<vmem>>) attributes {dimension_semantics = [#tpu.dimension_semantics<parallel>, #tpu.dimension_semantics<arbitrary>], iteration_bounds = array<i64: 1, 1>, scalar_prefetch = 0 : i64, scratch_operands = 1 : i64, tpu.core_type = #tpu.core_type<tc>, window_params = [{transform_indices = @transform_0, window_bounds = array<i64: 8, 128>}, {pipeline_mode = #tpu.pipeline_mode<synchronous>, transform_indices = @transform_1, window_bounds = array<i64: 128, 1024>}, {pipeline_mode = #tpu.pipeline_mode<synchronous>, transform_indices = @transform_2, window_bounds = array<i64: 1, 1024>}, {pipeline_mode = #tpu.pipeline_mode<synchronous>, transform_indices = @transform_3, window_bounds = array<i64: 1024, 512>}, {pipeline_mode = #tpu.pipeline_mode<synchronous>, transform_indices = @transform_4, window_bounds = array<i64: 1, 512>}, {pipeline_mode = #tpu.pipeline_mode<synchronous>, transform_indices = @transform_5, window_bounds = array<i64: 512, 128>}, {pipeline_mode = #tpu.pipeline_mode<synchronous>, transform_indices = @transform_6, window_bounds = array<i64: 1, 128>}, {transform_indices = @transform_7, window_bounds = array<i64: 8, 128>}]} {
    %c0_i32 = arith.constant 0 : i32
    %0 = arith.cmpi eq, %arg1, %c0_i32 : i32
    %1 = arith.extui %0 : i1 to i32
    %c0_i32_0 = arith.constant 0 : i32
    %2 = arith.cmpi ne, %1, %c0_i32_0 : i32
    scf.if %2 {
      %cst_10 = arith.constant 0.000000e+00 : f32
      %12 = vector.broadcast %cst_10 : f32 to vector<8x1024xf32>
      %c0_11 = arith.constant 0 : index
      %c0_12 = arith.constant 0 : index
      %13 = vector.load %arg10[%c0_11, %c0_12] : memref<8x1024xf32, #tpu.memory_space<vmem>>, vector<8x1024xf32>
      tpu.vector_store %arg10[%c0_11, %c0_12], %12 {strides = array<i32>} : memref<8x1024xf32, #tpu.memory_space<vmem>>, vector<8x1024xf32>,
    } else {
    }
    %c0 = arith.constant 0 : index
    %c0_1 = arith.constant 0 : index
    %3 = vector.load %arg10[%c0, %c0_1] : memref<8x1024xf32, #tpu.memory_space<vmem>>, vector<8x1024xf32>
    %c0_2 = arith.constant 0 : index
    %c0_3 = arith.constant 0 : index
    %4 = vector.load %arg2[%c0_2, %c0_3] : memref<8x128xbf16, #tpu.memory_space<vmem>>, vector<8x128xbf16>
    %c0_4 = arith.constant 0 : index
    %c0_5 = arith.constant 0 : index
    %5 = vector.load %arg3[%c0_4, %c0_5] : memref<128x1024xbf16, #tpu.memory_space<vmem>>, vector<128x1024xbf16>
    %cst = arith.constant dense<0.000000e+00> : vector<8x1024xf32>
    %6 = tpu.matmul %4, %5, %cst {dimension_numbers = #tpu.dot_dimension_numbers<[1], [0], [0], [1], [0, 0, 1, 1], [], []>} : vector<8x128xbf16>, vector<128x1024xbf16>, vector<8x1024xf32> -> vector<8x1024xf32>
    %7 = arith.addf %3, %6 : vector<8x1024xf32>
    %c0_6 = arith.constant 0 : index
    %c0_7 = arith.constant 0 : index
    %8 = vector.load %arg10[%c0_6, %c0_7] : memref<8x1024xf32, #tpu.memory_space<vmem>>, vector<8x1024xf32>
    tpu.vector_store %arg10[%c0_6, %c0_7], %7 {strides = array<i32>} : memref<8x1024xf32, #tpu.memory_space<vmem>>, vector<8x1024xf32>,
    %c0_i32_8 = arith.constant 0 : i32
    %9 = arith.cmpi eq, %arg1, %c0_i32_8 : i32
    %10 = arith.extui %9 : i1 to i32
    %c0_i32_9 = arith.constant 0 : i32
    %11 = arith.cmpi ne, %10, %c0_i32_9 : i32
    scf.if %11 {
      %c0_10 = arith.constant 0 : index
      %c0_11 = arith.constant 0 : index
      %12 = vector.load %arg10[%c0_10, %c0_11] : memref<8x1024xf32, #tpu.memory_space<vmem>>, vector<8x1024xf32>
      %c0_12 = arith.constant 0 : index
      %c0_13 = arith.constant 0 : index
      %13 = vector.load %arg4[%c0_12, %c0_13] : memref<1x1024xf32, #tpu.memory_space<vmem>>, vector<1x1024xf32>
      %14 = vector.broadcast %13 : vector<1x1024xf32> to vector<8x1024xf32>
      %15 = arith.addf %12, %14 : vector<8x1024xf32>
      %cst_14 = arith.constant 0.000000e+00 : f32
      %16 = vector.broadcast %cst_14 : f32 to vector<8x1024xf32>
      %17 = arith.maximumf %15, %16 : vector<8x1024xf32>
      %18 = arith.truncf %17 : vector<8x1024xf32> to vector<8x1024xbf16>
      %c0_15 = arith.constant 0 : index
      %c0_16 = arith.constant 0 : index
      %19 = vector.load %arg5[%c0_15, %c0_16] : memref<1024x512xbf16, #tpu.memory_space<vmem>>, vector<1024x512xbf16>
      %cst_17 = arith.constant dense<0.000000e+00> : vector<8x512xf32>
      %20 = tpu.matmul %18, %19, %cst_17 {dimension_numbers = #tpu.dot_dimension_numbers<[1], [0], [0], [1], [0, 0, 1, 1], [], []>} : vector<8x1024xbf16>, vector<1024x512xbf16>, vector<8x512xf32> -> vector<8x512xf32>
      %c0_18 = arith.constant 0 : index
      %c0_19 = arith.constant 0 : index
      %21 = vector.load %arg6[%c0_18, %c0_19] : memref<1x512xf32, #tpu.memory_space<vmem>>, vector<1x512xf32>
      %22 = vector.broadcast %21 : vector<1x512xf32> to vector<8x512xf32>
      %23 = arith.addf %20, %22 : vector<8x512xf32>
      %cst_20 = arith.constant 0.000000e+00 : f32
      %24 = vector.broadcast %cst_20 : f32 to vector<8x512xf32>
      %25 = arith.maximumf %23, %24 : vector<8x512xf32>
      %26 = arith.truncf %25 : vector<8x512xf32> to vector<8x512xbf16>
      %c0_21 = arith.constant 0 : index
      %c0_22 = arith.constant 0 : index
      %27 = vector.load %arg7[%c0_21, %c0_22] : memref<512x128xbf16, #tpu.memory_space<vmem>>, vector<512x128xbf16>
      %cst_23 = arith.constant dense<0.000000e+00> : vector<8x128xf32>
      %28 = tpu.matmul %26, %27, %cst_23 {dimension_numbers = #tpu.dot_dimension_numbers<[1], [0], [0], [1], [0, 0, 1, 1], [], []>} : vector<8x512xbf16>, vector<512x128xbf16>, vector<8x128xf32> -> vector<8x128xf32>
      %c0_24 = arith.constant 0 : index
      %c0_25 = arith.constant 0 : index
      %29 = vector.load %arg8[%c0_24, %c0_25] : memref<1x128xf32, #tpu.memory_space<vmem>>, vector<1x128xf32>
      %30 = vector.broadcast %29 : vector<1x128xf32> to vector<8x128xf32>
      %31 = arith.addf %28, %30 : vector<8x128xf32>
      %c0_26 = arith.constant 0 : index
      %c0_27 = arith.constant 0 : index
      %32 = vector.load %arg9[%c0_26, %c0_27] : memref<8x128xf32, #tpu.memory_space<vmem>>, vector<8x128xf32>
      tpu.vector_store %arg9[%c0_26, %c0_27], %31 {strides = array<i32>} : memref<8x128xf32, #tpu.memory_space<vmem>>, vector<8x128xf32>,
    } else {
    }
    return
  }
  func.func @transform_0(%arg0: i32, %arg1: i32) -> (i32, i32) {
    %c0_i32 = arith.constant 0 : i32
    return %arg0, %arg1 : i32, i32
  }
  func.func @transform_1(%arg0: i32, %arg1: i32) -> (i32, i32) {
    %c0_i32 = arith.constant 0 : i32
    %c0_i32_0 = arith.constant 0 : i32
    %c0_i32_1 = arith.constant 0 : i32
    return %c0_i32, %c0_i32_0 : i32, i32
  }
  func.func @transform_2(%arg0: i32, %arg1: i32) -> (i32, i32) {
    %c0_i32 = arith.constant 0 : i32
    %c0_i32_0 = arith.constant 0 : i32
    %c0_i32_1 = arith.constant 0 : i32
    return %c0_i32, %c0_i32_0 : i32, i32
  }
  func.func @transform_3(%arg0: i32, %arg1: i32) -> (i32, i32) {
    %c0_i32 = arith.constant 0 : i32
    %c0_i32_0 = arith.constant 0 : i32
    %c0_i32_1 = arith.constant 0 : i32
    return %c0_i32, %c0_i32_0 : i32, i32
  }
  func.func @transform_4(%arg0: i32, %arg1: i32) -> (i32, i32) {
    %c0_i32 = arith.constant 0 : i32
    %c0_i32_0 = arith.constant 0 : i32
    %c0_i32_1 = arith.constant 0 : i32
    return %c0_i32, %c0_i32_0 : i32, i32
  }
  func.func @transform_5(%arg0: i32, %arg1: i32) -> (i32, i32) {
    %c0_i32 = arith.constant 0 : i32
    %c0_i32_0 = arith.constant 0 : i32
    %c0_i32_1 = arith.constant 0 : i32
    return %c0_i32, %c0_i32_0 : i32, i32
  }
  func.func @transform_6(%arg0: i32, %arg1: i32) -> (i32, i32) {
    %c0_i32 = arith.constant 0 : i32
    %c0_i32_0 = arith.constant 0 : i32
    %c0_i32_1 = arith.constant 0 : i32
    return %c0_i32, %c0_i32_0 : i32, i32
  }
  func.func @transform_7(%arg0: i32, %arg1: i32) -> (i32, i32) {
    %c0_i32 = arith.constant 0 : i32
    %c0_i32_0 = arith.constant 0 : i32
    return %arg0, %c0_i32 : i32, i32
  }
}

</mosaic_0001>

<bundles_post_ra>
// kernel: tpu_custom_call.1
= control target key start
LH: loop header
LB: loop body
LE: loop exit
PB: predicated region body
PF: predicated region fallthrough
CT: control target
= control target key end

     0   :  { %12 = vsyncpa [#allocation4], 0  ;;  %s4195_s0 = inlined_call_operand.hbm [shape: bf16[8,128], index: 0, kind: input, shape index: {}]   ;;  %s4196_s1 = inlined_call_operand.hbm [shape: bf16[128,1024], index: 1, kind: input, shape index: {}]   ;;  %s4197_s2 = inlined_call_operand.hbm [shape: f32[1,1024], index: 2, kind: input, shape index: {}]   ;;  %s4198_s3 = inlined_call_operand.hbm [shape: bf16[1024,512], index: 3, kind: input, shape index: {}]   ;;  %s4199_s4 = inlined_call_operand.vmem [shape: f32[1,512], index: 4, kind: input, shape index: {}]   ;;  %s4200_s5 = inlined_call_operand.hbm [shape: bf16[512,128], index: 5, kind: input, shape index: {}]   ;;  %s4201_s6 = inlined_call_operand.vmem [shape: f32[1,128], index: 6, kind: input, shape index: {}]   ;;  %s4202_s7 = inlined_call_operand.hbm [shape: f32[8,128], index: 7, kind: output, shape index: {}]  }
   0x1   :  { %13 = vsyncpa [#allocation7], 0 }
   0x2   :  { %14 = vsyncpa [#allocation10], 0 }
   0x3   :  { %15 = vsyncpa [#allocation5], 0  ;;  %s4003_s24 = smov [#allocation6]   ;;  %s3863_s28 = scalar_lea.hbm %s4196_s1, 8192 }
   0x4   :  { %s31_s25 = sshll.u32 %s4003_s24, 4  ;;  %p3864_p0 = scmp.ne.s32.totalorder %s4196_s1, %s3863_s28  ;;  %s32_s25 = int_to_ptr.vmem [resolvable:$true] %s31_s25 }
   0x5   :  { %p3867_p1 = scmp.lt.u32.totalorder %s3863_s28, %s4196_s1 }
   0x7   :  { %p3869_p2 = pnand %p3867_p1, %p3864_p0 }
   0x9   :  { %3872 = shalt.err (!%p3869_p2)
}
   0xa   :  { %s3873_s10 = scalar_lea.vmem %s32_s25, 8192  ;;  %p3878_p4 = scmp.lt.s32.totalorder %s32_s25, %s32_s25 }
   0xb   :  { %p3874_p3 = scmp.ne.s32.totalorder %s32_s25, %s3873_s10  ;;  %p3879_p5 = scmp.lt.s32.totalorder %s3873_s10, %s3873_s10 }
   0xd   :  { %p3880_p6 = por %p3879_p5, %p3878_p4 }
   0xf   :  { %p3881_p7 = pnand %p3880_p6, %p3874_p3 }
  0x11   :  { %3884 = shalt.err (!%p3881_p7)
}
  0x12   :  { %s4004_s11 = smov 512   ;;  %s4005_s12 = smov 32  }
  0x13   :  { %37 = dma.hbm_to_vmem [thread:$0]  %s4196_s1, 8192, %s32_s25, [#allocation7], %s4004_s11, %s4004_s11, %s4005_s12  }
  0x14   :  { %s4006_s15 = smov [#allocation9]   ;;  %s3885_s19 = scalar_lea.hbm %s4198_s3, 32768 }
  0x15   :  { %s53_s16 = sshll.u32 %s4006_s15, 4  ;;  %p3886_p8 = scmp.ne.s32.totalorder %s4198_s3, %s3885_s19  ;;  %s54_s16 = int_to_ptr.vmem [resolvable:$true] %s53_s16 }
  0x16   :  { %p3889_p9 = scmp.lt.u32.totalorder %s3885_s19, %s4198_s3 }
  0x18   :  { %p3891_p10 = pnand %p3889_p9, %p3886_p8 }
  0x1a   :  { %3894 = shalt.err (!%p3891_p10)
}
  0x1b   :  { %s3895_s24 = scalar_lea.vmem %s54_s16, 32768  ;;  %p3900_p12 = scmp.lt.s32.totalorder %s54_s16, %s54_s16 }
  0x1c   :  { %p3896_p11 = scmp.ne.s32.totalorder %s54_s16, %s3895_s24  ;;  %p3901_p13 = scmp.lt.s32.totalorder %s3895_s24, %s3895_s24 }
  0x1e   :  { %p3902_p0 = por %p3901_p13, %p3900_p12 }
  0x20   :  { %p3903_p1 = pnand %p3902_p0, %p3896_p11 }
  0x22   :  { %3906 = shalt.err (!%p3903_p1)
}
  0x23   :  { %s4007_s1 = smov 256   ;;  %s4008_s25 = smov 16  }
  0x24   :  { %59 = dma.hbm_to_vmem [thread:$0]  %s4198_s3, 32768, %s54_s16, [#allocation10], %s4007_s1, %s4007_s1, %s4008_s25  }
  0x25   :  { %s4009_s28 = smov [#allocation3]   ;;  %s4010_s30 = smov [#allocation8]  }
  0x26   :  { %s22_s29 = sshll.u32 %s4009_s28, 4  ;;  %s44_s8 = sshll.u32 %s4010_s30, 4  ;;  %s23_s29 = int_to_ptr.vmem [resolvable:$true] %s22_s29  ;;  %s45_s8 = int_to_ptr.vmem [resolvable:$true] %s44_s8 }
  0x27   :  { %s3907_s11 = scalar_lea.hbm %s4195_s0, 64 }
  0x28   :  { %p3908_p2 = scmp.ne.s32.totalorder %s4195_s0, %s3907_s11  ;;  %p3911_p3 = scmp.lt.u32.totalorder %s3907_s11, %s4195_s0 }
  0x2a   :  { %p3913_p4 = pnand %p3911_p3, %p3908_p2 }
  0x2c   :  { %3916 = shalt.err (!%p3913_p4)
}
  0x2d   :  { %s3917_s3 = scalar_lea.vmem %s23_s29, 64  ;;  %p3922_p6 = scmp.lt.s32.totalorder %s23_s29, %s23_s29 }
  0x2e   :  { %p3918_p5 = scmp.ne.s32.totalorder %s23_s29, %s3917_s3  ;;  %p3923_p7 = scmp.lt.s32.totalorder %s3917_s3, %s3917_s3 }
  0x30   :  { %p3924_p8 = por %p3923_p7, %p3922_p6 }
  0x32   :  { %p3925_p9 = pnand %p3924_p8, %p3918_p5 }
  0x34   :  { %3928 = shalt.err (!%p3925_p9)
}
  0x35   :  { %25 = dma.hbm_to_vmem [thread:$0]  %s4195_s0, 64, %s23_s29, [#allocation4]  }
  0x36   :  { %s3929_s20 = scalar_lea.hbm %s4197_s2, 128 }
  0x37   :  { %p3930_p10 = scmp.ne.s32.totalorder %s4197_s2, %s3929_s20  ;;  %p3933_p11 = scmp.lt.u32.totalorder %s3929_s20, %s4197_s2 }
  0x39   :  { %p3935_p12 = pnand %p3933_p11, %p3930_p10 }
  0x3b   :  { %3938 = shalt.err (!%p3935_p12)
}
  0x3c   :  { %s3939_s1 = scalar_lea.vmem %s45_s8, 128  ;;  %p3944_p0 = scmp.lt.s32.totalorder %s45_s8, %s45_s8 }
  0x3d   :  { %p3940_p13 = scmp.ne.s32.totalorder %s45_s8, %s3939_s1  ;;  %p3945_p1 = scmp.lt.s32.totalorder %s3939_s1, %s3939_s1 }
  0x3f   :  { %p3946_p2 = por %p3945_p1, %p3944_p0 }
  0x41   :  { %p3947_p3 = pnand %p3946_p2, %p3940_p13 }
  0x43   :  { %3950 = shalt.err (!%p3947_p3)
}
  0x44   :  { %47 = dma.hbm_to_vmem [thread:$0]  %s4197_s2, 128, %s45_s8, [#allocation7]  }
  0x45   :  { %s4011_s26 = smov [#allocation11]   ;;  %s3951_s30 = scalar_lea.hbm %s4200_s5, 4096 }
  0x46   :  { %s67_s27 = sshll.u32 %s4011_s26, 4  ;;  %p3952_p4 = scmp.ne.s32.totalorder %s4200_s5, %s3951_s30  ;;  %s68_s27 = int_to_ptr.vmem [resolvable:$true] %s67_s27 }
  0x47   :  { %p3955_p5 = scmp.lt.u32.totalorder %s3951_s30, %s4200_s5 }
  0x49   :  { %p3957_p6 = pnand %p3955_p5, %p3952_p4 }
  0x4b   :  { %3960 = shalt.err (!%p3957_p6)
}
  0x4c   :  { %s3961_s13 = scalar_lea.vmem %s68_s27, 4096  ;;  %p3966_p8 = scmp.lt.s32.totalorder %s68_s27, %s68_s27 }
  0x4d   :  { %p3962_p7 = scmp.ne.s32.totalorder %s68_s27, %s3961_s13  ;;  %p3967_p9 = scmp.lt.s32.totalorder %s3961_s13, %s3961_s13 }
  0x4f   :  { %p3968_p10 = por %p3967_p9, %p3966_p8 }
  0x51   :  { %p3969_p11 = pnand %p3968_p10, %p3962_p7 }
  0x53   :  { %3972 = shalt.err (!%p3969_p11)
}
  0x54   :  { %s4012_s2 = smov 64   ;;  %s4013_s8 = smov 4  }
  0x55   :  { %73 = dma.hbm_to_vmem [thread:$0]  %s4200_s5, 4096, %s68_s27, [#allocation10], %s4012_s2, %s4012_s2, %s4013_s8  }
  0x56   :  { %3995 = dma.done.wait [#allocation4], 64  }
  0x57   :  { %3996 = vsyncadd [#allocation4], 4294967232 }
  0x58   :  { %3997 = dma.done.wait [#allocation7], 8320  }
  0x59   :  { %3998 = vsyncadd [#allocation7], 4294958976 }
  0x5a   :  { %3999 = dma.done.wait [#allocation10], 36864  }
  0x5b   :  { %4000 = vsyncadd [#allocation10], 4294930432  ;;  %v4014_v0 = vmov 0   ;;  %v113_v1 = vld [vmem:[#allocation6] sm:$0xff]  ;;  %v114_v14 = vld [vmem:[#allocation6 + $0x8] sm:$0xff]  ;;  %s4015_s17 = smov [#allocation12]  }
  0x5c   :  { %529 = vmatprep.mubr.bf16.mxu0 %v4014_v0  ;;  %570 = vmatprep.mubr.bf16.mxu1 %v4014_v0  ;;  %v117_v2 = vld [vmem:[#allocation6 + $0x20] sm:$0xff]  ;;  %v118_v15 = vld [vmem:[#allocation6 + $0x28] sm:$0xff]  ;;  %v115_v58 = vld [vmem:[#allocation6 + $0x10] sm:$0xff]  ;;  %s2998_s18 = sshll.u32 %s4015_s17, 4  ;;  %s2999_s18 = int_to_ptr.vmem [resolvable:$true] %s2998_s18 }
  0x5d   :  { %v121_v3 = vld [vmem:[#allocation6 + $0x40] sm:$0xff]  ;;  %v3010_v4 = vcombine.high %v113_v1, %v117_v2  ;;  %v3009_v5 = vcombine.low %v113_v1, %v117_v2  ;;  %v122_v16 = vld [vmem:[#allocation6 + $0x48] sm:$0xff]  ;;  %v3012_v18 = vcombine.high %v114_v14, %v118_v15  ;;  %v3011_v19 = vcombine.low %v114_v14, %v118_v15  ;;  %v119_v59 = vld [vmem:[#allocation6 + $0x30] sm:$0xff]  ;;  %s3973_s19 = scalar_lea.vmem %s2999_s18, 128  ;;  %p3978_p13 = scmp.lt.s32.totalorder %s2999_s18, %s2999_s18 }
  0x5e   :  { %v125_v6 = vld [vmem:[#allocation6 + $0x60] sm:$0xff]  ;;  %v126_v17 = vld [vmem:[#allocation6 + $0x68] sm:$0xff]  ;;  %v3014_v1 = vcombine.high %v115_v58, %v119_v59  ;;  %v4118_v2 = vld [vmem:[#allocation3] sm:$0xf]  ;;  %p3974_p12 = scmp.ne.s32.totalorder %s2999_s18, %s3973_s19  ;;  %p3979_p0 = scmp.lt.s32.totalorder %s3973_s19, %s3973_s19 }
  0x5f   :  { %v3018_v7 = vcombine.high %v121_v3, %v125_v6  ;;  %v129_v8 = vld [vmem:[#allocation6 + $0x80] sm:$0xff]  ;;  %497 = vmatprep.subr.bf16.mxu0 %v3010_v4  ;;  %v3017_v10 = vcombine.low %v121_v3, %v125_v6  ;;  %v3020_v20 = vcombine.high %v122_v16, %v126_v17  ;;  %v130_v22 = vld [vmem:[#allocation6 + $0x88] sm:$0xff]  ;;  %538 = vmatprep.subr.bf16.mxu1 %v3012_v18  ;;  %v123_v4 = vld [vmem:[#allocation6 + $0x50] sm:$0xff] }
  0x60   :  { %v133_v9 = vld [vmem:[#allocation6 + $0xa0] sm:$0xff]  ;;  %498 = vmatpush1.bf16.msra.mxu0 %v3009_v5  ;;  %v134_v23 = vld [vmem:[#allocation6 + $0xa8] sm:$0xff]  ;;  %539 = vmatpush1.bf16.msra.mxu1 %v3011_v19  ;;  %v3019_v27 = vcombine.low %v122_v16, %v126_v17  ;;  %v127_v5 = vld [vmem:[#allocation6 + $0x70] sm:$0xff]  ;;  %p3980_p1 = por %p3979_p0, %p3978_p13 }
  0x61   :  { %499 = vmatprep.subr.bf16.mxu0 %v3018_v7  ;;  %v3026_v11 = vcombine.high %v129_v8, %v133_v9  ;;  %v137_v12 = vld [vmem:[#allocation6 + $0xc0] sm:$0xff]  ;;  %v3025_v21 = vcombine.low %v129_v8, %v133_v9  ;;  %540 = vmatprep.subr.bf16.mxu1 %v3020_v20  ;;  %v3028_v28 = vcombine.high %v130_v22, %v134_v23  ;;  %v138_v30 = vld [vmem:[#allocation6 + $0xc8] sm:$0xff]  ;;  %v116_v7 = vld [vmem:[#allocation6 + $0x18] sm:$0xff] }
  0x62   :  { %v141_v13 = vld [vmem:[#allocation6 + $0xe0] sm:$0xff]  ;;  %v142_v31 = vld [vmem:[#allocation6 + $0xe8] sm:$0xff]  ;;  %v3027_v35 = vcombine.low %v130_v22, %v134_v23  ;;  %v3013_v8 = vcombine.low %v115_v58, %v119_v59  ;;  %v120_v9 = vld [vmem:[#allocation6 + $0x38] sm:$0xff]  ;;  %v3021_v16 = vcombine.low %v123_v4, %v127_v5  ;;  %p3981_p2 = pnand %p3980_p1, %p3974_p12 }
  0x63   :  { %v3034_v24 = vcombine.high %v137_v12, %v141_v13  ;;  %v145_v25 = vld [vmem:[#allocation6 + $0x100] sm:$0xff]  ;;  %v3033_v29 = vcombine.low %v137_v12, %v141_v13  ;;  %v3036_v36 = vcombine.high %v138_v30, %v142_v31  ;;  %v146_v38 = vld [vmem:[#allocation6 + $0x108] sm:$0xff]  ;;  %v3035_v43 = vcombine.low %v138_v30, %v142_v31  ;;  %v131_v12 = vld [vmem:[#allocation6 + $0x90] sm:$0xff] }
  0x64   :  { %500 = vmatpush1.bf16.msra.mxu0 %v3017_v10  ;;  %v149_v26 = vld [vmem:[#allocation6 + $0x120] sm:$0xff]  ;;  %541 = vmatpush1.bf16.msra.mxu1 %v3019_v27  ;;  %v150_v39 = vld [vmem:[#allocation6 + $0x128] sm:$0xff]  ;;  %v3022_v10 = vcombine.high %v123_v4, %v127_v5  ;;  %v135_v13 = vld [vmem:[#allocation6 + $0xb0] sm:$0xff]  ;;  %v3016_v14 = vcombine.high %v116_v7, %v120_v9 }
  0x65   :  { %501 = vmatprep.subr.bf16.mxu0 %v3026_v11  ;;  %v3042_v32 = vcombine.high %v145_v25, %v149_v26  ;;  %v153_v33 = vld [vmem:[#allocation6 + $0x140] sm:$0xff]  ;;  %542 = vmatprep.subr.bf16.mxu1 %v3028_v28  ;;  %v3041_v37 = vcombine.low %v145_v25, %v149_v26  ;;  %v3044_v44 = vcombine.high %v146_v38, %v150_v39  ;;  %v154_v46 = vld [vmem:[#allocation6 + $0x148] sm:$0xff]  ;;  %v124_v15 = vld [vmem:[#allocation6 + $0x58] sm:$0xff] }
  0x66   :  { %v157_v34 = vld [vmem:[#allocation6 + $0x160] sm:$0xff]  ;;  %v158_v47 = vld [vmem:[#allocation6 + $0x168] sm:$0xff]  ;;  %v3043_v51 = vcombine.low %v146_v38, %v150_v39  ;;  %v128_v17 = vld [vmem:[#allocation6 + $0x78] sm:$0xff]  ;;  %v3030_v18 = vcombine.high %v131_v12, %v135_v13 }
  0x67   :  { %v3050_v40 = vcombine.high %v153_v33, %v157_v34  ;;  %v161_v41 = vld [vmem:[#allocation6 + $0x180] sm:$0xff]  ;;  %v3049_v45 = vcombine.low %v153_v33, %v157_v34  ;;  %v3052_v52 = vcombine.high %v154_v46, %v158_v47  ;;  %v162_v53 = vld [vmem:[#allocation6 + $0x188] sm:$0xff]  ;;  %v3051_v57 = vcombine.low %v154_v46, %v158_v47  ;;  %v139_v19 = vld [vmem:[#allocation6 + $0xd0] sm:$0xff] }
  0x68   :  { %502 = vmatpush1.bf16.msra.mxu0 %v3025_v21  ;;  %v165_v42 = vld [vmem:[#allocation6 + $0x1a0] sm:$0xff]  ;;  %543 = vmatpush1.bf16.msra.mxu1 %v3027_v35  ;;  %v166_v55 = vld [vmem:[#allocation6 + $0x1a8] sm:$0xff]  ;;  %v143_v20 = vld [vmem:[#allocation6 + $0xf0] sm:$0xff]  ;;  %v3015_v21 = vcombine.low %v116_v7, %v120_v9  ;;  %v3024_v22 = vcombine.high %v124_v15, %v128_v17 }
  0x69   :  { %503 = vmatprep.subr.bf16.mxu0 %v3034_v24  ;;  %544 = vmatprep.subr.bf16.mxu1 %v3036_v36  ;;  %v3058_v48 = vcombine.high %v161_v41, %v165_v42  ;;  %v169_v49 = vld [vmem:[#allocation6 + $0x1c0] sm:$0xff]  ;;  %v3057_v54 = vcombine.low %v161_v41, %v165_v42  ;;  %v3060_v60 = vcombine.high %v162_v53, %v166_v55  ;;  %v170_v61 = vld [vmem:[#allocation6 + $0x1c8] sm:$0xff]  ;;  %v132_v23 = vld [vmem:[#allocation6 + $0x98] sm:$0xff] }
  0x6a   :  { %v173_v50 = vld [vmem:[#allocation6 + $0x1e0] sm:$0xff]  ;;  %v174_v63 = vld [vmem:[#allocation6 + $0x1e8] sm:$0xff]  ;;  %v3059_v3 = vcombine.low %v162_v53, %v166_v55  ;;  %v3029_v24 = vcombine.low %v131_v12, %v135_v13  ;;  %v136_v25 = vld [vmem:[#allocation6 + $0xb8] sm:$0xff]  ;;  %v3038_v26 = vcombine.high %v139_v19, %v143_v20 }
  0x6b   :  { %v3066_v56 = vcombine.high %v169_v49, %v173_v50  ;;  %v3065_v62 = vcombine.low %v169_v49, %v173_v50  ;;  %v3068_v6 = vcombine.high %v170_v61, %v174_v63  ;;  %v3067_v11 = vcombine.low %v170_v61, %v174_v63  ;;  %v147_v27 = vld [vmem:[#allocation6 + $0x110] sm:$0xff]  ;;  %v140_v31 = vld [vmem:[#allocation6 + $0xd8] sm:$0xff] }
  0x6c   :  { %504 = vmatpush1.bf16.msra.mxu0 %v3033_v29  ;;  %545 = vmatpush1.bf16.msra.mxu1 %v3035_v43  ;;  %v151_v28 = vld [vmem:[#allocation6 + $0x130] sm:$0xff]  ;;  %v3023_v29 = vcombine.low %v124_v15, %v128_v17  ;;  %v3032_v30 = vcombine.high %v132_v23, %v136_v25  ;;  %v144_v33 = vld [vmem:[#allocation6 + $0xf8] sm:$0xff] }
  0x6d   :  { %505 = vmatprep.subr.bf16.mxu0 %v3042_v32  ;;  %546 = vmatprep.subr.bf16.mxu1 %v3044_v44  ;;  %v3037_v32 = vcombine.low %v139_v19, %v143_v20  ;;  %v3046_v34 = vcombine.high %v147_v27, %v151_v28  ;;  %v155_v35 = vld [vmem:[#allocation6 + $0x150] sm:$0xff]  ;;  %v3040_v38 = vcombine.high %v140_v31, %v144_v33  ;;  %v148_v39 = vld [vmem:[#allocation6 + $0x118] sm:$0xff] }
  0x6e   :  { %v159_v36 = vld [vmem:[#allocation6 + $0x170] sm:$0xff]  ;;  %v152_v41 = vld [vmem:[#allocation6 + $0x138] sm:$0xff]  ;;  %v3039_v44 = vcombine.low %v140_v31, %v144_v33 }
  0x6f   :  { %v163_v42 = vld [vmem:[#allocation6 + $0x190] sm:$0xff]  ;;  %v156_v46 = vld [vmem:[#allocation6 + $0x158] sm:$0xff]  ;;  %v3053_v47 = vcombine.low %v155_v35, %v159_v36 }
  0x70   :  { %506 = vmatpush1.bf16.msra.mxu0 %v3041_v37  ;;  %547 = vmatpush1.bf16.msra.mxu1 %v3043_v51  ;;  %v3031_v37 = vcombine.low %v132_v23, %v136_v25  ;;  %v167_v43 = vld [vmem:[#allocation6 + $0x1b0] sm:$0xff]  ;;  %v172_v59 = vld [vmem:[#allocation6 + $0x1d8] sm:$0xff] }
  0x71   :  { %507 = vmatprep.subr.bf16.mxu0 %v3050_v40  ;;  %548 = vmatprep.subr.bf16.mxu1 %v3052_v52  ;;  %v3045_v40 = vcombine.low %v147_v27, %v151_v28  ;;  %v3062_v49 = vcombine.high %v163_v42, %v167_v43  ;;  %v171_v50 = vld [vmem:[#allocation6 + $0x1d0] sm:$0xff]  ;;  %v3047_v52 = vcombine.low %v148_v39, %v152_v41  ;;  %v3455_v5 = vld [vmem:[#allocation9 + $0x24] ss:$16 sps:$4 sm:$0xff]   ;;  %v3459_v12 = vld [vmem:[#allocation9 + $0x40] ss:$16 sps:$4 sm:$0xff]  }
  0x72   :  { %v175_v51 = vld [vmem:[#allocation6 + $0x1f0] sm:$0xff]  ;;  %v3061_v55 = vcombine.low %v163_v42, %v167_v43  ;;  %v3461_v9 = vld [vmem:[#allocation9 + $0x44] ss:$16 sps:$4 sm:$0xff]   ;;  %v3471_v20 = vld [vmem:[#allocation9 + $0x80] ss:$16 sps:$4 sm:$0xff]  }
  0x73   :  { %v3069_v63 = vcombine.low %v171_v50, %v175_v51  ;;  %v3467_v13 = vld [vmem:[#allocation9 + $0x64] ss:$16 sps:$4 sm:$0xff]   ;;  %v3464_v15 = vld [vmem:[#allocation9 + $0x4c] ss:$16 sps:$4 sm:$0xff]   ;;  %v3474_v25 = vld [vmem:[#allocation9 + $0x88] ss:$16 sps:$4 sm:$0xff]  }
  0x74   :  { %508 = vmatpush1.bf16.msra.mxu0 %v3049_v45  ;;  %549 = vmatpush1.bf16.msra.mxu1 %v3051_v57  ;;  %v3048_v45 = vcombine.high %v148_v39, %v152_v41  ;;  %v3070_v57 = vcombine.high %v171_v50, %v175_v51  ;;  %v3473_v17 = vld [vmem:[#allocation9 + $0x84] ss:$16 sps:$4 sm:$0xff]   ;;  %v3470_v19 = vld [vmem:[#allocation9 + $0x6c] ss:$16 sps:$4 sm:$0xff]   ;;  %v3483_v27 = vld [vmem:[#allocation9 + $0xc0] ss:$16 sps:$4 sm:$0xff]  }
  0x75   :  { %509 = vmatprep.subr.bf16.mxu0 %v3058_v48  ;;  %550 = vmatprep.subr.bf16.mxu1 %v3060_v60  ;;  %v160_v48 = vld [vmem:[#allocation6 + $0x178] sm:$0xff]  ;;  %v3476_v23 = vld [vmem:[#allocation9 + $0x8c] ss:$16 sps:$4 sm:$0xff]   ;;  %v3486_v33 = vld [vmem:[#allocation9 + $0xc8] ss:$16 sps:$4 sm:$0xff]  }
  0x76   :  { %v3056_v53 = vcombine.high %v156_v46, %v160_v48  ;;  %v3055_v58 = vcombine.low %v156_v46, %v160_v48  ;;  %v176_v60 = vld [vmem:[#allocation6 + $0x1f8] sm:$0xff]  ;;  %v3498_v41 = vld [vmem:[#allocation9 + $0x108] ss:$16 sps:$4 sm:$0xff]  }
  0x77   :  { %v3072_v4 = vcombine.high %v172_v59, %v176_v60  ;;  %v3071_v7 = vcombine.low %v172_v59, %v176_v60  ;;  %v3491_v28 = vld [vmem:[#allocation9 + $0xe4] ss:$16 sps:$4 sm:$0xff]   ;;  %v3489_v31 = vld [vmem:[#allocation9 + $0xe0] ss:$16 sps:$4 sm:$0xff]   ;;  %v3510_v48 = vld [vmem:[#allocation9 + $0x148] ss:$16 sps:$4 sm:$0xff]  }
  0x78   :  { %510 = vmatpush1.bf16.msra.mxu0 %v3057_v54  ;;  %551 = vmatpush1.bf16.msra.mxu1 %v3059_v3  ;;  %v164_v54 = vld [vmem:[#allocation6 + $0x198] sm:$0xff]  ;;  %v3536_v60 = vld [vmem:[#allocation9 + $0x1cc] ss:$16 sps:$4 sm:$0xff]  }
  0x79   :  { %511 = vmatprep.subr.bf16.mxu0 %v3066_v56  ;;  %552 = vmatprep.subr.bf16.mxu1 %v3068_v6  ;;  %v168_v56 = vld [vmem:[#allocation6 + $0x1b8] sm:$0xff]  ;;  %v3452_v6 = vld [vmem:[#allocation9 + $0xc] ss:$16 sps:$4 sm:$0xff]  }
  0x7a   :  { %v3064_v61 = vcombine.high %v164_v54, %v168_v56  ;;  %v3447_v3 = vld [vmem:[#allocation9] ss:$16 sps:$4 sm:$0xff]   ;;  %v3515_v43 = vld [vmem:[#allocation9 + $0x164] ss:$16 sps:$4 sm:$0xff]  }
  0x7b   :  { %v3501_v39 = vld [vmem:[#allocation9 + $0x120] ss:$16 sps:$4 sm:$0xff]   ;;  %v3527_v51 = vld [vmem:[#allocation9 + $0x1a4] ss:$16 sps:$4 sm:$0xff]  }
  0x7c   :  { %512 = vmatpush1.bf16.msra.mxu0 %v3065_v62  ;;  %553 = vmatpush1.bf16.msra.mxu1 %v3067_v11  ;;  %v3449_v62 = vld [vmem:[#allocation9 + $0x4] ss:$16 sps:$4 sm:$0xff]   ;;  %v3458_v11 = vld [vmem:[#allocation9 + $0x2c] ss:$16 sps:$4 sm:$0xff]   ;;  %v3507_v42 = vld [vmem:[#allocation9 + $0x140] ss:$16 sps:$4 sm:$0xff]  }
  0x7d   :  { %579 = vmatprep.subr.bf16.mxu0 %v3014_v1  ;;  %620 = vmatprep.subr.bf16.mxu1 %v3016_v14  ;;  %v3063_v1 = vcombine.low %v164_v54, %v168_v56  ;;  %v3456_v14 = vld [vmem:[#allocation9 + $0x28] ss:$16 sps:$4 sm:$0xff]   ;;  %v3513_v46 = vld [vmem:[#allocation9 + $0x160] ss:$16 sps:$4 sm:$0xff]   ;;  %v3530_v56 = vld [vmem:[#allocation9 + $0x1ac] ss:$16 sps:$4 sm:$0xff]  }
  0x7e   :  { %v3519_v50 = vld [vmem:[#allocation9 + $0x180] ss:$16 sps:$4 sm:$0xff]   ;;  %v3522_v54 = vld [vmem:[#allocation9 + $0x188] ss:$16 sps:$4 sm:$0xff]  }
  0x7f   :  { %530 = vmatmul.mubr.bf16.vlgmr.msra.gmra.mrb[0].mxu0 %v4118_v2  ;;  %571 = vmatmul.mubr.bf16.vlgmr.msra.gmra.mrb[0].mxu1 %v4118_v2  ;;  %v3531_v59 = vld [vmem:[#allocation9 + $0x1c0] ss:$16 sps:$4 sm:$0xff]  }
  0x80   :  { %580 = vmatpush1.bf16.msra.mxu0 %v3013_v8  ;;  %611 = vmatprep.mubr.bf16.mxu0 %v4014_v0  ;;  %v3453_v8 = vld [vmem:[#allocation9 + $0x20] ss:$16 sps:$4 sm:$0xff]  }
  0x81   :  { %581 = vmatprep.subr.bf16.mxu0 %v3022_v10  ;;  %621 = vmatpush1.bf16.msra.mxu1 %v3015_v21  ;;  %v3450_v10 = vld [vmem:[#allocation9 + $0x8] ss:$16 sps:$4 sm:$0xff]   ;;  %v3479_v21 = vld [vmem:[#allocation9 + $0xa4] ss:$16 sps:$4 sm:$0xff]  }
  0x82   :  { %652 = vmatprep.mubr.bf16.mxu1 %v4014_v0  ;;  %622 = vmatprep.subr.bf16.mxu1 %v3024_v22  ;;  %v3054_v0 = vcombine.high %v155_v35, %v159_v36  ;;  %v3468_v22 = vld [vmem:[#allocation9 + $0x68] ss:$16 sps:$4 sm:$0xff]   ;;  %v3495_v35 = vld [vmem:[#allocation9 + $0x100] ss:$16 sps:$4 sm:$0xff]   ;;  %v3503_v36 = vld [vmem:[#allocation9 + $0x124] ss:$16 sps:$4 sm:$0xff]  }
  0x84   :  { %582 = vmatpush1.bf16.msra.mxu0 %v3021_v16  ;;  %v3465_v16 = vld [vmem:[#allocation9 + $0x60] ss:$16 sps:$4 sm:$0xff]  }
  0x85   :  { %583 = vmatprep.subr.bf16.mxu0 %v3030_v18  ;;  %623 = vmatpush1.bf16.msra.mxu1 %v3023_v29  ;;  %v3462_v18 = vld [vmem:[#allocation9 + $0x48] ss:$16 sps:$4 sm:$0xff]  }
  0x86   :  { %624 = vmatprep.subr.bf16.mxu1 %v3032_v30  ;;  %v3480_v29 = vld [vmem:[#allocation9 + $0xa8] ss:$16 sps:$4 sm:$0xff]   ;;  %v3488_v30 = vld [vmem:[#allocation9 + $0xcc] ss:$16 sps:$4 sm:$0xff]  }
  0x88   :  { %584 = vmatpush1.bf16.msra.mxu0 %v3029_v24  ;;  %v3485_v24 = vld [vmem:[#allocation9 + $0xc4] ss:$16 sps:$4 sm:$0xff]  }
  0x89   :  { %585 = vmatprep.subr.bf16.mxu0 %v3038_v26  ;;  %625 = vmatpush1.bf16.msra.mxu1 %v3031_v37  ;;  %v3482_v26 = vld [vmem:[#allocation9 + $0xac] ss:$16 sps:$4 sm:$0xff]   ;;  %v3492_v37 = vld [vmem:[#allocation9 + $0xe8] ss:$16 sps:$4 sm:$0xff]  }
  0x8a   :  { %626 = vmatprep.subr.bf16.mxu1 %v3040_v38  ;;  %v3500_v38 = vld [vmem:[#allocation9 + $0x10c] ss:$16 sps:$4 sm:$0xff]  }
  0x8c   :  { %586 = vmatpush1.bf16.msra.mxu0 %v3037_v32  ;;  %v3497_v32 = vld [vmem:[#allocation9 + $0x104] ss:$16 sps:$4 sm:$0xff]  }
  0x8d   :  { %587 = vmatprep.subr.bf16.mxu0 %v3046_v34  ;;  %627 = vmatpush1.bf16.msra.mxu1 %v3039_v44  ;;  %v3494_v34 = vld [vmem:[#allocation9 + $0xec] ss:$16 sps:$4 sm:$0xff]   ;;  %v3504_v44 = vld [vmem:[#allocation9 + $0x128] ss:$16 sps:$4 sm:$0xff]  }
  0x8e   :  { %628 = vmatprep.subr.bf16.mxu1 %v3048_v45  ;;  %v3512_v45 = vld [vmem:[#allocation9 + $0x14c] ss:$16 sps:$4 sm:$0xff]  }
  0x90   :  { %588 = vmatpush1.bf16.msra.mxu0 %v3045_v40  ;;  %v3509_v40 = vld [vmem:[#allocation9 + $0x144] ss:$16 sps:$4 sm:$0xff]  }
  0x91   :  { %589 = vmatprep.subr.bf16.mxu0 %v3054_v0  ;;  %629 = vmatpush1.bf16.msra.mxu1 %v3047_v52  ;;  %v3506_v0 = vld [vmem:[#allocation9 + $0x12c] ss:$16 sps:$4 sm:$0xff]   ;;  %v3516_v52 = vld [vmem:[#allocation9 + $0x168] ss:$16 sps:$4 sm:$0xff]  }
  0x92   :  { %630 = vmatprep.subr.bf16.mxu1 %v3056_v53  ;;  %v3524_v53 = vld [vmem:[#allocation9 + $0x18c] ss:$16 sps:$4 sm:$0xff]  }
  0x94   :  { %590 = vmatpush1.bf16.msra.mxu0 %v3053_v47  ;;  %v3521_v47 = vld [vmem:[#allocation9 + $0x184] ss:$16 sps:$4 sm:$0xff]  }
  0x95   :  { %591 = vmatprep.subr.bf16.mxu0 %v3062_v49  ;;  %631 = vmatpush1.bf16.msra.mxu1 %v3055_v58  ;;  %v3518_v49 = vld [vmem:[#allocation9 + $0x16c] ss:$16 sps:$4 sm:$0xff]   ;;  %v3528_v58 = vld [vmem:[#allocation9 + $0x1a8] ss:$16 sps:$4 sm:$0xff]  }
  0x96   :  { %632 = vmatprep.subr.bf16.mxu1 %v3064_v61  ;;  %v3539_v61 = vld [vmem:[#allocation9 + $0x1e4] ss:$16 sps:$4 sm:$0xff]  }
  0x98   :  { %592 = vmatpush1.bf16.msra.mxu0 %v3061_v55  ;;  %v3525_v55 = vld [vmem:[#allocation9 + $0x1a0] ss:$16 sps:$4 sm:$0xff]  }
  0x99   :  { %593 = vmatprep.subr.bf16.mxu0 %v3070_v57  ;;  %633 = vmatpush1.bf16.msra.mxu1 %v3063_v1  ;;  %v3533_v57 = vld [vmem:[#allocation9 + $0x1c4] ss:$16 sps:$4 sm:$0xff]   ;;  %v3542_v1 = vld [vmem:[#allocation9 + $0x1ec] ss:$16 sps:$4 sm:$0xff]  }
  0x9a   :  { %634 = vmatprep.subr.bf16.mxu1 %v3072_v4  ;;  %v3540_v4 = vld [vmem:[#allocation9 + $0x1e8] ss:$16 sps:$4 sm:$0xff]  }
  0x9c   :  { %594 = vmatpush1.bf16.msra.mxu0 %v3069_v63  ;;  %v3537_v63 = vld [vmem:[#allocation9 + $0x1e0] ss:$16 sps:$4 sm:$0xff]  }
  0x9d   :  { %2312 = vmatprep.subr.bf16.mxu0 %v3449_v62  ;;  %635 = vmatpush1.bf16.msra.mxu1 %v3071_v7  ;;  %v3534_v62 = vld [vmem:[#allocation9 + $0x1c8] ss:$16 sps:$4 sm:$0xff]  }
  0x9e   :  { %2476 = vmatprep.subr.bf16.mxu1 %v3452_v6  ;;  %v690_v6 = vlaneseq }
  0x9f   :  { %612 = vmatmul.mubr.bf16.vlgmr.msra.gmra.mrb[4].mxu0 %v4118_v2 }
  0xa0   :  { %2313 = vmatpush1.bf16.msra.mxu0 %v3447_v3  ;;  %653 = vmatmul.mubr.bf16.vlgmr.msra.gmra.mrb[4].mxu1 %v4118_v2  ;;  %v3477_v2 = vld [vmem:[#allocation9 + $0xa0] ss:$16 sps:$4 sm:$0xff]   ;;  %v3545_v3 = vld [vmem:[#allocation9 + $0x204] ss:$16 sps:$4 sm:$0xff]   ;;  %v4126_v7 = vshrl.u32 %v690_v6, 7 }
  0xa1   :  { %2314 = vmatprep.subr.bf16.mxu0 %v3455_v5  ;;  %2477 = vmatpush1.bf16.msra.mxu1 %v3450_v10  ;;  %v3548_v5 = vld [vmem:[#allocation9 + $0x20c] ss:$16 sps:$4 sm:$0xff]  }
  0xa2   :  { %2478 = vmatprep.subr.bf16.mxu1 %v3458_v11  ;;  %v696_v10 = vsub.s32 1, %v4126_v7 }
  0xa4   :  { %2315 = vmatpush1.bf16.msra.mxu0 %v3453_v8  ;;  %v692_v8 = vsub.s32 0, %v4126_v7 }
  0xa5   :  { %2316 = vmatprep.subr.bf16.mxu0 %v3461_v9  ;;  %2479 = vmatpush1.bf16.msra.mxu1 %v3456_v14  ;;  %v4129_v9 = vld [vmem:[#allocation8] sm:$0xff]  ;;  %v704_v14 = vsub.s32 3, %v4126_v7 }
  0xa6   :  { %2480 = vmatprep.subr.bf16.mxu1 %v3464_v15  ;;  %v693_v11 = vrot.slane %v4129_v9, %v692_v8 }
  0xa8   :  { %2317 = vmatpush1.bf16.msra.mxu0 %v3459_v12  ;;  %v697_v12 = vrot.slane %v4129_v9, %v696_v10 }
  0xa9   :  { %2318 = vmatprep.subr.bf16.mxu0 %v3467_v13  ;;  %2481 = vmatpush1.bf16.msra.mxu1 %v3462_v18 }
  0xaa   :  { %2482 = vmatprep.subr.bf16.mxu1 %v3470_v19 }
  0xac   :  { %2319 = vmatpush1.bf16.msra.mxu0 %v3465_v16 }
  0xad   :  { %2320 = vmatprep.subr.bf16.mxu0 %v3473_v17  ;;  %2483 = vmatpush1.bf16.msra.mxu1 %v3468_v22  ;;  %v705_v22 = vrot.slane %v4129_v9, %v704_v14 }
  0xae   :  { %2484 = vmatprep.subr.bf16.mxu1 %v3476_v23 }
  0xb0   :  { %2321 = vmatpush1.bf16.msra.mxu0 %v3471_v20 }
  0xb1   :  { %2322 = vmatprep.subr.bf16.mxu0 %v3479_v21  ;;  %2485 = vmatpush1.bf16.msra.mxu1 %v3474_v25 }
  0xb2   :  { %2486 = vmatprep.subr.bf16.mxu1 %v3482_v26 }
  0xb4   :  { %2323 = vmatpush1.bf16.msra.mxu0 %v3477_v2  ;;  %v3543_v2 = vld [vmem:[#allocation9 + $0x200] ss:$16 sps:$4 sm:$0xff]  }
  0xb5   :  { %2324 = vmatprep.subr.bf16.mxu0 %v3485_v24  ;;  %2487 = vmatpush1.bf16.msra.mxu1 %v3480_v29  ;;  %v3546_v24 = vld [vmem:[#allocation9 + $0x208] ss:$16 sps:$4 sm:$0xff]  }
  0xb6   :  { %2488 = vmatprep.subr.bf16.mxu1 %v3488_v30 }
  0xb8   :  { %2325 = vmatpush1.bf16.msra.mxu0 %v3483_v27  ;;  %v3551_v27 = vld [vmem:[#allocation9 + $0x224] ss:$16 sps:$4 sm:$0xff]  }
  0xb9   :  { %2326 = vmatprep.subr.bf16.mxu0 %v3491_v28  ;;  %2489 = vmatpush1.bf16.msra.mxu1 %v3486_v33  ;;  %v3554_v28 = vld [vmem:[#allocation9 + $0x22c] ss:$16 sps:$4 sm:$0xff]   ;;  %v3549_v33 = vld [vmem:[#allocation9 + $0x220] ss:$16 sps:$4 sm:$0xff]  }
  0xba   :  { %2490 = vmatprep.subr.bf16.mxu1 %v3494_v34  ;;  %v3552_v34 = vld [vmem:[#allocation9 + $0x228] ss:$16 sps:$4 sm:$0xff]  }
  0xbc   :  { %2327 = vmatpush1.bf16.msra.mxu0 %v3489_v31 }
  0xbd   :  { %2328 = vmatprep.subr.bf16.mxu0 %v3497_v32  ;;  %2491 = vmatpush1.bf16.msra.mxu1 %v3492_v37  ;;  %v3560_v37 = vld [vmem:[#allocation9 + $0x24c] ss:$16 sps:$4 sm:$0xff]  }
  0xbe   :  { %2492 = vmatprep.subr.bf16.mxu1 %v3500_v38 }
  0xc0   :  { %2329 = vmatpush1.bf16.msra.mxu0 %v3495_v35 }
  0xc1   :  { %2330 = vmatprep.subr.bf16.mxu0 %v3503_v36  ;;  %2493 = vmatpush1.bf16.msra.mxu1 %v3498_v41  ;;  %v3557_v36 = vld [vmem:[#allocation9 + $0x244] ss:$16 sps:$4 sm:$0xff]  }
  0xc2   :  { %2494 = vmatprep.subr.bf16.mxu1 %v3506_v0  ;;  %v3563_v41 = vld [vmem:[#allocation9 + $0x264] ss:$16 sps:$4 sm:$0xff]   ;;  %v3566_v0 = vld [vmem:[#allocation9 + $0x26c] ss:$16 sps:$4 sm:$0xff]  }
  0xc4   :  { %2331 = vmatpush1.bf16.msra.mxu0 %v3501_v39  ;;  %v3555_v39 = vld [vmem:[#allocation9 + $0x240] ss:$16 sps:$4 sm:$0xff]  }
  0xc5   :  { %2332 = vmatprep.subr.bf16.mxu0 %v3509_v40  ;;  %2495 = vmatpush1.bf16.msra.mxu1 %v3504_v44  ;;  %v3558_v40 = vld [vmem:[#allocation9 + $0x248] ss:$16 sps:$4 sm:$0xff]   ;;  %v3569_v44 = vld [vmem:[#allocation9 + $0x284] ss:$16 sps:$4 sm:$0xff]  }
  0xc6   :  { %2496 = vmatprep.subr.bf16.mxu1 %v3512_v45  ;;  %v3572_v45 = vld [vmem:[#allocation9 + $0x28c] ss:$16 sps:$4 sm:$0xff]  }
  0xc8   :  { %2333 = vmatpush1.bf16.msra.mxu0 %v3507_v42  ;;  %v3561_v42 = vld [vmem:[#allocation9 + $0x260] ss:$16 sps:$4 sm:$0xff]  }
  0xc9   :  { %2334 = vmatprep.subr.bf16.mxu0 %v3515_v43  ;;  %2497 = vmatpush1.bf16.msra.mxu1 %v3510_v48  ;;  %v3564_v43 = vld [vmem:[#allocation9 + $0x268] ss:$16 sps:$4 sm:$0xff]   ;;  %v3575_v48 = vld [vmem:[#allocation9 + $0x2a4] ss:$16 sps:$4 sm:$0xff]  }
  0xca   :  { %2498 = vmatprep.subr.bf16.mxu1 %v3518_v49  ;;  %v3578_v49 = vld [vmem:[#allocation9 + $0x2ac] ss:$16 sps:$4 sm:$0xff]  }
  0xcc   :  { %2335 = vmatpush1.bf16.msra.mxu0 %v3513_v46  ;;  %v3567_v46 = vld [vmem:[#allocation9 + $0x280] ss:$16 sps:$4 sm:$0xff]  }
  0xcd   :  { %2336 = vmatprep.subr.bf16.mxu0 %v3521_v47  ;;  %2499 = vmatpush1.bf16.msra.mxu1 %v3516_v52  ;;  %v3570_v47 = vld [vmem:[#allocation9 + $0x288] ss:$16 sps:$4 sm:$0xff]   ;;  %v3581_v52 = vld [vmem:[#allocation9 + $0x2c4] ss:$16 sps:$4 sm:$0xff]  }
  0xce   :  { %2500 = vmatprep.subr.bf16.mxu1 %v3524_v53  ;;  %v3584_v53 = vld [vmem:[#allocation9 + $0x2cc] ss:$16 sps:$4 sm:$0xff]  }
  0xd0   :  { %2337 = vmatpush1.bf16.msra.mxu0 %v3519_v50  ;;  %v3573_v50 = vld [vmem:[#allocation9 + $0x2a0] ss:$16 sps:$4 sm:$0xff]  }
  0xd1   :  { %2338 = vmatprep.subr.bf16.mxu0 %v3527_v51  ;;  %2501 = vmatpush1.bf16.msra.mxu1 %v3522_v54  ;;  %v3576_v51 = vld [vmem:[#allocation9 + $0x2a8] ss:$16 sps:$4 sm:$0xff]   ;;  %v3579_v54 = vld [vmem:[#allocation9 + $0x2c0] ss:$16 sps:$4 sm:$0xff]  }
  0xd2   :  { %2502 = vmatprep.subr.bf16.mxu1 %v3530_v56  ;;  %v3587_v56 = vld [vmem:[#allocation9 + $0x2e4] ss:$16 sps:$4 sm:$0xff]  }
  0xd4   :  { %2339 = vmatpush1.bf16.msra.mxu0 %v3525_v55  ;;  %v3582_v55 = vld [vmem:[#allocation9 + $0x2c8] ss:$16 sps:$4 sm:$0xff]  }
  0xd5   :  { %2340 = vmatprep.subr.bf16.mxu0 %v3533_v57  ;;  %2503 = vmatpush1.bf16.msra.mxu1 %v3528_v58  ;;  %v3590_v57 = vld [vmem:[#allocation9 + $0x2ec] ss:$16 sps:$4 sm:$0xff]  }
  0xd6   :  { %2504 = vmatprep.subr.bf16.mxu1 %v3536_v60  ;;  %v3585_v60 = vld [vmem:[#allocation9 + $0x2e0] ss:$16 sps:$4 sm:$0xff]  }
  0xd8   :  { %2341 = vmatpush1.bf16.msra.mxu0 %v3531_v59 }
  0xd9   :  { %2342 = vmatprep.subr.bf16.mxu0 %v3539_v61  ;;  %2505 = vmatpush1.bf16.msra.mxu1 %v3534_v62  ;;  %v3588_v61 = vld [vmem:[#allocation9 + $0x2e8] ss:$16 sps:$4 sm:$0xff]  }
  0xda   :  { %2506 = vmatprep.subr.bf16.mxu1 %v3542_v1  ;;  %v3596_v1 = vld [vmem:[#allocation9 + $0x30c] ss:$16 sps:$4 sm:$0xff]  }
  0xdc   :  { %2343 = vmatpush1.bf16.msra.mxu0 %v3537_v63  ;;  %v3593_v63 = vld [vmem:[#allocation9 + $0x304] ss:$16 sps:$4 sm:$0xff]  }
  0xdd   :  { %2353 = vmatprep.subr.bf16.mxu0 %v3545_v3  ;;  %2507 = vmatpush1.bf16.msra.mxu1 %v3540_v4  ;;  %v3591_v4 = vld [vmem:[#allocation9 + $0x300] ss:$16 sps:$4 sm:$0xff]  }
  0xde   :  { %2517 = vmatprep.subr.bf16.mxu1 %v3548_v5  ;;  %v3594_v5 = vld [vmem:[#allocation9 + $0x308] ss:$16 sps:$4 sm:$0xff]  }
 0x152   :  { %v531_v13 = vpop.f32.mrb[0].mxu0  ;;  %v4142_v25 = vpop.f32.mrb[0].mxu1 }
 0x153   :  { %v730_v15 = vadd.f32 %v693_v11, %v531_v13  ;;  %v533_v16 = vpop.f32.mrb[1].mxu0  ;;  %v574_v29 = vpop.f32.mrb[1].mxu1  ;;  %v3599_v11 = vld [vmem:[#allocation9 + $0x324] ss:$16 sps:$4 sm:$0xff]  }
 0x154   :  { %v731_v17 = vadd.f32 %v697_v12, %v533_v16  ;;  %v535_v18 = vpop.f32.mrb[2].mxu0  ;;  %v733_v30 = vadd.f32 %v705_v22, %v574_v29  ;;  %v576_v31 = vpop.f32.mrb[2].mxu1  ;;  %v3602_v12 = vld [vmem:[#allocation9 + $0x32c] ss:$16 sps:$4 sm:$0xff]   ;;  %v3606_v22 = vld [vmem:[#allocation9 + $0x348] ss:$16 sps:$4 sm:$0xff]  }
 0x155   :  { %v738_v19 = vmax.f32 %v730_v15, 0.0  ;;  %v536_v20 = vpop.f32.mrb[3].mxu0  ;;  %v577_v32 = vpop.f32.mrb[3].mxu1  ;;  %v3600_v18 = vld [vmem:[#allocation9 + $0x328] ss:$16 sps:$4 sm:$0xff]   ;;  %v700_v29 = vsub.s32 2, %v4126_v7 }
 0x156   :  { %v739_v21 = vmax.f32 %v731_v17, 0.0  ;;  %v741_v35 = vmax.f32 %v733_v30, 0.0  ;;  %v3597_v17 = vld [vmem:[#allocation9 + $0x320] ss:$16 sps:$4 sm:$0xff]   ;;  %v3608_v20 = vld [vmem:[#allocation9 + $0x34c] ss:$16 sps:$4 sm:$0xff]  }
 0x157   :  { %v746_v26 = vpack.c.bf16 %v738_v19, %v738_v19  ;;  %v3605_v19 = vld [vmem:[#allocation9 + $0x344] ss:$16 sps:$4 sm:$0xff]   ;;  %v3615_v30 = vld [vmem:[#allocation9 + $0x380] ss:$16 sps:$4 sm:$0xff]   ;;  %v3618_v31 = vld [vmem:[#allocation9 + $0x388] ss:$16 sps:$4 sm:$0xff]  }
 0x158   :  { %v747_v23 = vpack.c.bf16 %v739_v21, %v739_v21  ;;  %v749_v38 = vpack.c.bf16 %v741_v35, %v741_v35  ;;  %v3603_v21 = vld [vmem:[#allocation9 + $0x340] ss:$16 sps:$4 sm:$0xff]   ;;  %v3623_v32 = vld [vmem:[#allocation9 + $0x3a4] ss:$16 sps:$4 sm:$0xff]   ;;  %v701_v35 = vrot.slane %v4129_v9, %v700_v29 }
 0x15a   :  { %2344 = vmatprep.mubr.bf16.mxu0 %v747_v23  ;;  %2508 = vmatprep.mubr.bf16.mxu1 %v747_v23  ;;  %v3611_v23 = vld [vmem:[#allocation9 + $0x364] ss:$16 sps:$4 sm:$0xff]  }
 0x15b   :  { %2345 = vmatmul.mubr.bf16.vlgmr.msra.gmra.mrb[8].mxu0 %v746_v26  ;;  %2509 = vmatmul.mubr.bf16.vlgmr.msra.gmra.mrb[8].mxu1 %v746_v26  ;;  %v3612_v26 = vld [vmem:[#allocation9 + $0x368] ss:$16 sps:$4 sm:$0xff]  }
 0x15c   :  { %2354 = vmatpush1.bf16.msra.mxu0 %v3543_v2  ;;  %2518 = vmatpush1.bf16.msra.mxu1 %v3546_v24  ;;  %v3614_v2 = vld [vmem:[#allocation9 + $0x36c] ss:$16 sps:$4 sm:$0xff]   ;;  %v3609_v24 = vld [vmem:[#allocation9 + $0x360] ss:$16 sps:$4 sm:$0xff]  }
 0x15d   :  { %2355 = vmatprep.subr.bf16.mxu0 %v3551_v27  ;;  %2519 = vmatprep.subr.bf16.mxu1 %v3554_v28  ;;  %v3617_v27 = vld [vmem:[#allocation9 + $0x384] ss:$16 sps:$4 sm:$0xff]   ;;  %v3620_v28 = vld [vmem:[#allocation9 + $0x38c] ss:$16 sps:$4 sm:$0xff]  }
 0x15e   :  { %2385 = vmatprep.mubr.bf16.mxu0 %v749_v38  ;;  %2549 = vmatprep.mubr.bf16.mxu1 %v749_v38  ;;  %v3629_v38 = vld [vmem:[#allocation9 + $0x3c4] ss:$16 sps:$4 sm:$0xff]  }
 0x160   :  { %2356 = vmatpush1.bf16.msra.mxu0 %v3549_v33  ;;  %2520 = vmatpush1.bf16.msra.mxu1 %v3552_v34  ;;  %v3626_v33 = vld [vmem:[#allocation9 + $0x3ac] ss:$16 sps:$4 sm:$0xff]   ;;  %v712_v34 = vsub.s32 5, %v4126_v7 }
 0x161   :  { %2357 = vmatprep.subr.bf16.mxu0 %v3557_v36  ;;  %2521 = vmatprep.subr.bf16.mxu1 %v3560_v37  ;;  %v3621_v36 = vld [vmem:[#allocation9 + $0x3a0] ss:$16 sps:$4 sm:$0xff]   ;;  %v3624_v37 = vld [vmem:[#allocation9 + $0x3a8] ss:$16 sps:$4 sm:$0xff]  }
 0x164   :  { %2358 = vmatpush1.bf16.msra.mxu0 %v3555_v39  ;;  %2522 = vmatpush1.bf16.msra.mxu1 %v3558_v40  ;;  %v3632_v39 = vld [vmem:[#allocation9 + $0x3cc] ss:$16 sps:$4 sm:$0xff]   ;;  %v713_v40 = vrot.slane %v4129_v9, %v712_v34  ;;  %v3695_v34 = vld [vmem:[#allocation9 + $0x524] ss:$16 sps:$4 sm:$0xff]  }
 0x165   :  { %2359 = vmatprep.subr.bf16.mxu0 %v3563_v41  ;;  %2523 = vmatprep.subr.bf16.mxu1 %v3566_v0  ;;  %v732_v41 = vadd.f32 %v701_v35, %v4142_v25  ;;  %v3627_v0 = vld [vmem:[#allocation9 + $0x3c0] ss:$16 sps:$4 sm:$0xff]   ;;  %v3698_v35 = vld [vmem:[#allocation9 + $0x52c] ss:$16 sps:$4 sm:$0xff]  }
 0x168   :  { %2360 = vmatpush1.bf16.msra.mxu0 %v3561_v42  ;;  %2524 = vmatpush1.bf16.msra.mxu1 %v3564_v43  ;;  %v3630_v42 = vld [vmem:[#allocation9 + $0x3c8] ss:$16 sps:$4 sm:$0xff]   ;;  %v3635_v43 = vld [vmem:[#allocation9 + $0x3e4] ss:$16 sps:$4 sm:$0xff]  }
 0x169   :  { %2361 = vmatprep.subr.bf16.mxu0 %v3569_v44  ;;  %2525 = vmatprep.subr.bf16.mxu1 %v3572_v45  ;;  %v3638_v44 = vld [vmem:[#allocation9 + $0x3ec] ss:$16 sps:$4 sm:$0xff]  }
 0x16c   :  { %2362 = vmatpush1.bf16.msra.mxu0 %v3567_v46  ;;  %2526 = vmatpush1.bf16.msra.mxu1 %v3570_v47  ;;  %v740_v46 = vmax.f32 %v732_v41, 0.0  ;;  %v3633_v47 = vld [vmem:[#allocation9 + $0x3e0] ss:$16 sps:$4 sm:$0xff]   ;;  %v3702_v41 = vld [vmem:[#allocation9 + $0x548] ss:$16 sps:$4 sm:$0xff]  }
 0x16d   :  { %2363 = vmatprep.subr.bf16.mxu0 %v3575_v48  ;;  %2527 = vmatprep.subr.bf16.mxu1 %v3578_v49  ;;  %v3636_v48 = vld [vmem:[#allocation9 + $0x3e8] ss:$16 sps:$4 sm:$0xff]   ;;  %v3641_v49 = vld [vmem:[#allocation9 + $0x404] ss:$16 sps:$4 sm:$0xff]  }
 0x170   :  { %2364 = vmatpush1.bf16.msra.mxu0 %v3573_v50  ;;  %2528 = vmatpush1.bf16.msra.mxu1 %v3576_v51  ;;  %v3644_v50 = vld [vmem:[#allocation9 + $0x40c] ss:$16 sps:$4 sm:$0xff]   ;;  %v748_v51 = vpack.c.bf16 %v740_v46, %v740_v46 }
 0x171   :  { %2365 = vmatprep.subr.bf16.mxu0 %v3581_v52  ;;  %2529 = vmatprep.subr.bf16.mxu1 %v3584_v53  ;;  %v3639_v52 = vld [vmem:[#allocation9 + $0x400] ss:$16 sps:$4 sm:$0xff]   ;;  %v3642_v53 = vld [vmem:[#allocation9 + $0x408] ss:$16 sps:$4 sm:$0xff]   ;;  %v3716_v46 = vld [vmem:[#allocation9 + $0x58c] ss:$16 sps:$4 sm:$0xff]  }
 0x172   :  { %v4144_v58 = vpop.f32.mrb[4].mxu0 }
 0x173   :  { %v4146_v59 = vpop.f32.mrb[5].mxu0  ;;  %v4148_v6 = vpop.f32.mrb[4].mxu1 }
 0x174   :  { %2366 = vmatpush1.bf16.msra.mxu0 %v3579_v54  ;;  %2530 = vmatpush1.bf16.msra.mxu1 %v3582_v55  ;;  %v617_v62 = vpop.f32.mrb[6].mxu0  ;;  %v4150_v13 = vpop.f32.mrb[5].mxu1  ;;  %v735_v45 = vadd.f32 %v713_v40, %v4146_v59  ;;  %v3647_v54 = vld [vmem:[#allocation9 + $0x424] ss:$16 sps:$4 sm:$0xff]   ;;  %v3650_v55 = vld [vmem:[#allocation9 + $0x42c] ss:$16 sps:$4 sm:$0xff]  }
 0x175   :  { %2367 = vmatprep.subr.bf16.mxu0 %v3587_v56  ;;  %2531 = vmatprep.subr.bf16.mxu1 %v3590_v57  ;;  %v618_v3 = vpop.f32.mrb[7].mxu0  ;;  %v658_v15 = vpop.f32.mrb[6].mxu1  ;;  %v3645_v57 = vld [vmem:[#allocation9 + $0x420] ss:$16 sps:$4 sm:$0xff]   ;;  %v3648_v59 = vld [vmem:[#allocation9 + $0x428] ss:$16 sps:$4 sm:$0xff]  }
 0x176   :  { %v659_v16 = vpop.f32.mrb[7].mxu1  ;;  %v743_v25 = vmax.f32 %v735_v45, 0.0  ;;  %v3651_v62 = vld [vmem:[#allocation9 + $0x440] ss:$16 sps:$4 sm:$0xff]   ;;  %v3662_v3 = vld [vmem:[#allocation9 + $0x46c] ss:$16 sps:$4 sm:$0xff]  }
 0x177   :  { %v3663_v15 = vld [vmem:[#allocation9 + $0x480] ss:$16 sps:$4 sm:$0xff]   ;;  %v3666_v16 = vld [vmem:[#allocation9 + $0x488] ss:$16 sps:$4 sm:$0xff]   ;;  %v3713_v45 = vld [vmem:[#allocation9 + $0x584] ss:$16 sps:$4 sm:$0xff]  }
 0x178   :  { %2368 = vmatpush1.bf16.msra.mxu0 %v3585_v60  ;;  %2532 = vmatpush1.bf16.msra.mxu1 %v3588_v61  ;;  %v751_v56 = vpack.c.bf16 %v743_v25, %v743_v25  ;;  %v3653_v60 = vld [vmem:[#allocation9 + $0x444] ss:$16 sps:$4 sm:$0xff]   ;;  %v3656_v61 = vld [vmem:[#allocation9 + $0x44c] ss:$16 sps:$4 sm:$0xff]   ;;  %v3699_v40 = vld [vmem:[#allocation9 + $0x540] ss:$16 sps:$4 sm:$0xff]  }
 0x179   :  { %2369 = vmatprep.subr.bf16.mxu0 %v3593_v63  ;;  %2533 = vmatprep.subr.bf16.mxu1 %v3596_v1  ;;  %v3654_v63 = vld [vmem:[#allocation9 + $0x448] ss:$16 sps:$4 sm:$0xff]   ;;  %v3659_v1 = vld [vmem:[#allocation9 + $0x464] ss:$16 sps:$4 sm:$0xff]   ;;  %v3722_v25 = vld [vmem:[#allocation9 + $0x5ac] ss:$16 sps:$4 sm:$0xff]  }
 0x17c   :  { %2370 = vmatpush1.bf16.msra.mxu0 %v3591_v4  ;;  %2534 = vmatpush1.bf16.msra.mxu1 %v3594_v5  ;;  %v3657_v4 = vld [vmem:[#allocation9 + $0x460] ss:$16 sps:$4 sm:$0xff]   ;;  %v3660_v5 = vld [vmem:[#allocation9 + $0x468] ss:$16 sps:$4 sm:$0xff]  }
 0x17d   :  { %2371 = vmatprep.subr.bf16.mxu0 %v3599_v11  ;;  %2535 = vmatprep.subr.bf16.mxu1 %v3602_v12  ;;  %v3665_v11 = vld [vmem:[#allocation9 + $0x484] ss:$16 sps:$4 sm:$0xff]   ;;  %v3668_v12 = vld [vmem:[#allocation9 + $0x48c] ss:$16 sps:$4 sm:$0xff]  }
 0x180   :  { %2372 = vmatpush1.bf16.msra.mxu0 %v3597_v17  ;;  %2536 = vmatpush1.bf16.msra.mxu1 %v3600_v18  ;;  %v3671_v17 = vld [vmem:[#allocation9 + $0x4a4] ss:$16 sps:$4 sm:$0xff]   ;;  %v3674_v18 = vld [vmem:[#allocation9 + $0x4ac] ss:$16 sps:$4 sm:$0xff]  }
 0x181   :  { %2373 = vmatprep.subr.bf16.mxu0 %v3605_v19  ;;  %2537 = vmatprep.subr.bf16.mxu1 %v3608_v20  ;;  %v3669_v19 = vld [vmem:[#allocation9 + $0x4a0] ss:$16 sps:$4 sm:$0xff]   ;;  %v3672_v20 = vld [vmem:[#allocation9 + $0x4a8] ss:$16 sps:$4 sm:$0xff]  }
 0x184   :  { %2374 = vmatpush1.bf16.msra.mxu0 %v3603_v21  ;;  %2538 = vmatpush1.bf16.msra.mxu1 %v3606_v22  ;;  %v3677_v21 = vld [vmem:[#allocation9 + $0x4c4] ss:$16 sps:$4 sm:$0xff]   ;;  %v3680_v22 = vld [vmem:[#allocation9 + $0x4cc] ss:$16 sps:$4 sm:$0xff]  }
 0x185   :  { %2375 = vmatprep.subr.bf16.mxu0 %v3611_v23  ;;  %2539 = vmatprep.subr.bf16.mxu1 %v3614_v2  ;;  %v3675_v23 = vld [vmem:[#allocation9 + $0x4c0] ss:$16 sps:$4 sm:$0xff]   ;;  %v3678_v2 = vld [vmem:[#allocation9 + $0x4c8] ss:$16 sps:$4 sm:$0xff]  }
 0x188   :  { %2376 = vmatpush1.bf16.msra.mxu0 %v3609_v24  ;;  %2540 = vmatpush1.bf16.msra.mxu1 %v3612_v26  ;;  %v3683_v24 = vld [vmem:[#allocation9 + $0x4e4] ss:$16 sps:$4 sm:$0xff]   ;;  %v3686_v26 = vld [vmem:[#allocation9 + $0x4ec] ss:$16 sps:$4 sm:$0xff]  }
 0x189   :  { %2377 = vmatprep.subr.bf16.mxu0 %v3617_v27  ;;  %2541 = vmatprep.subr.bf16.mxu1 %v3620_v28  ;;  %v3681_v27 = vld [vmem:[#allocation9 + $0x4e0] ss:$16 sps:$4 sm:$0xff]   ;;  %v3684_v28 = vld [vmem:[#allocation9 + $0x4e8] ss:$16 sps:$4 sm:$0xff]  }
 0x18c   :  { %2378 = vmatpush1.bf16.msra.mxu0 %v3615_v30  ;;  %2542 = vmatpush1.bf16.msra.mxu1 %v3618_v31  ;;  %v3689_v30 = vld [vmem:[#allocation9 + $0x504] ss:$16 sps:$4 sm:$0xff]   ;;  %v3692_v31 = vld [vmem:[#allocation9 + $0x50c] ss:$16 sps:$4 sm:$0xff]  }
 0x18d   :  { %2379 = vmatprep.subr.bf16.mxu0 %v3623_v32  ;;  %2543 = vmatprep.subr.bf16.mxu1 %v3626_v33  ;;  %v3687_v32 = vld [vmem:[#allocation9 + $0x500] ss:$16 sps:$4 sm:$0xff]   ;;  %v3690_v33 = vld [vmem:[#allocation9 + $0x508] ss:$16 sps:$4 sm:$0xff]  }
 0x190   :  { %2380 = vmatpush1.bf16.msra.mxu0 %v3621_v36  ;;  %2544 = vmatpush1.bf16.msra.mxu1 %v3624_v37  ;;  %v3693_v36 = vld [vmem:[#allocation9 + $0x520] ss:$16 sps:$4 sm:$0xff]   ;;  %v3696_v37 = vld [vmem:[#allocation9 + $0x528] ss:$16 sps:$4 sm:$0xff]  }
 0x191   :  { %2381 = vmatprep.subr.bf16.mxu0 %v3629_v38  ;;  %2545 = vmatprep.subr.bf16.mxu1 %v3632_v39  ;;  %v3701_v38 = vld [vmem:[#allocation9 + $0x544] ss:$16 sps:$4 sm:$0xff]   ;;  %v3704_v39 = vld [vmem:[#allocation9 + $0x54c] ss:$16 sps:$4 sm:$0xff]  }
 0x194   :  { %2382 = vmatpush1.bf16.msra.mxu0 %v3627_v0  ;;  %2546 = vmatpush1.bf16.msra.mxu1 %v3630_v42  ;;  %v3707_v0 = vld [vmem:[#allocation9 + $0x564] ss:$16 sps:$4 sm:$0xff]   ;;  %v3710_v42 = vld [vmem:[#allocation9 + $0x56c] ss:$16 sps:$4 sm:$0xff]  }
 0x195   :  { %2383 = vmatprep.subr.bf16.mxu0 %v3635_v43  ;;  %2547 = vmatprep.subr.bf16.mxu1 %v3638_v44  ;;  %v3705_v43 = vld [vmem:[#allocation9 + $0x560] ss:$16 sps:$4 sm:$0xff]   ;;  %v3708_v44 = vld [vmem:[#allocation9 + $0x568] ss:$16 sps:$4 sm:$0xff]  }
 0x198   :  { %2384 = vmatpush1.bf16.msra.mxu0 %v3633_v47  ;;  %2548 = vmatpush1.bf16.msra.mxu1 %v3636_v48  ;;  %v708_v47 = vsub.s32 4, %v4126_v7  ;;  %v3711_v48 = vld [vmem:[#allocation9 + $0x580] ss:$16 sps:$4 sm:$0xff]  }
 0x199   :  { %2394 = vmatprep.subr.bf16.mxu0 %v3641_v49  ;;  %2558 = vmatprep.subr.bf16.mxu1 %v3644_v50  ;;  %v3714_v49 = vld [vmem:[#allocation9 + $0x588] ss:$16 sps:$4 sm:$0xff]   ;;  %v3719_v50 = vld [vmem:[#allocation9 + $0x5a4] ss:$16 sps:$4 sm:$0xff]  }
 0x19b   :  { %2386 = vmatmul.mubr.bf16.vlgmr.msra.gmra.mrb[8].mxu0 %v748_v51  ;;  %2550 = vmatmul.mubr.bf16.vlgmr.msra.gmra.mrb[8].mxu1 %v748_v51  ;;  %v720_v51 = vsub.s32 7, %v4126_v7 }
 0x19c   :  { %2395 = vmatpush1.bf16.msra.mxu0 %v3639_v52  ;;  %2559 = vmatpush1.bf16.msra.mxu1 %v3642_v53  ;;  %v709_v52 = vrot.slane %v4129_v9, %v708_v47  ;;  %v3717_v53 = vld [vmem:[#allocation9 + $0x5a0] ss:$16 sps:$4 sm:$0xff]   ;;  %v3788_v47 = vld [vmem:[#allocation9 + $0x70c] ss:$16 sps:$4 sm:$0xff]  }
 0x19d   :  { %2396 = vmatprep.subr.bf16.mxu0 %v3647_v54  ;;  %2560 = vmatprep.subr.bf16.mxu1 %v3650_v55  ;;  %v3720_v54 = vld [vmem:[#allocation9 + $0x5a8] ss:$16 sps:$4 sm:$0xff]   ;;  %v3725_v55 = vld [vmem:[#allocation9 + $0x5c4] ss:$16 sps:$4 sm:$0xff]  }
 0x19e   :  { %2426 = vmatprep.mubr.bf16.mxu0 %v751_v56  ;;  %2590 = vmatprep.mubr.bf16.mxu1 %v751_v56  ;;  %v3728_v56 = vld [vmem:[#allocation9 + $0x5cc] ss:$16 sps:$4 sm:$0xff]  }
 0x1a0   :  { %2397 = vmatpush1.bf16.msra.mxu0 %v3645_v57  ;;  %2561 = vmatpush1.bf16.msra.mxu1 %v3648_v59  ;;  %v721_v57 = vrot.slane %v4129_v9, %v720_v51  ;;  %v734_v59 = vadd.f32 %v709_v52, %v4144_v58  ;;  %v3789_v51 = vld [vmem:[#allocation9 + $0x720] ss:$16 sps:$4 sm:$0xff]   ;;  %v3792_v52 = vld [vmem:[#allocation9 + $0x728] ss:$16 sps:$4 sm:$0xff]  }
 0x1a1   :  { %2398 = vmatprep.subr.bf16.mxu0 %v3653_v60  ;;  %2562 = vmatprep.subr.bf16.mxu1 %v3656_v61  ;;  %v3723_v60 = vld [vmem:[#allocation9 + $0x5c0] ss:$16 sps:$4 sm:$0xff]   ;;  %v3726_v61 = vld [vmem:[#allocation9 + $0x5c8] ss:$16 sps:$4 sm:$0xff]  }
 0x1a4   :  { %2399 = vmatpush1.bf16.msra.mxu0 %v3651_v62  ;;  %2563 = vmatpush1.bf16.msra.mxu1 %v3654_v63  ;;  %v3731_v62 = vld [vmem:[#allocation9 + $0x5e4] ss:$16 sps:$4 sm:$0xff]   ;;  %v3734_v63 = vld [vmem:[#allocation9 + $0x5ec] ss:$16 sps:$4 sm:$0xff]  }
 0x1a5   :  { %2400 = vmatprep.subr.bf16.mxu0 %v3659_v1  ;;  %2564 = vmatprep.subr.bf16.mxu1 %v3662_v3  ;;  %v737_v1 = vadd.f32 %v721_v57, %v4150_v13  ;;  %v742_v3 = vmax.f32 %v734_v59, 0.0  ;;  %v3803_v57 = vld [vmem:[#allocation9 + $0x764] ss:$16 sps:$4 sm:$0xff]   ;;  %v3806_v59 = vld [vmem:[#allocation9 + $0x76c] ss:$16 sps:$4 sm:$0xff]  }
 0x1a7   :  { %v745_v58 = vmax.f32 %v737_v1, 0.0  ;;  %v3807_v1 = vld [vmem:[#allocation9 + $0x780] ss:$16 sps:$4 sm:$0xff]  }
 0x1a8   :  { %2401 = vmatpush1.bf16.msra.mxu0 %v3657_v4  ;;  %2565 = vmatpush1.bf16.msra.mxu1 %v3660_v5  ;;  %v3729_v4 = vld [vmem:[#allocation9 + $0x5e0] ss:$16 sps:$4 sm:$0xff]   ;;  %v3732_v5 = vld [vmem:[#allocation9 + $0x5e8] ss:$16 sps:$4 sm:$0xff]  }
 0x1a9   :  { %2402 = vmatprep.subr.bf16.mxu0 %v3665_v11  ;;  %2566 = vmatprep.subr.bf16.mxu1 %v3668_v12  ;;  %v3737_v11 = vld [vmem:[#allocation9 + $0x604] ss:$16 sps:$4 sm:$0xff]   ;;  %v3740_v12 = vld [vmem:[#allocation9 + $0x60c] ss:$16 sps:$4 sm:$0xff]   ;;  %v753_v13 = vpack.c.bf16 %v745_v58, %v745_v58  ;;  %v3816_v58 = vld [vmem:[#allocation9 + $0x7a8] ss:$16 sps:$4 sm:$0xff]  }
 0x1ac   :  { %2403 = vmatpush1.bf16.msra.mxu0 %v3663_v15  ;;  %2567 = vmatpush1.bf16.msra.mxu1 %v3666_v16  ;;  %v750_v15 = vpack.c.bf16 %v742_v3, %v742_v3  ;;  %v3735_v16 = vld [vmem:[#allocation9 + $0x600] ss:$16 sps:$4 sm:$0xff]   ;;  %v3810_v3 = vld [vmem:[#allocation9 + $0x788] ss:$16 sps:$4 sm:$0xff]  }
 0x1ad   :  { %2404 = vmatprep.subr.bf16.mxu0 %v3671_v17  ;;  %2568 = vmatprep.subr.bf16.mxu1 %v3674_v18  ;;  %v3738_v17 = vld [vmem:[#allocation9 + $0x608] ss:$16 sps:$4 sm:$0xff]   ;;  %v3743_v18 = vld [vmem:[#allocation9 + $0x624] ss:$16 sps:$4 sm:$0xff]  }
 0x1b0   :  { %2405 = vmatpush1.bf16.msra.mxu0 %v3669_v19  ;;  %2569 = vmatpush1.bf16.msra.mxu1 %v3672_v20  ;;  %v3746_v19 = vld [vmem:[#allocation9 + $0x62c] ss:$16 sps:$4 sm:$0xff]   ;;  %v3741_v20 = vld [vmem:[#allocation9 + $0x620] ss:$16 sps:$4 sm:$0xff]  }
 0x1b1   :  { %2406 = vmatprep.subr.bf16.mxu0 %v3677_v21  ;;  %2570 = vmatprep.subr.bf16.mxu1 %v3680_v22  ;;  %v3744_v21 = vld [vmem:[#allocation9 + $0x628] ss:$16 sps:$4 sm:$0xff]   ;;  %v3749_v22 = vld [vmem:[#allocation9 + $0x644] ss:$16 sps:$4 sm:$0xff]  }
 0x1b4   :  { %2407 = vmatpush1.bf16.msra.mxu0 %v3675_v23  ;;  %2571 = vmatpush1.bf16.msra.mxu1 %v3678_v2  ;;  %v3752_v23 = vld [vmem:[#allocation9 + $0x64c] ss:$16 sps:$4 sm:$0xff]   ;;  %v3747_v2 = vld [vmem:[#allocation9 + $0x640] ss:$16 sps:$4 sm:$0xff]  }
 0x1b5   :  { %2408 = vmatprep.subr.bf16.mxu0 %v3683_v24  ;;  %2572 = vmatprep.subr.bf16.mxu1 %v3686_v26  ;;  %v3750_v24 = vld [vmem:[#allocation9 + $0x648] ss:$16 sps:$4 sm:$0xff]   ;;  %v3755_v26 = vld [vmem:[#allocation9 + $0x664] ss:$16 sps:$4 sm:$0xff]  }
 0x1b8   :  { %2409 = vmatpush1.bf16.msra.mxu0 %v3681_v27  ;;  %2573 = vmatpush1.bf16.msra.mxu1 %v3684_v28  ;;  %v3758_v27 = vld [vmem:[#allocation9 + $0x66c] ss:$16 sps:$4 sm:$0xff]   ;;  %v3753_v28 = vld [vmem:[#allocation9 + $0x660] ss:$16 sps:$4 sm:$0xff]  }
 0x1b9   :  { %2410 = vmatprep.subr.bf16.mxu0 %v3689_v30  ;;  %2574 = vmatprep.subr.bf16.mxu1 %v3692_v31  ;;  %v3756_v30 = vld [vmem:[#allocation9 + $0x668] ss:$16 sps:$4 sm:$0xff]   ;;  %v3761_v31 = vld [vmem:[#allocation9 + $0x684] ss:$16 sps:$4 sm:$0xff]  }
 0x1bc   :  { %2411 = vmatpush1.bf16.msra.mxu0 %v3687_v32  ;;  %2575 = vmatpush1.bf16.msra.mxu1 %v3690_v33  ;;  %v3764_v32 = vld [vmem:[#allocation9 + $0x68c] ss:$16 sps:$4 sm:$0xff]   ;;  %v3759_v33 = vld [vmem:[#allocation9 + $0x680] ss:$16 sps:$4 sm:$0xff]  }
 0x1bd   :  { %2412 = vmatprep.subr.bf16.mxu0 %v3695_v34  ;;  %2576 = vmatprep.subr.bf16.mxu1 %v3698_v35  ;;  %v3762_v34 = vld [vmem:[#allocation9 + $0x688] ss:$16 sps:$4 sm:$0xff]   ;;  %v3767_v35 = vld [vmem:[#allocation9 + $0x6a4] ss:$16 sps:$4 sm:$0xff]  }
 0x1c0   :  { %2413 = vmatpush1.bf16.msra.mxu0 %v3693_v36  ;;  %2577 = vmatpush1.bf16.msra.mxu1 %v3696_v37  ;;  %v3770_v36 = vld [vmem:[#allocation9 + $0x6ac] ss:$16 sps:$4 sm:$0xff]   ;;  %v3765_v37 = vld [vmem:[#allocation9 + $0x6a0] ss:$16 sps:$4 sm:$0xff]  }
 0x1c1   :  { %2414 = vmatprep.subr.bf16.mxu0 %v3701_v38  ;;  %2578 = vmatprep.subr.bf16.mxu1 %v3704_v39  ;;  %v3768_v38 = vld [vmem:[#allocation9 + $0x6a8] ss:$16 sps:$4 sm:$0xff]   ;;  %v3773_v39 = vld [vmem:[#allocation9 + $0x6c4] ss:$16 sps:$4 sm:$0xff]  }
 0x1c4   :  { %2415 = vmatpush1.bf16.msra.mxu0 %v3699_v40  ;;  %2579 = vmatpush1.bf16.msra.mxu1 %v3702_v41  ;;  %v3776_v40 = vld [vmem:[#allocation9 + $0x6cc] ss:$16 sps:$4 sm:$0xff]   ;;  %v3771_v41 = vld [vmem:[#allocation9 + $0x6c0] ss:$16 sps:$4 sm:$0xff]  }
 0x1c5   :  { %2416 = vmatprep.subr.bf16.mxu0 %v3707_v0  ;;  %2580 = vmatprep.subr.bf16.mxu1 %v3710_v42  ;;  %v3774_v0 = vld [vmem:[#allocation9 + $0x6c8] ss:$16 sps:$4 sm:$0xff]   ;;  %v3779_v42 = vld [vmem:[#allocation9 + $0x6e4] ss:$16 sps:$4 sm:$0xff]  }
 0x1c8   :  { %2417 = vmatpush1.bf16.msra.mxu0 %v3705_v43  ;;  %2581 = vmatpush1.bf16.msra.mxu1 %v3708_v44  ;;  %v3782_v43 = vld [vmem:[#allocation9 + $0x6ec] ss:$16 sps:$4 sm:$0xff]   ;;  %v3777_v44 = vld [vmem:[#allocation9 + $0x6e0] ss:$16 sps:$4 sm:$0xff]  }
 0x1c9   :  { %2418 = vmatprep.subr.bf16.mxu0 %v3713_v45  ;;  %2582 = vmatprep.subr.bf16.mxu1 %v3716_v46  ;;  %v3780_v45 = vld [vmem:[#allocation9 + $0x6e8] ss:$16 sps:$4 sm:$0xff]   ;;  %v3785_v46 = vld [vmem:[#allocation9 + $0x704] ss:$16 sps:$4 sm:$0xff]  }
 0x1cc   :  { %2419 = vmatpush1.bf16.msra.mxu0 %v3711_v48  ;;  %2583 = vmatpush1.bf16.msra.mxu1 %v3714_v49  ;;  %v3783_v48 = vld [vmem:[#allocation9 + $0x700] ss:$16 sps:$4 sm:$0xff]   ;;  %v3786_v49 = vld [vmem:[#allocation9 + $0x708] ss:$16 sps:$4 sm:$0xff]  }
 0x1cd   :  { %2420 = vmatprep.subr.bf16.mxu0 %v3719_v50  ;;  %2584 = vmatprep.subr.bf16.mxu1 %v3722_v25  ;;  %v3791_v50 = vld [vmem:[#allocation9 + $0x724] ss:$16 sps:$4 sm:$0xff]   ;;  %v3794_v25 = vld [vmem:[#allocation9 + $0x72c] ss:$16 sps:$4 sm:$0xff]  }
 0x1d0   :  { %2421 = vmatpush1.bf16.msra.mxu0 %v3717_v53  ;;  %2585 = vmatpush1.bf16.msra.mxu1 %v3720_v54  ;;  %v3797_v53 = vld [vmem:[#allocation9 + $0x744] ss:$16 sps:$4 sm:$0xff]   ;;  %v3800_v54 = vld [vmem:[#allocation9 + $0x74c] ss:$16 sps:$4 sm:$0xff]  }
 0x1d1   :  { %2422 = vmatprep.subr.bf16.mxu0 %v3725_v55  ;;  %2586 = vmatprep.subr.bf16.mxu1 %v3728_v56  ;;  %v3795_v55 = vld [vmem:[#allocation9 + $0x740] ss:$16 sps:$4 sm:$0xff]   ;;  %v3798_v56 = vld [vmem:[#allocation9 + $0x748] ss:$16 sps:$4 sm:$0xff]  }
 0x1d4   :  { %2423 = vmatpush1.bf16.msra.mxu0 %v3723_v60  ;;  %2587 = vmatpush1.bf16.msra.mxu1 %v3726_v61  ;;  %v3801_v60 = vld [vmem:[#allocation9 + $0x760] ss:$16 sps:$4 sm:$0xff]   ;;  %v3804_v61 = vld [vmem:[#allocation9 + $0x768] ss:$16 sps:$4 sm:$0xff]  }
 0x1d5   :  { %2424 = vmatprep.subr.bf16.mxu0 %v3731_v62  ;;  %2588 = vmatprep.subr.bf16.mxu1 %v3734_v63  ;;  %v3809_v62 = vld [vmem:[#allocation9 + $0x784] ss:$16 sps:$4 sm:$0xff]   ;;  %v3812_v63 = vld [vmem:[#allocation9 + $0x78c] ss:$16 sps:$4 sm:$0xff]  }
 0x1d8   :  { %2425 = vmatpush1.bf16.msra.mxu0 %v3729_v4  ;;  %2589 = vmatpush1.bf16.msra.mxu1 %v3732_v5  ;;  %v716_v4 = vsub.s32 6, %v4126_v7  ;;  %v3815_v5 = vld [vmem:[#allocation9 + $0x7a4] ss:$16 sps:$4 sm:$0xff]  }
 0x1d9   :  { %2435 = vmatprep.subr.bf16.mxu0 %v3737_v11  ;;  %2599 = vmatprep.subr.bf16.mxu1 %v3740_v12  ;;  %v3818_v11 = vld [vmem:[#allocation9 + $0x7ac] ss:$16 sps:$4 sm:$0xff]   ;;  %v3813_v12 = vld [vmem:[#allocation9 + $0x7a0] ss:$16 sps:$4 sm:$0xff]  }
 0x1db   :  { %2427 = vmatmul.mubr.bf16.vlgmr.msra.gmra.mrb[8].mxu0 %v750_v15  ;;  %2591 = vmatmul.mubr.bf16.vlgmr.msra.gmra.mrb[8].mxu1 %v750_v15  ;;  %v717_v15 = vrot.slane %v4129_v9, %v716_v4  ;;  %v3831_v9 = vld [vmem:[#allocation11 + $0x40] sm:$0xff]  }
 0x1dc   :  { %2436 = vmatpush1.bf16.msra.mxu0 %v3735_v16  ;;  %2600 = vmatpush1.bf16.msra.mxu1 %v3738_v17  ;;  %v3821_v16 = vld [vmem:[#allocation9 + $0x7c4] ss:$16 sps:$4 sm:$0xff]   ;;  %v3824_v17 = vld [vmem:[#allocation9 + $0x7cc] ss:$16 sps:$4 sm:$0xff]  }
 0x1dd   :  { %2437 = vmatprep.subr.bf16.mxu0 %v3743_v18  ;;  %2601 = vmatprep.subr.bf16.mxu1 %v3746_v19  ;;  %v3819_v18 = vld [vmem:[#allocation9 + $0x7c0] ss:$16 sps:$4 sm:$0xff]   ;;  %v3822_v19 = vld [vmem:[#allocation9 + $0x7c8] ss:$16 sps:$4 sm:$0xff]  }
 0x1de   :  { %2467 = vmatprep.mubr.bf16.mxu0 %v753_v13  ;;  %2631 = vmatprep.mubr.bf16.mxu1 %v753_v13  ;;  %v736_v13 = vadd.f32 %v717_v15, %v4148_v6  ;;  %v3835_v6 = vld [vmem:[#allocation11 + $0x48] sm:$0xff]  }
 0x1e0   :  { %2438 = vmatpush1.bf16.msra.mxu0 %v3741_v20  ;;  %2602 = vmatpush1.bf16.msra.mxu1 %v3744_v21  ;;  %v3827_v20 = vld [vmem:[#allocation9 + $0x7e4] ss:$16 sps:$4 sm:$0xff]   ;;  %v3830_v21 = vld [vmem:[#allocation9 + $0x7ec] ss:$16 sps:$4 sm:$0xff]  }
 0x1e1   :  { %2439 = vmatprep.subr.bf16.mxu0 %v3749_v22  ;;  %2603 = vmatprep.subr.bf16.mxu1 %v3752_v23  ;;  %v3825_v22 = vld [vmem:[#allocation9 + $0x7e0] ss:$16 sps:$4 sm:$0xff]   ;;  %v3828_v23 = vld [vmem:[#allocation9 + $0x7e8] ss:$16 sps:$4 sm:$0xff]  }
 0x1e4   :  { %2440 = vmatpush1.bf16.msra.mxu0 %v3747_v2  ;;  %2604 = vmatpush1.bf16.msra.mxu1 %v3750_v24  ;;  %v744_v2 = vmax.f32 %v736_v13, 0.0  ;;  %v3832_v24 = vld [vmem:[#allocation11 + $0xc0] sm:$0xff]  }
 0x1e5   :  { %2441 = vmatprep.subr.bf16.mxu0 %v3755_v26  ;;  %2605 = vmatprep.subr.bf16.mxu1 %v3758_v27  ;;  %v3833_v26 = vld [vmem:[#allocation11] sm:$0xff]  }
 0x1e6   :  { %v3834_v27 = vld [vmem:[#allocation11 + $0x80] sm:$0xff]  }
 0x1e8   :  { %2442 = vmatpush1.bf16.msra.mxu0 %v3753_v28  ;;  %2606 = vmatpush1.bf16.msra.mxu1 %v3756_v30  ;;  %v752_v28 = vpack.c.bf16 %v744_v2, %v744_v2  ;;  %v3836_v30 = vld [vmem:[#allocation11 + $0xc8] sm:$0xff]  }
 0x1e9   :  { %2443 = vmatprep.subr.bf16.mxu0 %v3761_v31  ;;  %2607 = vmatprep.subr.bf16.mxu1 %v3764_v32  ;;  %v3837_v31 = vld [vmem:[#allocation11 + $0x8] sm:$0xff]  }
 0x1ea   :  { %v3838_v32 = vld [vmem:[#allocation11 + $0x88] sm:$0xff]  }
 0x1ec   :  { %2444 = vmatpush1.bf16.msra.mxu0 %v3759_v33  ;;  %2608 = vmatpush1.bf16.msra.mxu1 %v3762_v34  ;;  %v3839_v33 = vld [vmem:[#allocation11 + $0x50] sm:$0xff]  }
 0x1ed   :  { %2445 = vmatprep.subr.bf16.mxu0 %v3767_v35  ;;  %2609 = vmatprep.subr.bf16.mxu1 %v3770_v36  ;;  %v3840_v34 = vld [vmem:[#allocation11 + $0xd0] sm:$0xff]  }
 0x1ee   :  { %v3841_v35 = vld [vmem:[#allocation11 + $0x10] sm:$0xff]  }
 0x1ef   :  { %v3842_v36 = vld [vmem:[#allocation11 + $0x90] sm:$0xff]  }
 0x1f0   :  { %2446 = vmatpush1.bf16.msra.mxu0 %v3765_v37  ;;  %2610 = vmatpush1.bf16.msra.mxu1 %v3768_v38  ;;  %v3843_v37 = vld [vmem:[#allocation11 + $0x58] sm:$0xff]  }
 0x1f1   :  { %2447 = vmatprep.subr.bf16.mxu0 %v3773_v39  ;;  %2611 = vmatprep.subr.bf16.mxu1 %v3776_v40  ;;  %v3844_v38 = vld [vmem:[#allocation11 + $0xd8] sm:$0xff]  }
 0x1f2   :  { %v3845_v39 = vld [vmem:[#allocation11 + $0x18] sm:$0xff]  }
 0x1f3   :  { %v3846_v40 = vld [vmem:[#allocation11 + $0x98] sm:$0xff]  }
 0x1f4   :  { %2448 = vmatpush1.bf16.msra.mxu0 %v3771_v41  ;;  %2612 = vmatpush1.bf16.msra.mxu1 %v3774_v0  ;;  %v3847_v41 = vld [vmem:[#allocation11 + $0x60] sm:$0xff]  }
 0x1f5   :  { %2449 = vmatprep.subr.bf16.mxu0 %v3779_v42  ;;  %2613 = vmatprep.subr.bf16.mxu1 %v3782_v43  ;;  %v3848_v0 = vld [vmem:[#allocation11 + $0xe0] sm:$0xff]  }
 0x1f6   :  { %v3849_v42 = vld [vmem:[#allocation11 + $0x20] sm:$0xff]  }
 0x1f7   :  { %v3850_v43 = vld [vmem:[#allocation11 + $0xa0] sm:$0xff]  }
 0x1f8   :  { %2450 = vmatpush1.bf16.msra.mxu0 %v3777_v44  ;;  %2614 = vmatpush1.bf16.msra.mxu1 %v3780_v45  ;;  %v3851_v44 = vld [vmem:[#allocation11 + $0x68] sm:$0xff]  }
 0x1f9   :  { %2451 = vmatprep.subr.bf16.mxu0 %v3785_v46  ;;  %2615 = vmatprep.subr.bf16.mxu1 %v3788_v47  ;;  %v3852_v45 = vld [vmem:[#allocation11 + $0xe8] sm:$0xff]  }
 0x1fa   :  { %v3853_v46 = vld [vmem:[#allocation11 + $0x28] sm:$0xff]  }
 0x1fb   :  { %v3854_v47 = vld [vmem:[#allocation11 + $0xa8] sm:$0xff]  }
 0x1fc   :  { %2452 = vmatpush1.bf16.msra.mxu0 %v3783_v48  ;;  %2616 = vmatpush1.bf16.msra.mxu1 %v3786_v49  ;;  %v3855_v48 = vld [vmem:[#allocation11 + $0x70] sm:$0xff]  }
 0x1fd   :  { %2453 = vmatprep.subr.bf16.mxu0 %v3791_v50  ;;  %2617 = vmatprep.subr.bf16.mxu1 %v3794_v25  ;;  %v3856_v49 = vld [vmem:[#allocation11 + $0xf0] sm:$0xff]  }
 0x1fe   :  { %v3857_v50 = vld [vmem:[#allocation11 + $0x30] sm:$0xff]  }
 0x1ff   :  { %v3858_v25 = vld [vmem:[#allocation11 + $0xb0] sm:$0xff]  }
 0x200   :  { %2454 = vmatpush1.bf16.msra.mxu0 %v3789_v51  ;;  %2618 = vmatpush1.bf16.msra.mxu1 %v3792_v52  ;;  %v3859_v51 = vld [vmem:[#allocation11 + $0x78] sm:$0xff]  }
 0x201   :  { %2455 = vmatprep.subr.bf16.mxu0 %v3797_v53  ;;  %2619 = vmatprep.subr.bf16.mxu1 %v3800_v54  ;;  %v3860_v52 = vld [vmem:[#allocation11 + $0xf8] sm:$0xff]  }
 0x202   :  { %v3861_v53 = vld [vmem:[#allocation11 + $0x38] sm:$0xff]  }
 0x203   :  { %v3862_v54 = vld [vmem:[#allocation11 + $0xb8] sm:$0xff]  }
 0x204   :  { %2456 = vmatpush1.bf16.msra.mxu0 %v3795_v55  ;;  %2620 = vmatpush1.bf16.msra.mxu1 %v3798_v56  ;;  %v1010_v55 = vld [vmem:[%s4199_s4] sm:$0xf] }
 0x205   :  { %2457 = vmatprep.subr.bf16.mxu0 %v3803_v57  ;;  %2621 = vmatprep.subr.bf16.mxu1 %v3806_v59  ;;  %v1015_v56 = vrot.slane %v1010_v55, %v692_v8  ;;  %v1023_v57 = vrot.slane %v1010_v55, %v700_v29  ;;  %v1019_v59 = vrot.slane %v1010_v55, %v696_v10 }
 0x208   :  { %2458 = vmatpush1.bf16.msra.mxu0 %v3801_v60  ;;  %2622 = vmatpush1.bf16.msra.mxu1 %v3804_v61  ;;  %v1027_v60 = vrot.slane %v1010_v55, %v704_v14 }
 0x209   :  { %2459 = vmatprep.subr.bf16.mxu0 %v3809_v62  ;;  %2623 = vmatprep.subr.bf16.mxu1 %v3812_v63 }
 0x20c   :  { %2460 = vmatpush1.bf16.msra.mxu0 %v3807_v1  ;;  %2624 = vmatpush1.bf16.msra.mxu1 %v3810_v3 }
 0x20d   :  { %2461 = vmatprep.subr.bf16.mxu0 %v3815_v5  ;;  %2625 = vmatprep.subr.bf16.mxu1 %v3818_v11 }
 0x210   :  { %2462 = vmatpush1.bf16.msra.mxu0 %v3813_v12  ;;  %2626 = vmatpush1.bf16.msra.mxu1 %v3816_v58 }
 0x211   :  { %2463 = vmatprep.subr.bf16.mxu0 %v3821_v16  ;;  %2627 = vmatprep.subr.bf16.mxu1 %v3824_v17 }
 0x214   :  { %2464 = vmatpush1.bf16.msra.mxu0 %v3819_v18  ;;  %2628 = vmatpush1.bf16.msra.mxu1 %v3822_v19 }
 0x215   :  { %2465 = vmatprep.subr.bf16.mxu0 %v3827_v20  ;;  %2629 = vmatprep.subr.bf16.mxu1 %v3830_v21  ;;  %v3329_v21 = vld [vmem:[%s4201_s6] ss:$0 sm:$0xff] }
 0x218   :  { %2466 = vmatpush1.bf16.msra.mxu0 %v3825_v22  ;;  %2630 = vmatpush1.bf16.msra.mxu1 %v3828_v23 }
 0x219   :  { %3362 = vmatprep.subr.bf16.mxu0 %v3831_v9  ;;  %3384 = vmatprep.subr.bf16.mxu1 %v3832_v24 }
 0x21b   :  { %2468 = vmatmul.mubr.bf16.vlgmr.msra.gmra.mrb[8].mxu0 %v752_v28  ;;  %2632 = vmatmul.mubr.bf16.vlgmr.msra.gmra.mrb[8].mxu1 %v752_v28 }
 0x21c   :  { %3363 = vmatpush3.bf16.msra.mxu0 %v3833_v26  ;;  %3385 = vmatpush3.bf16.msra.mxu1 %v3834_v27 }
 0x21d   :  { %3364 = vmatprep.subr.bf16.mxu0 %v3835_v6  ;;  %3386 = vmatprep.subr.bf16.mxu1 %v3836_v30 }
 0x220   :  { %3365 = vmatpush3.bf16.msra.mxu0 %v3837_v31  ;;  %3387 = vmatpush3.bf16.msra.mxu1 %v3838_v32 }
 0x221   :  { %3366 = vmatprep.subr.bf16.mxu0 %v3839_v33  ;;  %3388 = vmatprep.subr.bf16.mxu1 %v3840_v34 }
 0x224   :  { %3367 = vmatpush3.bf16.msra.mxu0 %v3841_v35  ;;  %3389 = vmatpush3.bf16.msra.mxu1 %v3842_v36 }
 0x225   :  { %3368 = vmatprep.subr.bf16.mxu0 %v3843_v37  ;;  %3390 = vmatprep.subr.bf16.mxu1 %v3844_v38 }
 0x228   :  { %3369 = vmatpush3.bf16.msra.mxu0 %v3845_v39  ;;  %3391 = vmatpush3.bf16.msra.mxu1 %v3846_v40 }
 0x229   :  { %3370 = vmatprep.subr.bf16.mxu0 %v3847_v41  ;;  %3392 = vmatprep.subr.bf16.mxu1 %v3848_v0 }
 0x22c   :  { %3371 = vmatpush3.bf16.msra.mxu0 %v3849_v42  ;;  %3393 = vmatpush3.bf16.msra.mxu1 %v3850_v43 }
 0x22d   :  { %3372 = vmatprep.subr.bf16.mxu0 %v3851_v44  ;;  %3394 = vmatprep.subr.bf16.mxu1 %v3852_v45 }
 0x230   :  { %3373 = vmatpush3.bf16.msra.mxu0 %v3853_v46  ;;  %3395 = vmatpush3.bf16.msra.mxu1 %v3854_v47 }
 0x231   :  { %3374 = vmatprep.subr.bf16.mxu0 %v3855_v48  ;;  %3396 = vmatprep.subr.bf16.mxu1 %v3856_v49 }
 0x234   :  { %3375 = vmatpush3.bf16.msra.mxu0 %v3857_v50  ;;  %3397 = vmatpush3.bf16.msra.mxu1 %v3858_v25 }
 0x235   :  { %3376 = vmatprep.subr.bf16.mxu0 %v3859_v51  ;;  %3398 = vmatprep.subr.bf16.mxu1 %v3860_v52 }
 0x238   :  { %3377 = vmatpush3.bf16.msra.mxu0 %v3861_v53  ;;  %3399 = vmatpush3.bf16.msra.mxu1 %v3862_v54 }
 0x2ee   :  { %v2469_v61 = vpop.f32.mrb[8].mxu0  ;;  %v2633_v62 = vpop.f32.mrb[8].mxu1 }
 0x2ef   :  { %v3406_v63 = vadd.f32 %v2469_v61, %v1015_v56  ;;  %v3408_v1 = vadd.f32 %v2633_v62, %v1023_v57  ;;  %v2471_v3 = vpop.f32.mrb[9].mxu0  ;;  %v2635_v4 = vpop.f32.mrb[9].mxu1 }
 0x2f0   :  { %v3407_v5 = vadd.f32 %v2471_v3, %v1019_v59  ;;  %v3409_v11 = vadd.f32 %v2635_v4, %v1027_v60  ;;  %v2473_v12 = vpop.f32.mrb[10].mxu0  ;;  %v2637_v58 = vpop.f32.mrb[10].mxu1 }
 0x2f1   :  { %v2640_v8 = vmax.f32 %v3406_v63, 0.0  ;;  %v2642_v15 = vmax.f32 %v3408_v1, 0.0  ;;  %v2474_v16 = vpop.f32.mrb[11].mxu0  ;;  %v2638_v29 = vpop.f32.mrb[11].mxu1 }
 0x2f2   :  { %v2641_v17 = vmax.f32 %v3407_v5, 0.0  ;;  %v2643_v18 = vmax.f32 %v3409_v11, 0.0 }
 0x2f3   :  { %v2644_v7 = vpack.c.bf16 %v2640_v8, %v2640_v8  ;;  %v2646_v14 = vpack.c.bf16 %v2642_v15, %v2642_v15 }
 0x2f4   :  { %v2645_v10 = vpack.c.bf16 %v2641_v17, %v2641_v17  ;;  %v2647_v19 = vpack.c.bf16 %v2643_v18, %v2643_v18 }
 0x2f6   :  { %2943 = vmatprep.mubr.bf16.mxu0 %v2645_v10  ;;  %2983 = vmatprep.mubr.bf16.mxu1 %v2647_v19 }
 0x2f7   :  { %2944 = vmatmul.mubr.bf16.vlgmr.msra.gmra.mrb[12].mxu0 %v2644_v7  ;;  %2984 = vmatmul.mubr.bf16.vlgmr.msra.gmra.mrb[12].mxu1 %v2646_v14 }
 0x3ca   :  { %v3378_v13 = vpop.f32.mrb[12].mxu0  ;;  %v3400_v20 = vpop.f32.mrb[12].mxu1 }
 0x3cb   :  { %v3379_v22 = vpop.f32.mrb[13].mxu0  ;;  %v3401_v23 = vpop.f32.mrb[13].mxu1 }
 0x3cc   :  { %v3380_v2 = vadd.f32 %v3379_v22, %v3378_v13  ;;  %v3402_v9 = vadd.f32 %v3401_v23, %v3400_v20  ;;  %v3381_v24 = vpop.f32.mrb[14].mxu0  ;;  %v3403_v26 = vpop.f32.mrb[14].mxu1 }
 0x3cd   :  { %v3382_v27 = vpop.f32.mrb[15].mxu0  ;;  %v3404_v28 = vpop.f32.mrb[15].mxu1 }
 0x3ce   :  { %v2946_v6 = vadd.f32 %v3380_v2, %v3329_v21 }
 0x3d0   :  { %v2986_v30 = vadd.f32 %v3402_v9, %v2946_v6 }
 0x3d2   :  { %2991 = vst [vmem:[#allocation12] sm:$0xff] %v2986_v30 }
 0x3d3   :  { %3984 = shalt.err (!%p3981_p2)
}
 0x3d4   :  { %s3985_s21 = scalar_lea.hbm %s4202_s7, 128 }
 0x3d5   :  { %p3986_p3 = scmp.ne.s32.totalorder %s4202_s7, %s3985_s21  ;;  %p3989_p4 = scmp.lt.u32.totalorder %s3985_s21, %s4202_s7 }
 0x3d7   :  { %p3991_p5 = pnand %p3989_p4, %p3986_p3 }
 0x3d9   :  { %3994 = shalt.err (!%p3991_p5)
}
 0x3da   :  { %3001 = dma.vmem_to_hbm [thread:$0]  %s2999_s18, 128, %s4202_s7, [#allocation5]  }
 0x3db   :  { %4001 = dma.done.wait [#allocation5], 128  }
 0x3dc   :  { %4002 = vsyncadd [#allocation5], 4294967168 }
 0x3dd   :  { %3005 = vsyncpa [#allocation4], 1 }
 0x3de   :  { %3006 = vsyncpa [#allocation7], 1 }
 0x3df   :  { %3007 = vsyncpa [#allocation10], 1 }
 0x3e0   :  { %3008 = vsyncpa [#allocation5], 1 }

// kernel: tpu_custom_call.1
= control target key start
LH: loop header
LB: loop body
LE: loop exit
PB: predicated region body
PF: predicated region fallthrough
CT: control target
= control target key end

     0   :  { %12 = vsyncpa [#allocation4], 0  ;;  %s4195_s0 = inlined_call_operand.hbm [shape: bf16[8,128], index: 0, kind: input, shape index: {}]   ;;  %s4196_s1 = inlined_call_operand.hbm [shape: bf16[128,1024], index: 1, kind: input, shape index: {}]   ;;  %s4197_s2 = inlined_call_operand.hbm [shape: f32[1,1024], index: 2, kind: input, shape index: {}]   ;;  %s4198_s3 = inlined_call_operand.hbm [shape: bf16[1024,512], index: 3, kind: input, shape index: {}]   ;;  %s4199_s4 = inlined_call_operand.vmem [shape: f32[1,512], index: 4, kind: input, shape index: {}]   ;;  %s4200_s5 = inlined_call_operand.hbm [shape: bf16[512,128], index: 5, kind: input, shape index: {}]   ;;  %s4201_s6 = inlined_call_operand.vmem [shape: f32[1,128], index: 6, kind: input, shape index: {}]   ;;  %s4202_s7 = inlined_call_operand.hbm [shape: f32[8,128], index: 7, kind: output, shape index: {}]  }
   0x1   :  { %13 = vsyncpa [#allocation7], 0 }
   0x2   :  { %14 = vsyncpa [#allocation10], 0 }
   0x3   :  { %15 = vsyncpa [#allocation5], 0  ;;  %s4003_s24 = smov [#allocation6]   ;;  %s3863_s28 = scalar_lea.hbm %s4196_s1, 8192 }
   0x4   :  { %s31_s25 = sshll.u32 %s4003_s24, 4  ;;  %p3864_p0 = scmp.ne.s32.totalorder %s4196_s1, %s3863_s28  ;;  %s32_s25 = int_to_ptr.vmem [resolvable:$true] %s31_s25 }
   0x5   :  { %p3867_p1 = scmp.lt.u32.totalorder %s3863_s28, %s4196_s1 }
   0x7   :  { %p3869_p2 = pnand %p3867_p1, %p3864_p0 }
   0x9   :  { %3872 = shalt.err (!%p3869_p2)
}
   0xa   :  { %s3873_s10 = scalar_lea.vmem %s32_s25, 8192  ;;  %p3878_p4 = scmp.lt.s32.totalorder %s32_s25, %s32_s25 }
   0xb   :  { %p3874_p3 = scmp.ne.s32.totalorder %s32_s25, %s3873_s10  ;;  %p3879_p5 = scmp.lt.s32.totalorder %s3873_s10, %s3873_s10 }
   0xd   :  { %p3880_p6 = por %p3879_p5, %p3878_p4 }
   0xf   :  { %p3881_p7 = pnand %p3880_p6, %p3874_p3 }
  0x11   :  { %3884 = shalt.err (!%p3881_p7)
}
  0x12   :  { %s4004_s11 = smov 512   ;;  %s4005_s12 = smov 32  }
  0x13   :  { %37 = dma.hbm_to_vmem [thread:$0]  %s4196_s1, 8192, %s32_s25, [#allocation7], %s4004_s11, %s4004_s11, %s4005_s12  }
  0x14   :  { %s4006_s15 = smov [#allocation9]   ;;  %s3885_s19 = scalar_lea.hbm %s4198_s3, 32768 }
  0x15   :  { %s53_s16 = sshll.u32 %s4006_s15, 4  ;;  %p3886_p8 = scmp.ne.s32.totalorder %s4198_s3, %s3885_s19  ;;  %s54_s16 = int_to_ptr.vmem [resolvable:$true] %s53_s16 }
  0x16   :  { %p3889_p9 = scmp.lt.u32.totalorder %s3885_s19, %s4198_s3 }
  0x18   :  { %p3891_p10 = pnand %p3889_p9, %p3886_p8 }
  0x1a   :  { %3894 = shalt.err (!%p3891_p10)
}
  0x1b   :  { %s3895_s24 = scalar_lea.vmem %s54_s16, 32768  ;;  %p3900_p12 = scmp.lt.s32.totalorder %s54_s16, %s54_s16 }
  0x1c   :  { %p3896_p11 = scmp.ne.s32.totalorder %s54_s16, %s3895_s24  ;;  %p3901_p13 = scmp.lt.s32.totalorder %s3895_s24, %s3895_s24 }
  0x1e   :  { %p3902_p0 = por %p3901_p13, %p3900_p12 }
  0x20   :  { %p3903_p1 = pnand %p3902_p0, %p3896_p11 }
  0x22   :  { %3906 = shalt.err (!%p3903_p1)
}
  0x23   :  { %s4007_s1 = smov 256   ;;  %s4008_s25 = smov 16  }
  0x24   :  { %59 = dma.hbm_to_vmem [thread:$0]  %s4198_s3, 32768, %s54_s16, [#allocation10], %s4007_s1, %s4007_s1, %s4008_s25  }
  0x25   :  { %s4009_s28 = smov [#allocation3]   ;;  %s4010_s30 = smov [#allocation8]  }
  0x26   :  { %s22_s29 = sshll.u32 %s4009_s28, 4  ;;  %s44_s8 = sshll.u32 %s4010_s30, 4  ;;  %s23_s29 = int_to_ptr.vmem [resolvable:$true] %s22_s29  ;;  %s45_s8 = int_to_ptr.vmem [resolvable:$true] %s44_s8 }
  0x27   :  { %s3907_s11 = scalar_lea.hbm %s4195_s0, 64 }
  0x28   :  { %p3908_p2 = scmp.ne.s32.totalorder %s4195_s0, %s3907_s11  ;;  %p3911_p3 = scmp.lt.u32.totalorder %s3907_s11, %s4195_s0 }
  0x2a   :  { %p3913_p4 = pnand %p3911_p3, %p3908_p2 }
  0x2c   :  { %3916 = shalt.err (!%p3913_p4)
}
  0x2d   :  { %s3917_s3 = scalar_lea.vmem %s23_s29, 64  ;;  %p3922_p6 = scmp.lt.s32.totalorder %s23_s29, %s23_s29 }
  0x2e   :  { %p3918_p5 = scmp.ne.s32.totalorder %s23_s29, %s3917_s3  ;;  %p3923_p7 = scmp.lt.s32.totalorder %s3917_s3, %s3917_s3 }
  0x30   :  { %p3924_p8 = por %p3923_p7, %p3922_p6 }
  0x32   :  { %p3925_p9 = pnand %p3924_p8, %p3918_p5 }
  0x34   :  { %3928 = shalt.err (!%p3925_p9)
}
  0x35   :  { %25 = dma.hbm_to_vmem [thread:$0]  %s4195_s0, 64, %s23_s29, [#allocation4]  }
  0x36   :  { %s3929_s20 = scalar_lea.hbm %s4197_s2, 128 }
  0x37   :  { %p3930_p10 = scmp.ne.s32.totalorder %s4197_s2, %s3929_s20  ;;  %p3933_p11 = scmp.lt.u32.totalorder %s3929_s20, %s4197_s2 }
  0x39   :  { %p3935_p12 = pnand %p3933_p11, %p3930_p10 }
  0x3b   :  { %3938 = shalt.err (!%p3935_p12)
}
  0x3c   :  { %s3939_s1 = scalar_lea.vmem %s45_s8, 128  ;;  %p3944_p0 = scmp.lt.s32.totalorder %s45_s8, %s45_s8 }
  0x3d   :  { %p3940_p13 = scmp.ne.s32.totalorder %s45_s8, %s3939_s1  ;;  %p3945_p1 = scmp.lt.s32.totalorder %s3939_s1, %s3939_s1 }
  0x3f   :  { %p3946_p2 = por %p3945_p1, %p3944_p0 }
  0x41   :  { %p3947_p3 = pnand %p3946_p2, %p3940_p13 }
  0x43   :  { %3950 = shalt.err (!%p3947_p3)
}
  0x44   :  { %47 = dma.hbm_to_vmem [thread:$0]  %s4197_s2, 128, %s45_s8, [#allocation7]  }
  0x45   :  { %s4011_s26 = smov [#allocation11]   ;;  %s3951_s30 = scalar_lea.hbm %s4200_s5, 4096 }
  0x46   :  { %s67_s27 = sshll.u32 %s4011_s26, 4  ;;  %p3952_p4 = scmp.ne.s32.totalorder %s4200_s5, %s3951_s30  ;;  %s68_s27 = int_to_ptr.vmem [resolvable:$true] %s67_s27 }
  0x47   :  { %p3955_p5 = scmp.lt.u32.totalorder %s3951_s30, %s4200_s5 }
  0x49   :  { %p3957_p6 = pnand %p3955_p5, %p3952_p4 }
  0x4b   :  { %3960 = shalt.err (!%p3957_p6)
}
  0x4c   :  { %s3961_s13 = scalar_lea.vmem %s68_s27, 4096  ;;  %p3966_p8 = scmp.lt.s32.totalorder %s68_s27, %s68_s27 }
  0x4d   :  { %p3962_p7 = scmp.ne.s32.totalorder %s68_s27, %s3961_s13  ;;  %p3967_p9 = scmp.lt.s32.totalorder %s3961_s13, %s3961_s13 }
  0x4f   :  { %p3968_p10 = por %p3967_p9, %p3966_p8 }
  0x51   :  { %p3969_p11 = pnand %p3968_p10, %p3962_p7 }
  0x53   :  { %3972 = shalt.err (!%p3969_p11)
}
  0x54   :  { %s4012_s2 = smov 64   ;;  %s4013_s8 = smov 4  }
  0x55   :  { %73 = dma.hbm_to_vmem [thread:$0]  %s4200_s5, 4096, %s68_s27, [#allocation10], %s4012_s2, %s4012_s2, %s4013_s8  }
  0x56   :  { %3995 = dma.done.wait [#allocation4], 64  }
  0x57   :  { %3996 = vsyncadd [#allocation4], 4294967232 }
  0x58   :  { %3997 = dma.done.wait [#allocation7], 8320  }
  0x59   :  { %3998 = vsyncadd [#allocation7], 4294958976 }
  0x5a   :  { %3999 = dma.done.wait [#allocation10], 36864  }
  0x5b   :  { %4000 = vsyncadd [#allocation10], 4294930432  ;;  %v4014_v0 = vmov 0   ;;  %v113_v1 = vld [vmem:[#allocation6] sm:$0xff]  ;;  %v114_v14 = vld [vmem:[#allocation6 + $0x8] sm:$0xff]  ;;  %s4015_s17 = smov [#allocation12]  }
  0x5c   :  { %529 = vmatprep.mubr.bf16.mxu0 %v4014_v0  ;;  %570 = vmatprep.mubr.bf16.mxu1 %v4014_v0  ;;  %v117_v2 = vld [vmem:[#allocation6 + $0x20] sm:$0xff]  ;;  %v118_v15 = vld [vmem:[#allocation6 + $0x28] sm:$0xff]  ;;  %v115_v58 = vld [vmem:[#allocation6 + $0x10] sm:$0xff]  ;;  %s2998_s18 = sshll.u32 %s4015_s17, 4  ;;  %s2999_s18 = int_to_ptr.vmem [resolvable:$true] %s2998_s18 }
  0x5d   :  { %v121_v3 = vld [vmem:[#allocation6 + $0x40] sm:$0xff]  ;;  %v3010_v4 = vcombine.high %v113_v1, %v117_v2  ;;  %v3009_v5 = vcombine.low %v113_v1, %v117_v2  ;;  %v122_v16 = vld [vmem:[#allocation6 + $0x48] sm:$0xff]  ;;  %v3012_v18 = vcombine.high %v114_v14, %v118_v15  ;;  %v3011_v19 = vcombine.low %v114_v14, %v118_v15  ;;  %v119_v59 = vld [vmem:[#allocation6 + $0x30] sm:$0xff]  ;;  %s3973_s19 = scalar_lea.vmem %s2999_s18, 128  ;;  %p3978_p13 = scmp.lt.s32.totalorder %s2999_s18, %s2999_s18 }
  0x5e   :  { %v125_v6 = vld [vmem:[#allocation6 + $0x60] sm:$0xff]  ;;  %v126_v17 = vld [vmem:[#allocation6 + $0x68] sm:$0xff]  ;;  %v3014_v1 = vcombine.high %v115_v58, %v119_v59  ;;  %v4118_v2 = vld [vmem:[#allocation3] sm:$0xf]  ;;  %p3974_p12 = scmp.ne.s32.totalorder %s2999_s18, %s3973_s19  ;;  %p3979_p0 = scmp.lt.s32.totalorder %s3973_s19, %s3973_s19 }
  0x5f   :  { %v3018_v7 = vcombine.high %v121_v3, %v125_v6  ;;  %v129_v8 = vld [vmem:[#allocation6 + $0x80] sm:$0xff]  ;;  %497 = vmatprep.subr.bf16.mxu0 %v3010_v4  ;;  %v3017_v10 = vcombine.low %v121_v3, %v125_v6  ;;  %v3020_v20 = vcombine.high %v122_v16, %v126_v17  ;;  %v130_v22 = vld [vmem:[#allocation6 + $0x88] sm:$0xff]  ;;  %538 = vmatprep.subr.bf16.mxu1 %v3012_v18  ;;  %v123_v4 = vld [vmem:[#allocation6 + $0x50] sm:$0xff] }
  0x60   :  { %v133_v9 = vld [vmem:[#allocation6 + $0xa0] sm:$0xff]  ;;  %498 = vmatpush1.bf16.msra.mxu0 %v3009_v5  ;;  %v134_v23 = vld [vmem:[#allocation6 + $0xa8] sm:$0xff]  ;;  %539 = vmatpush1.bf16.msra.mxu1 %v3011_v19  ;;  %v3019_v27 = vcombine.low %v122_v16, %v126_v17  ;;  %v127_v5 = vld [vmem:[#allocation6 + $0x70] sm:$0xff]  ;;  %p3980_p1 = por %p3979_p0, %p3978_p13 }
  0x61   :  { %499 = vmatprep.subr.bf16.mxu0 %v3018_v7  ;;  %v3026_v11 = vcombine.high %v129_v8, %v133_v9  ;;  %v137_v12 = vld [vmem:[#allocation6 + $0xc0] sm:$0xff]  ;;  %v3025_v21 = vcombine.low %v129_v8, %v133_v9  ;;  %540 = vmatprep.subr.bf16.mxu1 %v3020_v20  ;;  %v3028_v28 = vcombine.high %v130_v22, %v134_v23  ;;  %v138_v30 = vld [vmem:[#allocation6 + $0xc8] sm:$0xff]  ;;  %v116_v7 = vld [vmem:[#allocation6 + $0x18] sm:$0xff] }
  0x62   :  { %v141_v13 = vld [vmem:[#allocation6 + $0xe0] sm:$0xff]  ;;  %v142_v31 = vld [vmem:[#allocation6 + $0xe8] sm:$0xff]  ;;  %v3027_v35 = vcombine.low %v130_v22, %v134_v23  ;;  %v3013_v8 = vcombine.low %v115_v58, %v119_v59  ;;  %v120_v9 = vld [vmem:[#allocation6 + $0x38] sm:$0xff]  ;;  %v3021_v16 = vcombine.low %v123_v4, %v127_v5  ;;  %p3981_p2 = pnand %p3980_p1, %p3974_p12 }
  0x63   :  { %v3034_v24 = vcombine.high %v137_v12, %v141_v13  ;;  %v145_v25 = vld [vmem:[#allocation6 + $0x100] sm:$0xff]  ;;  %v3033_v29 = vcombine.low %v137_v12, %v141_v13  ;;  %v3036_v36 = vcombine.high %v138_v30, %v142_v31  ;;  %v146_v38 = vld [vmem:[#allocation6 + $0x108] sm:$0xff]  ;;  %v3035_v43 = vcombine.low %v138_v30, %v142_v31  ;;  %v131_v12 = vld [vmem:[#allocation6 + $0x90] sm:$0xff] }
  0x64   :  { %500 = vmatpush1.bf16.msra.mxu0 %v3017_v10  ;;  %v149_v26 = vld [vmem:[#allocation6 + $0x120] sm:$0xff]  ;;  %541 = vmatpush1.bf16.msra.mxu1 %v3019_v27  ;;  %v150_v39 = vld [vmem:[#allocation6 + $0x128] sm:$0xff]  ;;  %v3022_v10 = vcombine.high %v123_v4, %v127_v5  ;;  %v135_v13 = vld [vmem:[#allocation6 + $0xb0] sm:$0xff]  ;;  %v3016_v14 = vcombine.high %v116_v7, %v120_v9 }
  0x65   :  { %501 = vmatprep.subr.bf16.mxu0 %v3026_v11  ;;  %v3042_v32 = vcombine.high %v145_v25, %v149_v26  ;;  %v153_v33 = vld [vmem:[#allocation6 + $0x140] sm:$0xff]  ;;  %542 = vmatprep.subr.bf16.mxu1 %v3028_v28  ;;  %v3041_v37 = vcombine.low %v145_v25, %v149_v26  ;;  %v3044_v44 = vcombine.high %v146_v38, %v150_v39  ;;  %v154_v46 = vld [vmem:[#allocation6 + $0x148] sm:$0xff]  ;;  %v124_v15 = vld [vmem:[#allocation6 + $0x58] sm:$0xff] }
  0x66   :  { %v157_v34 = vld [vmem:[#allocation6 + $0x160] sm:$0xff]  ;;  %v158_v47 = vld [vmem:[#allocation6 + $0x168] sm:$0xff]  ;;  %v3043_v51 = vcombine.low %v146_v38, %v150_v39  ;;  %v128_v17 = vld [vmem:[#allocation6 + $0x78] sm:$0xff]  ;;  %v3030_v18 = vcombine.high %v131_v12, %v135_v13 }
  0x67   :  { %v3050_v40 = vcombine.high %v153_v33, %v157_v34  ;;  %v161_v41 = vld [vmem:[#allocation6 + $0x180] sm:$0xff]  ;;  %v3049_v45 = vcombine.low %v153_v33, %v157_v34  ;;  %v3052_v52 = vcombine.high %v154_v46, %v158_v47  ;;  %v162_v53 = vld [vmem:[#allocation6 + $0x188] sm:$0xff]  ;;  %v3051_v57 = vcombine.low %v154_v46, %v158_v47  ;;  %v139_v19 = vld [vmem:[#allocation6 + $0xd0] sm:$0xff] }
  0x68   :  { %502 = vmatpush1.bf16.msra.mxu0 %v3025_v21  ;;  %v165_v42 = vld [vmem:[#allocation6 + $0x1a0] sm:$0xff]  ;;  %543 = vmatpush1.bf16.msra.mxu1 %v3027_v35  ;;  %v166_v55 = vld [vmem:[#allocation6 + $0x1a8] sm:$0xff]  ;;  %v143_v20 = vld [vmem:[#allocation6 + $0xf0] sm:$0xff]  ;;  %v3015_v21 = vcombine.low %v116_v7, %v120_v9  ;;  %v3024_v22 = vcombine.high %v124_v15, %v128_v17 }
  0x69   :  { %503 = vmatprep.subr.bf16.mxu0 %v3034_v24  ;;  %544 = vmatprep.subr.bf16.mxu1 %v3036_v36  ;;  %v3058_v48 = vcombine.high %v161_v41, %v165_v42  ;;  %v169_v49 = vld [vmem:[#allocation6 + $0x1c0] sm:$0xff]  ;;  %v3057_v54 = vcombine.low %v161_v41, %v165_v42  ;;  %v3060_v60 = vcombine.high %v162_v53, %v166_v55  ;;  %v170_v61 = vld [vmem:[#allocation6 + $0x1c8] sm:$0xff]  ;;  %v132_v23 = vld [vmem:[#allocation6 + $0x98] sm:$0xff] }
  0x6a   :  { %v173_v50 = vld [vmem:[#allocation6 + $0x1e0] sm:$0xff]  ;;  %v174_v63 = vld [vmem:[#allocation6 + $0x1e8] sm:$0xff]  ;;  %v3059_v3 = vcombine.low %v162_v53, %v166_v55  ;;  %v3029_v24 = vcombine.low %v131_v12, %v135_v13  ;;  %v136_v25 = vld [vmem:[#allocation6 + $0xb8] sm:$0xff]  ;;  %v3038_v26 = vcombine.high %v139_v19, %v143_v20 }
  0x6b   :  { %v3066_v56 = vcombine.high %v169_v49, %v173_v50  ;;  %v3065_v62 = vcombine.low %v169_v49, %v173_v50  ;;  %v3068_v6 = vcombine.high %v170_v61, %v174_v63  ;;  %v3067_v11 = vcombine.low %v170_v61, %v174_v63  ;;  %v147_v27 = vld [vmem:[#allocation6 + $0x110] sm:$0xff]  ;;  %v140_v31 = vld [vmem:[#allocation6 + $0xd8] sm:$0xff] }
  0x6c   :  { %504 = vmatpush1.bf16.msra.mxu0 %v3033_v29  ;;  %545 = vmatpush1.bf16.msra.mxu1 %v3035_v43  ;;  %v151_v28 = vld [vmem:[#allocation6 + $0x130] sm:$0xff]  ;;  %v3023_v29 = vcombine.low %v124_v15, %v128_v17  ;;  %v3032_v30 = vcombine.high %v132_v23, %v136_v25  ;;  %v144_v33 = vld [vmem:[#allocation6 + $0xf8] sm:$0xff] }
  0x6d   :  { %505 = vmatprep.subr.bf16.mxu0 %v3042_v32  ;;  %546 = vmatprep.subr.bf16.mxu1 %v3044_v44  ;;  %v3037_v32 = vcombine.low %v139_v19, %v143_v20  ;;  %v3046_v34 = vcombine.high %v147_v27, %v151_v28  ;;  %v155_v35 = vld [vmem:[#allocation6 + $0x150] sm:$0xff]  ;;  %v3040_v38 = vcombine.high %v140_v31, %v144_v33  ;;  %v148_v39 = vld [vmem:[#allocation6 + $0x118] sm:$0xff] }
  0x6e   :  { %v159_v36 = vld [vmem:[#allocation6 + $0x170] sm:$0xff]  ;;  %v152_v41 = vld [vmem:[#allocation6 + $0x138] sm:$0xff]  ;;  %v3039_v44 = vcombine.low %v140_v31, %v144_v33 }
  0x6f   :  { %v163_v42 = vld [vmem:[#allocation6 + $0x190] sm:$0xff]  ;;  %v156_v46 = vld [vmem:[#allocation6 + $0x158] sm:$0xff]  ;;  %v3053_v47 = vcombine.low %v155_v35, %v159_v36 }
  0x70   :  { %506 = vmatpush1.bf16.msra.mxu0 %v3041_v37  ;;  %547 = vmatpush1.bf16.msra.mxu1 %v3043_v51  ;;  %v3031_v37 = vcombine.low %v132_v23, %v136_v25  ;;  %v167_v43 = vld [vmem:[#allocation6 + $0x1b0] sm:$0xff]  ;;  %v172_v59 = vld [vmem:[#allocation6 + $0x1d8] sm:$0xff] }
  0x71   :  { %507 = vmatprep.subr.bf16.mxu0 %v3050_v40  ;;  %548 = vmatprep.subr.bf16.mxu1 %v3052_v52  ;;  %v3045_v40 = vcombine.low %v147_v27, %v151_v28  ;;  %v3062_v49 = vcombine.high %v163_v42, %v167_v43  ;;  %v171_v50 = vld [vmem:[#allocation6 + $0x1d0] sm:$0xff]  ;;  %v3047_v52 = vcombine.low %v148_v39, %v152_v41  ;;  %v3455_v5 = vld [vmem:[#allocation9 + $0x24] ss:$16 sps:$4 sm:$0xff]   ;;  %v3459_v12 = vld [vmem:[#allocation9 + $0x40] ss:$16 sps:$4 sm:$0xff]  }
  0x72   :  { %v175_v51 = vld [vmem:[#allocation6 + $0x1f0] sm:$0xff]  ;;  %v3061_v55 = vcombine.low %v163_v42, %v167_v43  ;;  %v3461_v9 = vld [vmem:[#allocation9 + $0x44] ss:$16 sps:$4 sm:$0xff]   ;;  %v3471_v20 = vld [vmem:[#allocation9 + $0x80] ss:$16 sps:$4 sm:$0xff]  }
  0x73   :  { %v3069_v63 = vcombine.low %v171_v50, %v175_v51  ;;  %v3467_v13 = vld [vmem:[#allocation9 + $0x64] ss:$16 sps:$4 sm:$0xff]   ;;  %v3464_v15 = vld [vmem:[#allocation9 + $0x4c] ss:$16 sps:$4 sm:$0xff]   ;;  %v3474_v25 = vld [vmem:[#allocation9 + $0x88] ss:$16 sps:$4 sm:$0xff]  }
  0x74   :  { %508 = vmatpush1.bf16.msra.mxu0 %v3049_v45  ;;  %549 = vmatpush1.bf16.msra.mxu1 %v3051_v57  ;;  %v3048_v45 = vcombine.high %v148_v39, %v152_v41  ;;  %v3070_v57 = vcombine.high %v171_v50, %v175_v51  ;;  %v3473_v17 = vld [vmem:[#allocation9 + $0x84] ss:$16 sps:$4 sm:$0xff]   ;;  %v3470_v19 = vld [vmem:[#allocation9 + $0x6c] ss:$16 sps:$4 sm:$0xff]   ;;  %v3483_v27 = vld [vmem:[#allocation9 + $0xc0] ss:$16 sps:$4 sm:$0xff]  }
  0x75   :  { %509 = vmatprep.subr.bf16.mxu0 %v3058_v48  ;;  %550 = vmatprep.subr.bf16.mxu1 %v3060_v60  ;;  %v160_v48 = vld [vmem:[#allocation6 + $0x178] sm:$0xff]  ;;  %v3476_v23 = vld [vmem:[#allocation9 + $0x8c] ss:$16 sps:$4 sm:$0xff]   ;;  %v3486_v33 = vld [vmem:[#allocation9 + $0xc8] ss:$16 sps:$4 sm:$0xff]  }
  0x76   :  { %v3056_v53 = vcombine.high %v156_v46, %v160_v48  ;;  %v3055_v58 = vcombine.low %v156_v46, %v160_v48  ;;  %v176_v60 = vld [vmem:[#allocation6 + $0x1f8] sm:$0xff]  ;;  %v3498_v41 = vld [vmem:[#allocation9 + $0x108] ss:$16 sps:$4 sm:$0xff]  }
  0x77   :  { %v3072_v4 = vcombine.high %v172_v59, %v176_v60  ;;  %v3071_v7 = vcombine.low %v172_v59, %v176_v60  ;;  %v3491_v28 = vld [vmem:[#allocation9 + $0xe4] ss:$16 sps:$4 sm:$0xff]   ;;  %v3489_v31 = vld [vmem:[#allocation9 + $0xe0] ss:$16 sps:$4 sm:$0xff]   ;;  %v3510_v48 = vld [vmem:[#allocation9 + $0x148] ss:$16 sps:$4 sm:$0xff]  }
  0x78   :  { %510 = vmatpush1.bf16.msra.mxu0 %v3057_v54  ;;  %551 = vmatpush1.bf16.msra.mxu1 %v3059_v3  ;;  %v164_v54 = vld [vmem:[#allocation6 + $0x198] sm:$0xff]  ;;  %v3536_v60 = vld [vmem:[#allocation9 + $0x1cc] ss:$16 sps:$4 sm:$0xff]  }
  0x79   :  { %511 = vmatprep.subr.bf16.mxu0 %v3066_v56  ;;  %552 = vmatprep.subr.bf16.mxu1 %v3068_v6  ;;  %v168_v56 = vld [vmem:[#allocation6 + $0x1b8] sm:$0xff]  ;;  %v3452_v6 = vld [vmem:[#allocation9 + $0xc] ss:$16 sps:$4 sm:$0xff]  }
  0x7a   :  { %v3064_v61 = vcombine.high %v164_v54, %v168_v56  ;;  %v3447_v3 = vld [vmem:[#allocation9] ss:$16 sps:$4 sm:$0xff]   ;;  %v3515_v43 = vld [vmem:[#allocation9 + $0x164] ss:$16 sps:$4 sm:$0xff]  }
  0x7b   :  { %v3501_v39 = vld [vmem:[#allocation9 + $0x120] ss:$16 sps:$4 sm:$0xff]   ;;  %v3527_v51 = vld [vmem:[#allocation9 + $0x1a4] ss:$16 sps:$4 sm:$0xff]  }
  0x7c   :  { %512 = vmatpush1.bf16.msra.mxu0 %v3065_v62  ;;  %553 = vmatpush1.bf16.msra.mxu1 %v3067_v11  ;;  %v3449_v62 = vld [vmem:[#allocation9 + $0x4] ss:$16 sps:$4 sm:$0xff]   ;;  %v3458_v11 = vld [vmem:[#allocation9 + $0x2c] ss:$16 sps:$4 sm:$0xff]   ;;  %v3507_v42 = vld [vmem:[#allocation9 + $0x140] ss:$16 sps:$4 sm:$0xff]  }
  0x7d   :  { %579 = vmatprep.subr.bf16.mxu0 %v3014_v1  ;;  %620 = vmatprep.subr.bf16.mxu1 %v3016_v14  ;;  %v3063_v1 = vcombine.low %v164_v54, %v168_v56  ;;  %v3456_v14 = vld [vmem:[#allocation9 + $0x28] ss:$16 sps:$4 sm:$0xff]   ;;  %v3513_v46 = vld [vmem:[#allocation9 + $0x160] ss:$16 sps:$4 sm:$0xff]   ;;  %v3530_v56 = vld [vmem:[#allocation9 + $0x1ac] ss:$16 sps:$4 sm:$0xff]  }
  0x7e   :  { %v3519_v50 = vld [vmem:[#allocation9 + $0x180] ss:$16 sps:$4 sm:$0xff]   ;;  %v3522_v54 = vld [vmem:[#allocation9 + $0x188] ss:$16 sps:$4 sm:$0xff]  }
  0x7f   :  { %530 = vmatmul.mubr.bf16.vlgmr.msra.gmra.mrb[0].mxu0 %v4118_v2  ;;  %571 = vmatmul.mubr.bf16.vlgmr.msra.gmra.mrb[0].mxu1 %v4118_v2  ;;  %v3531_v59 = vld [vmem:[#allocation9 + $0x1c0] ss:$16 sps:$4 sm:$0xff]  }
  0x80   :  { %580 = vmatpush1.bf16.msra.mxu0 %v3013_v8  ;;  %611 = vmatprep.mubr.bf16.mxu0 %v4014_v0  ;;  %v3453_v8 = vld [vmem:[#allocation9 + $0x20] ss:$16 sps:$4 sm:$0xff]  }
  0x81   :  { %581 = vmatprep.subr.bf16.mxu0 %v3022_v10  ;;  %621 = vmatpush1.bf16.msra.mxu1 %v3015_v21  ;;  %v3450_v10 = vld [vmem:[#allocation9 + $0x8] ss:$16 sps:$4 sm:$0xff]   ;;  %v3479_v21 = vld [vmem:[#allocation9 + $0xa4] ss:$16 sps:$4 sm:$0xff]  }
  0x82   :  { %652 = vmatprep.mubr.bf16.mxu1 %v4014_v0  ;;  %622 = vmatprep.subr.bf16.mxu1 %v3024_v22  ;;  %v3054_v0 = vcombine.high %v155_v35, %v159_v36  ;;  %v3468_v22 = vld [vmem:[#allocation9 + $0x68] ss:$16 sps:$4 sm:$0xff]   ;;  %v3495_v35 = vld [vmem:[#allocation9 + $0x100] ss:$16 sps:$4 sm:$0xff]   ;;  %v3503_v36 = vld [vmem:[#allocation9 + $0x124] ss:$16 sps:$4 sm:$0xff]  }
  0x84   :  { %582 = vmatpush1.bf16.msra.mxu0 %v3021_v16  ;;  %v3465_v16 = vld [vmem:[#allocation9 + $0x60] ss:$16 sps:$4 sm:$0xff]  }
  0x85   :  { %583 = vmatprep.subr.bf16.mxu0 %v3030_v18  ;;  %623 = vmatpush1.bf16.msra.mxu1 %v3023_v29  ;;  %v3462_v18 = vld [vmem:[#allocation9 + $0x48] ss:$16 sps:$4 sm:$0xff]  }
  0x86   :  { %624 = vmatprep.subr.bf16.mxu1 %v3032_v30  ;;  %v3480_v29 = vld [vmem:[#allocation9 + $0xa8] ss:$16 sps:$4 sm:$0xff]   ;;  %v3488_v30 = vld [vmem:[#allocation9 + $0xcc] ss:$16 sps:$4 sm:$0xff]  }
  0x88   :  { %584 = vmatpush1.bf16.msra.mxu0 %v3029_v24  ;;  %v3485_v24 = vld [vmem:[#allocation9 + $0xc4] ss:$16 sps:$4 sm:$0xff]  }
  0x89   :  { %585 = vmatprep.subr.bf16.mxu0 %v3038_v26  ;;  %625 = vmatpush1.bf16.msra.mxu1 %v3031_v37  ;;  %v3482_v26 = vld [vmem:[#allocation9 + $0xac] ss:$16 sps:$4 sm:$0xff]   ;;  %v3492_v37 = vld [vmem:[#allocation9 + $0xe8] ss:$16 sps:$4 sm:$0xff]  }
  0x8a   :  { %626 = vmatprep.subr.bf16.mxu1 %v3040_v38  ;;  %v3500_v38 = vld [vmem:[#allocation9 + $0x10c] ss:$16 sps:$4 sm:$0xff]  }
  0x8c   :  { %586 = vmatpush1.bf16.msra.mxu0 %v3037_v32  ;;  %v3497_v32 = vld [vmem:[#allocation9 + $0x104] ss:$16 sps:$4 sm:$0xff]  }
  0x8d   :  { %587 = vmatprep.subr.bf16.mxu0 %v3046_v34  ;;  %627 = vmatpush1.bf16.msra.mxu1 %v3039_v44  ;;  %v3494_v34 = vld [vmem:[#allocation9 + $0xec] ss:$16 sps:$4 sm:$0xff]   ;;  %v3504_v44 = vld [vmem:[#allocation9 + $0x128] ss:$16 sps:$4 sm:$0xff]  }
  0x8e   :  { %628 = vmatprep.subr.bf16.mxu1 %v3048_v45  ;;  %v3512_v45 = vld [vmem:[#allocation9 + $0x14c] ss:$16 sps:$4 sm:$0xff]  }
  0x90   :  { %588 = vmatpush1.bf16.msra.mxu0 %v3045_v40  ;;  %v3509_v40 = vld [vmem:[#allocation9 + $0x144] ss:$16 sps:$4 sm:$0xff]  }
  0x91   :  { %589 = vmatprep.subr.bf16.mxu0 %v3054_v0  ;;  %629 = vmatpush1.bf16.msra.mxu1 %v3047_v52  ;;  %v3506_v0 = vld [vmem:[#allocation9 + $0x12c] ss:$16 sps:$4 sm:$0xff]   ;;  %v3516_v52 = vld [vmem:[#allocation9 + $0x168] ss:$16 sps:$4 sm:$0xff]  }
  0x92   :  { %630 = vmatprep.subr.bf16.mxu1 %v3056_v53  ;;  %v3524_v53 = vld [vmem:[#allocation9 + $0x18c] ss:$16 sps:$4 sm:$0xff]  }
  0x94   :  { %590 = vmatpush1.bf16.msra.mxu0 %v3053_v47  ;;  %v3521_v47 = vld [vmem:[#allocation9 + $0x184] ss:$16 sps:$4 sm:$0xff]  }
  0x95   :  { %591 = vmatprep.subr.bf16.mxu0 %v3062_v49  ;;  %631 = vmatpush1.bf16.msra.mxu1 %v3055_v58  ;;  %v3518_v49 = vld [vmem:[#allocation9 + $0x16c] ss:$16 sps:$4 sm:$0xff]   ;;  %v3528_v58 = vld [vmem:[#allocation9 + $0x1a8] ss:$16 sps:$4 sm:$0xff]  }
  0x96   :  { %632 = vmatprep.subr.bf16.mxu1 %v3064_v61  ;;  %v3539_v61 = vld [vmem:[#allocation9 + $0x1e4] ss:$16 sps:$4 sm:$0xff]  }
  0x98   :  { %592 = vmatpush1.bf16.msra.mxu0 %v3061_v55  ;;  %v3525_v55 = vld [vmem:[#allocation9 + $0x1a0] ss:$16 sps:$4 sm:$0xff]  }
  0x99   :  { %593 = vmatprep.subr.bf16.mxu0 %v3070_v57  ;;  %633 = vmatpush1.bf16.msra.mxu1 %v3063_v1  ;;  %v3533_v57 = vld [vmem:[#allocation9 + $0x1c4] ss:$16 sps:$4 sm:$0xff]   ;;  %v3542_v1 = vld [vmem:[#allocation9 + $0x1ec] ss:$16 sps:$4 sm:$0xff]  }
  0x9a   :  { %634 = vmatprep.subr.bf16.mxu1 %v3072_v4  ;;  %v3540_v4 = vld [vmem:[#allocation9 + $0x1e8] ss:$16 sps:$4 sm:$0xff]  }
  0x9c   :  { %594 = vmatpush1.bf16.msra.mxu0 %v3069_v63  ;;  %v3537_v63 = vld [vmem:[#allocation9 + $0x1e0] ss:$16 sps:$4 sm:$0xff]  }
  0x9d   :  { %2312 = vmatprep.subr.bf16.mxu0 %v3449_v62  ;;  %635 = vmatpush1.bf16.msra.mxu1 %v3071_v7  ;;  %v3534_v62 = vld [vmem:[#allocation9 + $0x1c8] ss:$16 sps:$4 sm:$0xff]  }
  0x9e   :  { %2476 = vmatprep.subr.bf16.mxu1 %v3452_v6  ;;  %v690_v6 = vlaneseq }
  0x9f   :  { %612 = vmatmul.mubr.bf16.vlgmr.msra.gmra.mrb[4].mxu0 %v4118_v2 }
  0xa0   :  { %2313 = vmatpush1.bf16.msra.mxu0 %v3447_v3  ;;  %653 = vmatmul.mubr.bf16.vlgmr.msra.gmra.mrb[4].mxu1 %v4118_v2  ;;  %v3477_v2 = vld [vmem:[#allocation9 + $0xa0] ss:$16 sps:$4 sm:$0xff]   ;;  %v3545_v3 = vld [vmem:[#allocation9 + $0x204] ss:$16 sps:$4 sm:$0xff]   ;;  %v4126_v7 = vshrl.u32 %v690_v6, 7 }
  0xa1   :  { %2314 = vmatprep.subr.bf16.mxu0 %v3455_v5  ;;  %2477 = vmatpush1.bf16.msra.mxu1 %v3450_v10  ;;  %v3548_v5 = vld [vmem:[#allocation9 + $0x20c] ss:$16 sps:$4 sm:$0xff]  }
  0xa2   :  { %2478 = vmatprep.subr.bf16.mxu1 %v3458_v11  ;;  %v696_v10 = vsub.s32 1, %v4126_v7 }
  0xa4   :  { %2315 = vmatpush1.bf16.msra.mxu0 %v3453_v8  ;;  %v692_v8 = vsub.s32 0, %v4126_v7 }
  0xa5   :  { %2316 = vmatprep.subr.bf16.mxu0 %v3461_v9  ;;  %2479 = vmatpush1.bf16.msra.mxu1 %v3456_v14  ;;  %v4129_v9 = vld [vmem:[#allocation8] sm:$0xff]  ;;  %v704_v14 = vsub.s32 3, %v4126_v7 }
  0xa6   :  { %2480 = vmatprep.subr.bf16.mxu1 %v3464_v15  ;;  %v693_v11 = vrot.slane %v4129_v9, %v692_v8 }
  0xa8   :  { %2317 = vmatpush1.bf16.msra.mxu0 %v3459_v12  ;;  %v697_v12 = vrot.slane %v4129_v9, %v696_v10 }
  0xa9   :  { %2318 = vmatprep.subr.bf16.mxu0 %v3467_v13  ;;  %2481 = vmatpush1.bf16.msra.mxu1 %v3462_v18 }
  0xaa   :  { %2482 = vmatprep.subr.bf16.mxu1 %v3470_v19 }
  0xac   :  { %2319 = vmatpush1.bf16.msra.mxu0 %v3465_v16 }
  0xad   :  { %2320 = vmatprep.subr.bf16.mxu0 %v3473_v17  ;;  %2483 = vmatpush1.bf16.msra.mxu1 %v3468_v22  ;;  %v705_v22 = vrot.slane %v4129_v9, %v704_v14 }
  0xae   :  { %2484 = vmatprep.subr.bf16.mxu1 %v3476_v23 }
  0xb0   :  { %2321 = vmatpush1.bf16.msra.mxu0 %v3471_v20 }
  0xb1   :  { %2322 = vmatprep.subr.bf16.mxu0 %v3479_v21  ;;  %2485 = vmatpush1.bf16.msra.mxu1 %v3474_v25 }
  0xb2   :  { %2486 = vmatprep.subr.bf16.mxu1 %v3482_v26 }
  0xb4   :  { %2323 = vmatpush1.bf16.msra.mxu0 %v3477_v2  ;;  %v3543_v2 = vld [vmem:[#allocation9 + $0x200] ss:$16 sps:$4 sm:$0xff]  }
  0xb5   :  { %2324 = vmatprep.subr.bf16.mxu0 %v3485_v24  ;;  %2487 = vmatpush1.bf16.msra.mxu1 %v3480_v29  ;;  %v3546_v24 = vld [vmem:[#allocation9 + $0x208] ss:$16 sps:$4 sm:$0xff]  }
  0xb6   :  { %2488 = vmatprep.subr.bf16.mxu1 %v3488_v30 }
  0xb8   :  { %2325 = vmatpush1.bf16.msra.mxu0 %v3483_v27  ;;  %v3551_v27 = vld [vmem:[#allocation9 + $0x224] ss:$16 sps:$4 sm:$0xff]  }
  0xb9   :  { %2326 = vmatprep.subr.bf16.mxu0 %v3491_v28  ;;  %2489 = vmatpush1.bf16.msra.mxu1 %v3486_v33  ;;  %v3554_v28 = vld [vmem:[#allocation9 + $0x22c] ss:$16 sps:$4 sm:$0xff]   ;;  %v3549_v33 = vld [vmem:[#allocation9 + $0x220] ss:$16 sps:$4 sm:$0xff]  }
  0xba   :  { %2490 = vmatprep.subr.bf16.mxu1 %v3494_v34  ;;  %v3552_v34 = vld [vmem:[#allocation9 + $0x228] ss:$16 sps:$4 sm:$0xff]  }
  0xbc   :  { %2327 = vmatpush1.bf16.msra.mxu0 %v3489_v31 }
  0xbd   :  { %2328 = vmatprep.subr.bf16.mxu0 %v3497_v32  ;;  %2491 = vmatpush1.bf16.msra.mxu1 %v3492_v37  ;;  %v3560_v37 = vld [vmem:[#allocation9 + $0x24c] ss:$16 sps:$4 sm:$0xff]  }
  0xbe   :  { %2492 = vmatprep.subr.bf16.mxu1 %v3500_v38 }
  0xc0   :  { %2329 = vmatpush1.bf16.msra.mxu0 %v3495_v35 }
  0xc1   :  { %2330 = vmatprep.subr.bf16.mxu0 %v3503_v36  ;;  %2493 = vmatpush1.bf16.msra.mxu1 %v3498_v41  ;;  %v3557_v36 = vld [vmem:[#allocation9 + $0x244] ss:$16 sps:$4 sm:$0xff]  }
  0xc2   :  { %2494 = vmatprep.subr.bf16.mxu1 %v3506_v0  ;;  %v3563_v41 = vld [vmem:[#allocation9 + $0x264] ss:$16 sps:$4 sm:$0xff]   ;;  %v3566_v0 = vld [vmem:[#allocation9 + $0x26c] ss:$16 sps:$4 sm:$0xff]  }
  0xc4   :  { %2331 = vmatpush1.bf16.msra.mxu0 %v3501_v39  ;;  %v3555_v39 = vld [vmem:[#allocation9 + $0x240] ss:$16 sps:$4 sm:$0xff]  }
  0xc5   :  { %2332 = vmatprep.subr.bf16.mxu0 %v3509_v40  ;;  %2495 = vmatpush1.bf16.msra.mxu1 %v3504_v44  ;;  %v3558_v40 = vld [vmem:[#allocation9 + $0x248] ss:$16 sps:$4 sm:$0xff]   ;;  %v3569_v44 = vld [vmem:[#allocation9 + $0x284] ss:$16 sps:$4 sm:$0xff]  }
  0xc6   :  { %2496 = vmatprep.subr.bf16.mxu1 %v3512_v45  ;;  %v3572_v45 = vld [vmem:[#allocation9 + $0x28c] ss:$16 sps:$4 sm:$0xff]  }
  0xc8   :  { %2333 = vmatpush1.bf16.msra.mxu0 %v3507_v42  ;;  %v3561_v42 = vld [vmem:[#allocation9 + $0x260] ss:$16 sps:$4 sm:$0xff]  }
  0xc9   :  { %2334 = vmatprep.subr.bf16.mxu0 %v3515_v43  ;;  %2497 = vmatpush1.bf16.msra.mxu1 %v3510_v48  ;;  %v3564_v43 = vld [vmem:[#allocation9 + $0x268] ss:$16 sps:$4 sm:$0xff]   ;;  %v3575_v48 = vld [vmem:[#allocation9 + $0x2a4] ss:$16 sps:$4 sm:$0xff]  }
  0xca   :  { %2498 = vmatprep.subr.bf16.mxu1 %v3518_v49  ;;  %v3578_v49 = vld [vmem:[#allocation9 + $0x2ac] ss:$16 sps:$4 sm:$0xff]  }
  0xcc   :  { %2335 = vmatpush1.bf16.msra.mxu0 %v3513_v46  ;;  %v3567_v46 = vld [vmem:[#allocation9 + $0x280] ss:$16 sps:$4 sm:$0xff]  }
  0xcd   :  { %2336 = vmatprep.subr.bf16.mxu0 %v3521_v47  ;;  %2499 = vmatpush1.bf16.msra.mxu1 %v3516_v52  ;;  %v3570_v47 = vld [vmem:[#allocation9 + $0x288] ss:$16 sps:$4 sm:$0xff]   ;;  %v3581_v52 = vld [vmem:[#allocation9 + $0x2c4] ss:$16 sps:$4 sm:$0xff]  }
  0xce   :  { %2500 = vmatprep.subr.bf16.mxu1 %v3524_v53  ;;  %v3584_v53 = vld [vmem:[#allocation9 + $0x2cc] ss:$16 sps:$4 sm:$0xff]  }
  0xd0   :  { %2337 = vmatpush1.bf16.msra.mxu0 %v3519_v50  ;;  %v3573_v50 = vld [vmem:[#allocation9 + $0x2a0] ss:$16 sps:$4 sm:$0xff]  }
  0xd1   :  { %2338 = vmatprep.subr.bf16.mxu0 %v3527_v51  ;;  %2501 = vmatpush1.bf16.msra.mxu1 %v3522_v54  ;;  %v3576_v51 = vld [vmem:[#allocation9 + $0x2a8] ss:$16 sps:$4 sm:$0xff]   ;;  %v3579_v54 = vld [vmem:[#allocation9 + $0x2c0] ss:$16 sps:$4 sm:$0xff]  }
  0xd2   :  { %2502 = vmatprep.subr.bf16.mxu1 %v3530_v56  ;;  %v3587_v56 = vld [vmem:[#allocation9 + $0x2e4] ss:$16 sps:$4 sm:$0xff]  }
  0xd4   :  { %2339 = vmatpush1.bf16.msra.mxu0 %v3525_v55  ;;  %v3582_v55 = vld [vmem:[#allocation9 + $0x2c8] ss:$16 sps:$4 sm:$0xff]  }
  0xd5   :  { %2340 = vmatprep.subr.bf16.mxu0 %v3533_v57  ;;  %2503 = vmatpush1.bf16.msra.mxu1 %v3528_v58  ;;  %v3590_v57 = vld [vmem:[#allocation9 + $0x2ec] ss:$16 sps:$4 sm:$0xff]  }
  0xd6   :  { %2504 = vmatprep.subr.bf16.mxu1 %v3536_v60  ;;  %v3585_v60 = vld [vmem:[#allocation9 + $0x2e0] ss:$16 sps:$4 sm:$0xff]  }
  0xd8   :  { %2341 = vmatpush1.bf16.msra.mxu0 %v3531_v59 }
  0xd9   :  { %2342 = vmatprep.subr.bf16.mxu0 %v3539_v61  ;;  %2505 = vmatpush1.bf16.msra.mxu1 %v3534_v62  ;;  %v3588_v61 = vld [vmem:[#allocation9 + $0x2e8] ss:$16 sps:$4 sm:$0xff]  }
  0xda   :  { %2506 = vmatprep.subr.bf16.mxu1 %v3542_v1  ;;  %v3596_v1 = vld [vmem:[#allocation9 + $0x30c] ss:$16 sps:$4 sm:$0xff]  }
  0xdc   :  { %2343 = vmatpush1.bf16.msra.mxu0 %v3537_v63  ;;  %v3593_v63 = vld [vmem:[#allocation9 + $0x304] ss:$16 sps:$4 sm:$0xff]  }
  0xdd   :  { %2353 = vmatprep.subr.bf16.mxu0 %v3545_v3  ;;  %2507 = vmatpush1.bf16.msra.mxu1 %v3540_v4  ;;  %v3591_v4 = vld [vmem:[#allocation9 + $0x300] ss:$16 sps:$4 sm:$0xff]  }
  0xde   :  { %2517 = vmatprep.subr.bf16.mxu1 %v3548_v5  ;;  %v3594_v5 = vld [vmem:[#allocation9 + $0x308] ss:$16 sps:$4 sm:$0xff]  }
 0x152   :  { %v531_v13 = vpop.f32.mrb[0].mxu0  ;;  %v4142_v25 = vpop.f32.mrb[0].mxu1 }
 0x153   :  { %v730_v15 = vadd.f32 %v693_v11, %v531_v13  ;;  %v533_v16 = vpop.f32.mrb[1].mxu0  ;;  %v574_v29 = vpop.f32.mrb[1].mxu1  ;;  %v3599_v11 = vld [vmem:[#allocation9 + $0x324] ss:$16 sps:$4 sm:$0xff]  }
 0x154   :  { %v731_v17 = vadd.f32 %v697_v12, %v533_v16  ;;  %v535_v18 = vpop.f32.mrb[2].mxu0  ;;  %v733_v30 = vadd.f32 %v705_v22, %v574_v29  ;;  %v576_v31 = vpop.f32.mrb[2].mxu1  ;;  %v3602_v12 = vld [vmem:[#allocation9 + $0x32c] ss:$16 sps:$4 sm:$0xff]   ;;  %v3606_v22 = vld [vmem:[#allocation9 + $0x348] ss:$16 sps:$4 sm:$0xff]  }
 0x155   :  { %v738_v19 = vmax.f32 %v730_v15, 0.0  ;;  %v536_v20 = vpop.f32.mrb[3].mxu0  ;;  %v577_v32 = vpop.f32.mrb[3].mxu1  ;;  %v3600_v18 = vld [vmem:[#allocation9 + $0x328] ss:$16 sps:$4 sm:$0xff]   ;;  %v700_v29 = vsub.s32 2, %v4126_v7 }
 0x156   :  { %v739_v21 = vmax.f32 %v731_v17, 0.0  ;;  %v741_v35 = vmax.f32 %v733_v30, 0.0  ;;  %v3597_v17 = vld [vmem:[#allocation9 + $0x320] ss:$16 sps:$4 sm:$0xff]   ;;  %v3608_v20 = vld [vmem:[#allocation9 + $0x34c] ss:$16 sps:$4 sm:$0xff]  }
 0x157   :  { %v746_v26 = vpack.c.bf16 %v738_v19, %v738_v19  ;;  %v3605_v19 = vld [vmem:[#allocation9 + $0x344] ss:$16 sps:$4 sm:$0xff]   ;;  %v3615_v30 = vld [vmem:[#allocation9 + $0x380] ss:$16 sps:$4 sm:$0xff]   ;;  %v3618_v31 = vld [vmem:[#allocation9 + $0x388] ss:$16 sps:$4 sm:$0xff]  }
 0x158   :  { %v747_v23 = vpack.c.bf16 %v739_v21, %v739_v21  ;;  %v749_v38 = vpack.c.bf16 %v741_v35, %v741_v35  ;;  %v3603_v21 = vld [vmem:[#allocation9 + $0x340] ss:$16 sps:$4 sm:$0xff]   ;;  %v3623_v32 = vld [vmem:[#allocation9 + $0x3a4] ss:$16 sps:$4 sm:$0xff]   ;;  %v701_v35 = vrot.slane %v4129_v9, %v700_v29 }
 0x15a   :  { %2344 = vmatprep.mubr.bf16.mxu0 %v747_v23  ;;  %2508 = vmatprep.mubr.bf16.mxu1 %v747_v23  ;;  %v3611_v23 = vld [vmem:[#allocation9 + $0x364] ss:$16 sps:$4 sm:$0xff]  }
 0x15b   :  { %2345 = vmatmul.mubr.bf16.vlgmr.msra.gmra.mrb[8].mxu0 %v746_v26  ;;  %2509 = vmatmul.mubr.bf16.vlgmr.msra.gmra.mrb[8].mxu1 %v746_v26  ;;  %v3612_v26 = vld [vmem:[#allocation9 + $0x368] ss:$16 sps:$4 sm:$0xff]  }
 0x15c   :  { %2354 = vmatpush1.bf16.msra.mxu0 %v3543_v2  ;;  %2518 = vmatpush1.bf16.msra.mxu1 %v3546_v24  ;;  %v3614_v2 = vld [vmem:[#allocation9 + $0x36c] ss:$16 sps:$4 sm:$0xff]   ;;  %v3609_v24 = vld [vmem:[#allocation9 + $0x360] ss:$16 sps:$4 sm:$0xff]  }
 0x15d   :  { %2355 = vmatprep.subr.bf16.mxu0 %v3551_v27  ;;  %2519 = vmatprep.subr.bf16.mxu1 %v3554_v28  ;;  %v3617_v27 = vld [vmem:[#allocation9 + $0x384] ss:$16 sps:$4 sm:$0xff]   ;;  %v3620_v28 = vld [vmem:[#allocation9 + $0x38c] ss:$16 sps:$4 sm:$0xff]  }
 0x15e   :  { %2385 = vmatprep.mubr.bf16.mxu0 %v749_v38  ;;  %2549 = vmatprep.mubr.bf16.mxu1 %v749_v38  ;;  %v3629_v38 = vld [vmem:[#allocation9 + $0x3c4] ss:$16 sps:$4 sm:$0xff]  }
 0x160   :  { %2356 = vmatpush1.bf16.msra.mxu0 %v3549_v33  ;;  %2520 = vmatpush1.bf16.msra.mxu1 %v3552_v34  ;;  %v3626_v33 = vld [vmem:[#allocation9 + $0x3ac] ss:$16 sps:$4 sm:$0xff]   ;;  %v712_v34 = vsub.s32 5, %v4126_v7 }
 0x161   :  { %2357 = vmatprep.subr.bf16.mxu0 %v3557_v36  ;;  %2521 = vmatprep.subr.bf16.mxu1 %v3560_v37  ;;  %v3621_v36 = vld [vmem:[#allocation9 + $0x3a0] ss:$16 sps:$4 sm:$0xff]   ;;  %v3624_v37 = vld [vmem:[#allocation9 + $0x3a8] ss:$16 sps:$4 sm:$0xff]  }
 0x164   :  { %2358 = vmatpush1.bf16.msra.mxu0 %v3555_v39  ;;  %2522 = vmatpush1.bf16.msra.mxu1 %v3558_v40  ;;  %v3632_v39 = vld [vmem:[#allocation9 + $0x3cc] ss:$16 sps:$4 sm:$0xff]   ;;  %v713_v40 = vrot.slane %v4129_v9, %v712_v34  ;;  %v3695_v34 = vld [vmem:[#allocation9 + $0x524] ss:$16 sps:$4 sm:$0xff]  }
 0x165   :  { %2359 = vmatprep.subr.bf16.mxu0 %v3563_v41  ;;  %2523 = vmatprep.subr.bf16.mxu1 %v3566_v0  ;;  %v732_v41 = vadd.f32 %v701_v35, %v4142_v25  ;;  %v3627_v0 = vld [vmem:[#allocation9 + $0x3c0] ss:$16 sps:$4 sm:$0xff]   ;;  %v3698_v35 = vld [vmem:[#allocation9 + $0x52c] ss:$16 sps:$4 sm:$0xff]  }
 0x168   :  { %2360 = vmatpush1.bf16.msra.mxu0 %v3561_v42  ;;  %2524 = vmatpush1.bf16.msra.mxu1 %v3564_v43  ;;  %v3630_v42 = vld [vmem:[#allocation9 + $0x3c8] ss:$16 sps:$4 sm:$0xff]   ;;  %v3635_v43 = vld [vmem:[#allocation9 + $0x3e4] ss:$16 sps:$4 sm:$0xff]  }
 0x169   :  { %2361 = vmatprep.subr.bf16.mxu0 %v3569_v44  ;;  %2525 = vmatprep.subr.bf16.mxu1 %v3572_v45  ;;  %v3638_v44 = vld [vmem:[#allocation9 + $0x3ec] ss:$16 sps:$4 sm:$0xff]  }
 0x16c   :  { %2362 = vmatpush1.bf16.msra.mxu0 %v3567_v46  ;;  %2526 = vmatpush1.bf16.msra.mxu1 %v3570_v47  ;;  %v740_v46 = vmax.f32 %v732_v41, 0.0  ;;  %v3633_v47 = vld [vmem:[#allocation9 + $0x3e0] ss:$16 sps:$4 sm:$0xff]   ;;  %v3702_v41 = vld [vmem:[#allocation9 + $0x548] ss:$16 sps:$4 sm:$0xff]  }
 0x16d   :  { %2363 = vmatprep.subr.bf16.mxu0 %v3575_v48  ;;  %2527 = vmatprep.subr.bf16.mxu1 %v3578_v49  ;;  %v3636_v48 = vld [vmem:[#allocation9 + $0x3e8] ss:$16 sps:$4 sm:$0xff]   ;;  %v3641_v49 = vld [vmem:[#allocation9 + $0x404] ss:$16 sps:$4 sm:$0xff]  }
 0x170   :  { %2364 = vmatpush1.bf16.msra.mxu0 %v3573_v50  ;;  %2528 = vmatpush1.bf16.msra.mxu1 %v3576_v51  ;;  %v3644_v50 = vld [vmem:[#allocation9 + $0x40c] ss:$16 sps:$4 sm:$0xff]   ;;  %v748_v51 = vpack.c.bf16 %v740_v46, %v740_v46 }
 0x171   :  { %2365 = vmatprep.subr.bf16.mxu0 %v3581_v52  ;;  %2529 = vmatprep.subr.bf16.mxu1 %v3584_v53  ;;  %v3639_v52 = vld [vmem:[#allocation9 + $0x400] ss:$16 sps:$4 sm:$0xff]   ;;  %v3642_v53 = vld [vmem:[#allocation9 + $0x408] ss:$16 sps:$4 sm:$0xff]   ;;  %v3716_v46 = vld [vmem:[#allocation9 + $0x58c] ss:$16 sps:$4 sm:$0xff]  }
 0x172   :  { %v4144_v58 = vpop.f32.mrb[4].mxu0 }
 0x173   :  { %v4146_v59 = vpop.f32.mrb[5].mxu0  ;;  %v4148_v6 = vpop.f32.mrb[4].mxu1 }
 0x174   :  { %2366 = vmatpush1.bf16.msra.mxu0 %v3579_v54  ;;  %2530 = vmatpush1.bf16.msra.mxu1 %v3582_v55  ;;  %v617_v62 = vpop.f32.mrb[6].mxu0  ;;  %v4150_v13 = vpop.f32.mrb[5].mxu1  ;;  %v735_v45 = vadd.f32 %v713_v40, %v4146_v59  ;;  %v3647_v54 = vld [vmem:[#allocation9 + $0x424] ss:$16 sps:$4 sm:$0xff]   ;;  %v3650_v55 = vld [vmem:[#allocation9 + $0x42c] ss:$16 sps:$4 sm:$0xff]  }
 0x175   :  { %2367 = vmatprep.subr.bf16.mxu0 %v3587_v56  ;;  %2531 = vmatprep.subr.bf16.mxu1 %v3590_v57  ;;  %v618_v3 = vpop.f32.mrb[7].mxu0  ;;  %v658_v15 = vpop.f32.mrb[6].mxu1  ;;  %v3645_v57 = vld [vmem:[#allocation9 + $0x420] ss:$16 sps:$4 sm:$0xff]   ;;  %v3648_v59 = vld [vmem:[#allocation9 + $0x428] ss:$16 sps:$4 sm:$0xff]  }
 0x176   :  { %v659_v16 = vpop.f32.mrb[7].mxu1  ;;  %v743_v25 = vmax.f32 %v735_v45, 0.0  ;;  %v3651_v62 = vld [vmem:[#allocation9 + $0x440] ss:$16 sps:$4 sm:$0xff]   ;;  %v3662_v3 = vld [vmem:[#allocation9 + $0x46c] ss:$16 sps:$4 sm:$0xff]  }
 0x177   :  { %v3663_v15 = vld [vmem:[#allocation9 + $0x480] ss:$16 sps:$4 sm:$0xff]   ;;  %v3666_v16 = vld [vmem:[#allocation9 + $0x488] ss:$16 sps:$4 sm:$0xff]   ;;  %v3713_v45 = vld [vmem:[#allocation9 + $0x584] ss:$16 sps:$4 sm:$0xff]  }
 0x178   :  { %2368 = vmatpush1.bf16.msra.mxu0 %v3585_v60  ;;  %2532 = vmatpush1.bf16.msra.mxu1 %v3588_v61  ;;  %v751_v56 = vpack.c.bf16 %v743_v25, %v743_v25  ;;  %v3653_v60 = vld [vmem:[#allocation9 + $0x444] ss:$16 sps:$4 sm:$0xff]   ;;  %v3656_v61 = vld [vmem:[#allocation9 + $0x44c] ss:$16 sps:$4 sm:$0xff]   ;;  %v3699_v40 = vld [vmem:[#allocation9 + $0x540] ss:$16 sps:$4 sm:$0xff]  }
 0x179   :  { %2369 = vmatprep.subr.bf16.mxu0 %v3593_v63  ;;  %2533 = vmatprep.subr.bf16.mxu1 %v3596_v1  ;;  %v3654_v63 = vld [vmem:[#allocation9 + $0x448] ss:$16 sps:$4 sm:$0xff]   ;;  %v3659_v1 = vld [vmem:[#allocation9 + $0x464] ss:$16 sps:$4 sm:$0xff]   ;;  %v3722_v25 = vld [vmem:[#allocation9 + $0x5ac] ss:$16 sps:$4 sm:$0xff]  }
 0x17c   :  { %2370 = vmatpush1.bf16.msra.mxu0 %v3591_v4  ;;  %2534 = vmatpush1.bf16.msra.mxu1 %v3594_v5  ;;  %v3657_v4 = vld [vmem:[#allocation9 + $0x460] ss:$16 sps:$4 sm:$0xff]   ;;  %v3660_v5 = vld [vmem:[#allocation9 + $0x468] ss:$16 sps:$4 sm:$0xff]  }
 0x17d   :  { %2371 = vmatprep.subr.bf16.mxu0 %v3599_v11  ;;  %2535 = vmatprep.subr.bf16.mxu1 %v3602_v12  ;;  %v3665_v11 = vld [vmem:[#allocation9 + $0x484] ss:$16 sps:$4 sm:$0xff]   ;;  %v3668_v12 = vld [vmem:[#allocation9 + $0x48c] ss:$16 sps:$4 sm:$0xff]  }
 0x180   :  { %2372 = vmatpush1.bf16.msra.mxu0 %v3597_v17  ;;  %2536 = vmatpush1.bf16.msra.mxu1 %v3600_v18  ;;  %v3671_v17 = vld [vmem:[#allocation9 + $0x4a4] ss:$16 sps:$4 sm:$0xff]   ;;  %v3674_v18 = vld [vmem:[#allocation9 + $0x4ac] ss:$16 sps:$4 sm:$0xff]  }
 0x181   :  { %2373 = vmatprep.subr.bf16.mxu0 %v3605_v19  ;;  %2537 = vmatprep.subr.bf16.mxu1 %v3608_v20  ;;  %v3669_v19 = vld [vmem:[#allocation9 + $0x4a0] ss:$16 sps:$4 sm:$0xff]   ;;  %v3672_v20 = vld [vmem:[#allocation9 + $0x4a8] ss:$16 sps:$4 sm:$0xff]  }
 0x184   :  { %2374 = vmatpush1.bf16.msra.mxu0 %v3603_v21  ;;  %2538 = vmatpush1.bf16.msra.mxu1 %v3606_v22  ;;  %v3677_v21 = vld [vmem:[#allocation9 + $0x4c4] ss:$16 sps:$4 sm:$0xff]   ;;  %v3680_v22 = vld [vmem:[#allocation9 + $0x4cc] ss:$16 sps:$4 sm:$0xff]  }
 0x185   :  { %2375 = vmatprep.subr.bf16.mxu0 %v3611_v23  ;;  %2539 = vmatprep.subr.bf16.mxu1 %v3614_v2  ;;  %v3675_v23 = vld [vmem:[#allocation9 + $0x4c0] ss:$16 sps:$4 sm:$0xff]   ;;  %v3678_v2 = vld [vmem:[#allocation9 + $0x4c8] ss:$16 sps:$4 sm:$0xff]  }
 0x188   :  { %2376 = vmatpush1.bf16.msra.mxu0 %v3609_v24  ;;  %2540 = vmatpush1.bf16.msra.mxu1 %v3612_v26  ;;  %v3683_v24 = vld [vmem:[#allocation9 + $0x4e4] ss:$16 sps:$4 sm:$0xff]   ;;  %v3686_v26 = vld [vmem:[#allocation9 + $0x4ec] ss:$16 sps:$4 sm:$0xff]  }
 0x189   :  { %2377 = vmatprep.subr.bf16.mxu0 %v3617_v27  ;;  %2541 = vmatprep.subr.bf16.mxu1 %v3620_v28  ;;  %v3681_v27 = vld [vmem:[#allocation9 + $0x4e0] ss:$16 sps:$4 sm:$0xff]   ;;  %v3684_v28 = vld [vmem:[#allocation9 + $0x4e8] ss:$16 sps:$4 sm:$0xff]  }
 0x18c   :  { %2378 = vmatpush1.bf16.msra.mxu0 %v3615_v30  ;;  %2542 = vmatpush1.bf16.msra.mxu1 %v3618_v31  ;;  %v3689_v30 = vld [vmem:[#allocation9 + $0x504] ss:$16 sps:$4 sm:$0xff]   ;;  %v3692_v31 = vld [vmem:[#allocation9 + $0x50c] ss:$16 sps:$4 sm:$0xff]  }
 0x18d   :  { %2379 = vmatprep.subr.bf16.mxu0 %v3623_v32  ;;  %2543 = vmatprep.subr.bf16.mxu1 %v3626_v33  ;;  %v3687_v32 = vld [vmem:[#allocation9 + $0x500] ss:$16 sps:$4 sm:$0xff]   ;;  %v3690_v33 = vld [vmem:[#allocation9 + $0x508] ss:$16 sps:$4 sm:$0xff]  }
 0x190   :  { %2380 = vmatpush1.bf16.msra.mxu0 %v3621_v36  ;;  %2544 = vmatpush1.bf16.msra.mxu1 %v3624_v37  ;;  %v3693_v36 = vld [vmem:[#allocation9 + $0x520] ss:$16 sps:$4 sm:$0xff]   ;;  %v3696_v37 = vld [vmem:[#allocation9 + $0x528] ss:$16 sps:$4 sm:$0xff]  }
 0x191   :  { %2381 = vmatprep.subr.bf16.mxu0 %v3629_v38  ;;  %2545 = vmatprep.subr.bf16.mxu1 %v3632_v39  ;;  %v3701_v38 = vld [vmem:[#allocation9 + $0x544] ss:$16 sps:$4 sm:$0xff]   ;;  %v3704_v39 = vld [vmem:[#allocation9 + $0x54c] ss:$16 sps:$4 sm:$0xff]  }
 0x194   :  { %2382 = vmatpush1.bf16.msra.mxu0 %v3627_v0  ;;  %2546 = vmatpush1.bf16.msra.mxu1 %v3630_v42  ;;  %v3707_v0 = vld [vmem:[#allocation9 + $0x564] ss:$16 sps:$4 sm:$0xff]   ;;  %v3710_v42 = vld [vmem:[#allocation9 + $0x56c] ss:$16 sps:$4 sm:$0xff]  }
 0x195   :  { %2383 = vmatprep.subr.bf16.mxu0 %v3635_v43  ;;  %2547 = vmatprep.subr.bf16.mxu1 %v3638_v44  ;;  %v3705_v43 = vld [vmem:[#allocation9 + $0x560] ss:$16 sps:$4 sm:$0xff]   ;;  %v3708_v44 = vld [vmem:[#allocation9 + $0x568] ss:$16 sps:$4 sm:$0xff]  }
 0x198   :  { %2384 = vmatpush1.bf16.msra.mxu0 %v3633_v47  ;;  %2548 = vmatpush1.bf16.msra.mxu1 %v3636_v48  ;;  %v708_v47 = vsub.s32 4, %v4126_v7  ;;  %v3711_v48 = vld [vmem:[#allocation9 + $0x580] ss:$16 sps:$4 sm:$0xff]  }
 0x199   :  { %2394 = vmatprep.subr.bf16.mxu0 %v3641_v49  ;;  %2558 = vmatprep.subr.bf16.mxu1 %v3644_v50  ;;  %v3714_v49 = vld [vmem:[#allocation9 + $0x588] ss:$16 sps:$4 sm:$0xff]   ;;  %v3719_v50 = vld [vmem:[#allocation9 + $0x5a4] ss:$16 sps:$4 sm:$0xff]  }
 0x19b   :  { %2386 = vmatmul.mubr.bf16.vlgmr.msra.gmra.mrb[8].mxu0 %v748_v51  ;;  %2550 = vmatmul.mubr.bf16.vlgmr.msra.gmra.mrb[8].mxu1 %v748_v51  ;;  %v720_v51 = vsub.s32 7, %v4126_v7 }
 0x19c   :  { %2395 = vmatpush1.bf16.msra.mxu0 %v3639_v52  ;;  %2559 = vmatpush1.bf16.msra.mxu1 %v3642_v53  ;;  %v709_v52 = vrot.slane %v4129_v9, %v708_v47  ;;  %v3717_v53 = vld [vmem:[#allocation9 + $0x5a0] ss:$16 sps:$4 sm:$0xff]   ;;  %v3788_v47 = vld [vmem:[#allocation9 + $0x70c] ss:$16 sps:$4 sm:$0xff]  }
 0x19d   :  { %2396 = vmatprep.subr.bf16.mxu0 %v3647_v54  ;;  %2560 = vmatprep.subr.bf16.mxu1 %v3650_v55  ;;  %v3720_v54 = vld [vmem:[#allocation9 + $0x5a8] ss:$16 sps:$4 sm:$0xff]   ;;  %v3725_v55 = vld [vmem:[#allocation9 + $0x5c4] ss:$16 sps:$4 sm:$0xff]  }
 0x19e   :  { %2426 = vmatprep.mubr.bf16.mxu0 %v751_v56  ;;  %2590 = vmatprep.mubr.bf16.mxu1 %v751_v56  ;;  %v3728_v56 = vld [vmem:[#allocation9 + $0x5cc] ss:$16 sps:$4 sm:$0xff]  }
 0x1a0   :  { %2397 = vmatpush1.bf16.msra.mxu0 %v3645_v57  ;;  %2561 = vmatpush1.bf16.msra.mxu1 %v3648_v59  ;;  %v721_v57 = vrot.slane %v4129_v9, %v720_v51  ;;  %v734_v59 = vadd.f32 %v709_v52, %v4144_v58  ;;  %v3789_v51 = vld [vmem:[#allocation9 + $0x720] ss:$16 sps:$4 sm:$0xff]   ;;  %v3792_v52 = vld [vmem:[#allocation9 + $0x728] ss:$16 sps:$4 sm:$0xff]  }
 0x1a1   :  { %2398 = vmatprep.subr.bf16.mxu0 %v3653_v60  ;;  %2562 = vmatprep.subr.bf16.mxu1 %v3656_v61  ;;  %v3723_v60 = vld [vmem:[#allocation9 + $0x5c0] ss:$16 sps:$4 sm:$0xff]   ;;  %v3726_v61 = vld [vmem:[#allocation9 + $0x5c8] ss:$16 sps:$4 sm:$0xff]  }
 0x1a4   :  { %2399 = vmatpush1.bf16.msra.mxu0 %v3651_v62  ;;  %2563 = vmatpush1.bf16.msra.mxu1 %v3654_v63  ;;  %v3731_v62 = vld [vmem:[#allocation9 + $0x5e4] ss:$16 sps:$4 sm:$0xff]   ;;  %v3734_v63 = vld [vmem:[#allocation9 + $0x5ec] ss:$16 sps:$4 sm:$0xff]  }
 0x1a5   :  { %2400 = vmatprep.subr.bf16.mxu0 %v3659_v1  ;;  %2564 = vmatprep.subr.bf16.mxu1 %v3662_v3  ;;  %v737_v1 = vadd.f32 %v721_v57, %v4150_v13  ;;  %v742_v3 = vmax.f32 %v734_v59, 0.0  ;;  %v3803_v57 = vld [vmem:[#allocation9 + $0x764] ss:$16 sps:$4 sm:$0xff]   ;;  %v3806_v59 = vld [vmem:[#allocation9 + $0x76c] ss:$16 sps:$4 sm:$0xff]  }
 0x1a7   :  { %v745_v58 = vmax.f32 %v737_v1, 0.0  ;;  %v3807_v1 = vld [vmem:[#allocation9 + $0x780] ss:$16 sps:$4 sm:$0xff]  }
 0x1a8   :  { %2401 = vmatpush1.bf16.msra.mxu0 %v3657_v4  ;;  %2565 = vmatpush1.bf16.msra.mxu1 %v3660_v5  ;;  %v3729_v4 = vld [vmem:[#allocation9 + $0x5e0] ss:$16 sps:$4 sm:$0xff]   ;;  %v3732_v5 = vld [vmem:[#allocation9 + $0x5e8] ss:$16 sps:$4 sm:$0xff]  }
 0x1a9   :  { %2402 = vmatprep.subr.bf16.mxu0 %v3665_v11  ;;  %2566 = vmatprep.subr.bf16.mxu1 %v3668_v12  ;;  %v3737_v11 = vld [vmem:[#allocation9 + $0x604] ss:$16 sps:$4 sm:$0xff]   ;;  %v3740_v12 = vld [vmem:[#allocation9 + $0x60c] ss:$16 sps:$4 sm:$0xff]   ;;  %v753_v13 = vpack.c.bf16 %v745_v58, %v745_v58  ;;  %v3816_v58 = vld [vmem:[#allocation9 + $0x7a8] ss:$16 sps:$4 sm:$0xff]  }
 0x1ac   :  { %2403 = vmatpush1.bf16.msra.mxu0 %v3663_v15  ;;  %2567 = vmatpush1.bf16.msra.mxu1 %v3666_v16  ;;  %v750_v15 = vpack.c.bf16 %v742_v3, %v742_v3  ;;  %v3735_v16 = vld [vmem:[#allocation9 + $0x600] ss:$16 sps:$4 sm:$0xff]   ;;  %v3810_v3 = vld [vmem:[#allocation9 + $0x788] ss:$16 sps:$4 sm:$0xff]  }
 0x1ad   :  { %2404 = vmatprep.subr.bf16.mxu0 %v3671_v17  ;;  %2568 = vmatprep.subr.bf16.mxu1 %v3674_v18  ;;  %v3738_v17 = vld [vmem:[#allocation9 + $0x608] ss:$16 sps:$4 sm:$0xff]   ;;  %v3743_v18 = vld [vmem:[#allocation9 + $0x624] ss:$16 sps:$4 sm:$0xff]  }
 0x1b0   :  { %2405 = vmatpush1.bf16.msra.mxu0 %v3669_v19  ;;  %2569 = vmatpush1.bf16.msra.mxu1 %v3672_v20  ;;  %v3746_v19 = vld [vmem:[#allocation9 + $0x62c] ss:$16 sps:$4 sm:$0xff]   ;;  %v3741_v20 = vld [vmem:[#allocation9 + $0x620] ss:$16 sps:$4 sm:$0xff]  }
 0x1b1   :  { %2406 = vmatprep.subr.bf16.mxu0 %v3677_v21  ;;  %2570 = vmatprep.subr.bf16.mxu1 %v3680_v22  ;;  %v3744_v21 = vld [vmem:[#allocation9 + $0x628] ss:$16 sps:$4 sm:$0xff]   ;;  %v3749_v22 = vld [vmem:[#allocation9 + $0x644] ss:$16 sps:$4 sm:$0xff]  }
 0x1b4   :  { %2407 = vmatpush1.bf16.msra.mxu0 %v3675_v23  ;;  %2571 = vmatpush1.bf16.msra.mxu1 %v3678_v2  ;;  %v3752_v23 = vld [vmem:[#allocation9 + $0x64c] ss:$16 sps:$4 sm:$0xff]   ;;  %v3747_v2 = vld [vmem:[#allocation9 + $0x640] ss:$16 sps:$4 sm:$0xff]  }
 0x1b5   :  { %2408 = vmatprep.subr.bf16.mxu0 %v3683_v24  ;;  %2572 = vmatprep.subr.bf16.mxu1 %v3686_v26  ;;  %v3750_v24 = vld [vmem:[#allocation9 + $0x648] ss:$16 sps:$4 sm:$0xff]   ;;  %v3755_v26 = vld [vmem:[#allocation9 + $0x664] ss:$16 sps:$4 sm:$0xff]  }
 0x1b8   :  { %2409 = vmatpush1.bf16.msra.mxu0 %v3681_v27  ;;  %2573 = vmatpush1.bf16.msra.mxu1 %v3684_v28  ;;  %v3758_v27 = vld [vmem:[#allocation9 + $0x66c] ss:$16 sps:$4 sm:$0xff]   ;;  %v3753_v28 = vld [vmem:[#allocation9 + $0x660] ss:$16 sps:$4 sm:$0xff]  }
 0x1b9   :  { %2410 = vmatprep.subr.bf16.mxu0 %v3689_v30  ;;  %2574 = vmatprep.subr.bf16.mxu1 %v3692_v31  ;;  %v3756_v30 = vld [vmem:[#allocation9 + $0x668] ss:$16 sps:$4 sm:$0xff]   ;;  %v3761_v31 = vld [vmem:[#allocation9 + $0x684] ss:$16 sps:$4 sm:$0xff]  }
 0x1bc   :  { %2411 = vmatpush1.bf16.msra.mxu0 %v3687_v32  ;;  %2575 = vmatpush1.bf16.msra.mxu1 %v3690_v33  ;;  %v3764_v32 = vld [vmem:[#allocation9 + $0x68c] ss:$16 sps:$4 sm:$0xff]   ;;  %v3759_v33 = vld [vmem:[#allocation9 + $0x680] ss:$16 sps:$4 sm:$0xff]  }
 0x1bd   :  { %2412 = vmatprep.subr.bf16.mxu0 %v3695_v34  ;;  %2576 = vmatprep.subr.bf16.mxu1 %v3698_v35  ;;  %v3762_v34 = vld [vmem:[#allocation9 + $0x688] ss:$16 sps:$4 sm:$0xff]   ;;  %v3767_v35 = vld [vmem:[#allocation9 + $0x6a4] ss:$16 sps:$4 sm:$0xff]  }
 0x1c0   :  { %2413 = vmatpush1.bf16.msra.mxu0 %v3693_v36  ;;  %2577 = vmatpush1.bf16.msra.mxu1 %v3696_v37  ;;  %v3770_v36 = vld [vmem:[#allocation9 + $0x6ac] ss:$16 sps:$4 sm:$0xff]   ;;  %v3765_v37 = vld [vmem:[#allocation9 + $0x6a0] ss:$16 sps:$4 sm:$0xff]  }
 0x1c1   :  { %2414 = vmatprep.subr.bf16.mxu0 %v3701_v38  ;;  %2578 = vmatprep.subr.bf16.mxu1 %v3704_v39  ;;  %v3768_v38 = vld [vmem:[#allocation9 + $0x6a8] ss:$16 sps:$4 sm:$0xff]   ;;  %v3773_v39 = vld [vmem:[#allocation9 + $0x6c4] ss:$16 sps:$4 sm:$0xff]  }
 0x1c4   :  { %2415 = vmatpush1.bf16.msra.mxu0 %v3699_v40  ;;  %2579 = vmatpush1.bf16.msra.mxu1 %v3702_v41  ;;  %v3776_v40 = vld [vmem:[#allocation9 + $0x6cc] ss:$16 sps:$4 sm:$0xff]   ;;  %v3771_v41 = vld [vmem:[#allocation9 + $0x6c0] ss:$16 sps:$4 sm:$0xff]  }
 0x1c5   :  { %2416 = vmatprep.subr.bf16.mxu0 %v3707_v0  ;;  %2580 = vmatprep.subr.bf16.mxu1 %v3710_v42  ;;  %v3774_v0 = vld [vmem:[#allocation9 + $0x6c8] ss:$16 sps:$4 sm:$0xff]   ;;  %v3779_v42 = vld [vmem:[#allocation9 + $0x6e4] ss:$16 sps:$4 sm:$0xff]  }
 0x1c8   :  { %2417 = vmatpush1.bf16.msra.mxu0 %v3705_v43  ;;  %2581 = vmatpush1.bf16.msra.mxu1 %v3708_v44  ;;  %v3782_v43 = vld [vmem:[#allocation9 + $0x6ec] ss:$16 sps:$4 sm:$0xff]   ;;  %v3777_v44 = vld [vmem:[#allocation9 + $0x6e0] ss:$16 sps:$4 sm:$0xff]  }
 0x1c9   :  { %2418 = vmatprep.subr.bf16.mxu0 %v3713_v45  ;;  %2582 = vmatprep.subr.bf16.mxu1 %v3716_v46  ;;  %v3780_v45 = vld [vmem:[#allocation9 + $0x6e8] ss:$16 sps:$4 sm:$0xff]   ;;  %v3785_v46 = vld [vmem:[#allocation9 + $0x704] ss:$16 sps:$4 sm:$0xff]  }
 0x1cc   :  { %2419 = vmatpush1.bf16.msra.mxu0 %v3711_v48  ;;  %2583 = vmatpush1.bf16.msra.mxu1 %v3714_v49  ;;  %v3783_v48 = vld [vmem:[#allocation9 + $0x700] ss:$16 sps:$4 sm:$0xff]   ;;  %v3786_v49 = vld [vmem:[#allocation9 + $0x708] ss:$16 sps:$4 sm:$0xff]  }
 0x1cd   :  { %2420 = vmatprep.subr.bf16.mxu0 %v3719_v50  ;;  %2584 = vmatprep.subr.bf16.mxu1 %v3722_v25  ;;  %v3791_v50 = vld [vmem:[#allocation9 + $0x724] ss:$16 sps:$4 sm:$0xff]   ;;  %v3794_v25 = vld [vmem:[#allocation9 + $0x72c] ss:$16 sps:$4 sm:$0xff]  }
 0x1d0   :  { %2421 = vmatpush1.bf16.msra.mxu0 %v3717_v53  ;;  %2585 = vmatpush1.bf16.msra.mxu1 %v3720_v54  ;;  %v3797_v53 = vld [vmem:[#allocation9 + $0x744] ss:$16 sps:$4 sm:$0xff]   ;;  %v3800_v54 = vld [vmem:[#allocation9 + $0x74c] ss:$16 sps:$4 sm:$0xff]  }
 0x1d1   :  { %2422 = vmatprep.subr.bf16.mxu0 %v3725_v55  ;;  %2586 = vmatprep.subr.bf16.mxu1 %v3728_v56  ;;  %v3795_v55 = vld [vmem:[#allocation9 + $0x740] ss:$16 sps:$4 sm:$0xff]   ;;  %v3798_v56 = vld [vmem:[#allocation9 + $0x748] ss:$16 sps:$4 sm:$0xff]  }
 0x1d4   :  { %2423 = vmatpush1.bf16.msra.mxu0 %v3723_v60  ;;  %2587 = vmatpush1.bf16.msra.mxu1 %v3726_v61  ;;  %v3801_v60 = vld [vmem:[#allocation9 + $0x760] ss:$16 sps:$4 sm:$0xff]   ;;  %v3804_v61 = vld [vmem:[#allocation9 + $0x768] ss:$16 sps:$4 sm:$0xff]  }
 0x1d5   :  { %2424 = vmatprep.subr.bf16.mxu0 %v3731_v62  ;;  %2588 = vmatprep.subr.bf16.mxu1 %v3734_v63  ;;  %v3809_v62 = vld [vmem:[#allocation9 + $0x784] ss:$16 sps:$4 sm:$0xff]   ;;  %v3812_v63 = vld [vmem:[#allocation9 + $0x78c] ss:$16 sps:$4 sm:$0xff]  }
 0x1d8   :  { %2425 = vmatpush1.bf16.msra.mxu0 %v3729_v4  ;;  %2589 = vmatpush1.bf16.msra.mxu1 %v3732_v5  ;;  %v716_v4 = vsub.s32 6, %v4126_v7  ;;  %v3815_v5 = vld [vmem:[#allocation9 + $0x7a4] ss:$16 sps:$4 sm:$0xff]  }
 0x1d9   :  { %2435 = vmatprep.subr.bf16.mxu0 %v3737_v11  ;;  %2599 = vmatprep.subr.bf16.mxu1 %v3740_v12  ;;  %v3818_v11 = vld [vmem:[#allocation9 + $0x7ac] ss:$16 sps:$4 sm:$0xff]   ;;  %v3813_v12 = vld [vmem:[#allocation9 + $0x7a0] ss:$16 sps:$4 sm:$0xff]  }
 0x1db   :  { %2427 = vmatmul.mubr.bf16.vlgmr.msra.gmra.mrb[8].mxu0 %v750_v15  ;;  %2591 = vmatmul.mubr.bf16.vlgmr.msra.gmra.mrb[8].mxu1 %v750_v15  ;;  %v717_v15 = vrot.slane %v4129_v9, %v716_v4  ;;  %v3831_v9 = vld [vmem:[#allocation11 + $0x40] sm:$0xff]  }
 0x1dc   :  { %2436 = vmatpush1.bf16.msra.mxu0 %v3735_v16  ;;  %2600 = vmatpush1.bf16.msra.mxu1 %v3738_v17  ;;  %v3821_v16 = vld [vmem:[#allocation9 + $0x7c4] ss:$16 sps:$4 sm:$0xff]   ;;  %v3824_v17 = vld [vmem:[#allocation9 + $0x7cc] ss:$16 sps:$4 sm:$0xff]  }
 0x1dd   :  { %2437 = vmatprep.subr.bf16.mxu0 %v3743_v18  ;;  %2601 = vmatprep.subr.bf16.mxu1 %v3746_v19  ;;  %v3819_v18 = vld [vmem:[#allocation9 + $0x7c0] ss:$16 sps:$4 sm:$0xff]   ;;  %v3822_v19 = vld [vmem:[#allocation9 + $0x7c8] ss:$16 sps:$4 sm:$0xff]  }
 0x1de   :  { %2467 = vmatprep.mubr.bf16.mxu0 %v753_v13  ;;  %2631 = vmatprep.mubr.bf16.mxu1 %v753_v13  ;;  %v736_v13 = vadd.f32 %v717_v15, %v4148_v6  ;;  %v3835_v6 = vld [vmem:[#allocation11 + $0x48] sm:$0xff]  }
 0x1e0   :  { %2438 = vmatpush1.bf16.msra.mxu0 %v3741_v20  ;;  %2602 = vmatpush1.bf16.msra.mxu1 %v3744_v21  ;;  %v3827_v20 = vld [vmem:[#allocation9 + $0x7e4] ss:$16 sps:$4 sm:$0xff]   ;;  %v3830_v21 = vld [vmem:[#allocation9 + $0x7ec] ss:$16 sps:$4 sm:$0xff]  }
 0x1e1   :  { %2439 = vmatprep.subr.bf16.mxu0 %v3749_v22  ;;  %2603 = vmatprep.subr.bf16.mxu1 %v3752_v23  ;;  %v3825_v22 = vld [vmem:[#allocation9 + $0x7e0] ss:$16 sps:$4 sm:$0xff]   ;;  %v3828_v23 = vld [vmem:[#allocation9 + $0x7e8] ss:$16 sps:$4 sm:$0xff]  }
 0x1e4   :  { %2440 = vmatpush1.bf16.msra.mxu0 %v3747_v2  ;;  %2604 = vmatpush1.bf16.msra.mxu1 %v3750_v24  ;;  %v744_v2 = vmax.f32 %v736_v13, 0.0  ;;  %v3832_v24 = vld [vmem:[#allocation11 + $0xc0] sm:$0xff]  }
 0x1e5   :  { %2441 = vmatprep.subr.bf16.mxu0 %v3755_v26  ;;  %2605 = vmatprep.subr.bf16.mxu1 %v3758_v27  ;;  %v3833_v26 = vld [vmem:[#allocation11] sm:$0xff]  }
 0x1e6   :  { %v3834_v27 = vld [vmem:[#allocation11 + $0x80] sm:$0xff]  }
 0x1e8   :  { %2442 = vmatpush1.bf16.msra.mxu0 %v3753_v28  ;;  %2606 = vmatpush1.bf16.msra.mxu1 %v3756_v30  ;;  %v752_v28 = vpack.c.bf16 %v744_v2, %v744_v2  ;;  %v3836_v30 = vld [vmem:[#allocation11 + $0xc8] sm:$0xff]  }
 0x1e9   :  { %2443 = vmatprep.subr.bf16.mxu0 %v3761_v31  ;;  %2607 = vmatprep.subr.bf16.mxu1 %v3764_v32  ;;  %v3837_v31 = vld [vmem:[#allocation11 + $0x8] sm:$0xff]  }
 0x1ea   :  { %v3838_v32 = vld [vmem:[#allocation11 + $0x88] sm:$0xff]  }
 0x1ec   :  { %2444 = vmatpush1.bf16.msra.mxu0 %v3759_v33  ;;  %2608 = vmatpush1.bf16.msra.mxu1 %v3762_v34  ;;  %v3839_v33 = vld [vmem:[#allocation11 + $0x50] sm:$0xff]  }
 0x1ed   :  { %2445 = vmatprep.subr.bf16.mxu0 %v3767_v35  ;;  %2609 = vmatprep.subr.bf16.mxu1 %v3770_v36  ;;  %v3840_v34 = vld [vmem:[#allocation11 + $0xd0] sm:$0xff]  }
 0x1ee   :  { %v3841_v35 = vld [vmem:[#allocation11 + $0x10] sm:$0xff]  }
 0x1ef   :  { %v3842_v36 = vld [vmem:[#allocation11 + $0x90] sm:$0xff]  }
 0x1f0   :  { %2446 = vmatpush1.bf16.msra.mxu0 %v3765_v37  ;;  %2610 = vmatpush1.bf16.msra.mxu1 %v3768_v38  ;;  %v3843_v37 = vld [vmem:[#allocation11 + $0x58] sm:$0xff]  }
 0x1f1   :  { %2447 = vmatprep.subr.bf16.mxu0 %v3773_v39  ;;  %2611 = vmatprep.subr.bf16.mxu1 %v3776_v40  ;;  %v3844_v38 = vld [vmem:[#allocation11 + $0xd8] sm:$0xff]  }
 0x1f2   :  { %v3845_v39 = vld [vmem:[#allocation11 + $0x18] sm:$0xff]  }
 0x1f3   :  { %v3846_v40 = vld [vmem:[#allocation11 + $0x98] sm:$0xff]  }
 0x1f4   :  { %2448 = vmatpush1.bf16.msra.mxu0 %v3771_v41  ;;  %2612 = vmatpush1.bf16.msra.mxu1 %v3774_v0  ;;  %v3847_v41 = vld [vmem:[#allocation11 + $0x60] sm:$0xff]  }
 0x1f5   :  { %2449 = vmatprep.subr.bf16.mxu0 %v3779_v42  ;;  %2613 = vmatprep.subr.bf16.mxu1 %v3782_v43  ;;  %v3848_v0 = vld [vmem:[#allocation11 + $0xe0] sm:$0xff]  }
 0x1f6   :  { %v3849_v42 = vld [vmem:[#allocation11 + $0x20] sm:$0xff]  }
 0x1f7   :  { %v3850_v43 = vld [vmem:[#allocation11 + $0xa0] sm:$0xff]  }
 0x1f8   :  { %2450 = vmatpush1.bf16.msra.mxu0 %v3777_v44  ;;  %2614 = vmatpush1.bf16.msra.mxu1 %v3780_v45  ;;  %v3851_v44 = vld [vmem:[#allocation11 + $0x68] sm:$0xff]  }
 0x1f9   :  { %2451 = vmatprep.subr.bf16.mxu0 %v3785_v46  ;;  %2615 = vmatprep.subr.bf16.mxu1 %v3788_v47  ;;  %v3852_v45 = vld [vmem:[#allocation11 + $0xe8] sm:$0xff]  }
 0x1fa   :  { %v3853_v46 = vld [vmem:[#allocation11 + $0x28] sm:$0xff]  }
 0x1fb   :  { %v3854_v47 = vld [vmem:[#allocation11 + $0xa8] sm:$0xff]  }
 0x1fc   :  { %2452 = vmatpush1.bf16.msra.mxu0 %v3783_v48  ;;  %2616 = vmatpush1.bf16.msra.mxu1 %v3786_v49  ;;  %v3855_v48 = vld [vmem:[#allocation11 + $0x70] sm:$0xff]  }
 0x1fd   :  { %2453 = vmatprep.subr.bf16.mxu0 %v3791_v50  ;;  %2617 = vmatprep.subr.bf16.mxu1 %v3794_v25  ;;  %v3856_v49 = vld [vmem:[#allocation11 + $0xf0] sm:$0xff]  }
 0x1fe   :  { %v3857_v50 = vld [vmem:[#allocation11 + $0x30] sm:$0xff]  }
 0x1ff   :  { %v3858_v25 = vld [vmem:[#allocation11 + $0xb0] sm:$0xff]  }
 0x200   :  { %2454 = vmatpush1.bf16.msra.mxu0 %v3789_v51  ;;  %2618 = vmatpush1.bf16.msra.mxu1 %v3792_v52  ;;  %v3859_v51 = vld [vmem:[#allocation11 + $0x78] sm:$0xff]  }
 0x201   :  { %2455 = vmatprep.subr.bf16.mxu0 %v3797_v53  ;;  %2619 = vmatprep.subr.bf16.mxu1 %v3800_v54  ;;  %v3860_v52 = vld [vmem:[#allocation11 + $0xf8] sm:$0xff]  }
 0x202   :  { %v3861_v53 = vld [vmem:[#allocation11 + $0x38] sm:$0xff]  }
 0x203   :  { %v3862_v54 = vld [vmem:[#allocation11 + $0xb8] sm:$0xff]  }
 0x204   :  { %2456 = vmatpush1.bf16.msra.mxu0 %v3795_v55  ;;  %2620 = vmatpush1.bf16.msra.mxu1 %v3798_v56  ;;  %v1010_v55 = vld [vmem:[%s4199_s4] sm:$0xf] }
 0x205   :  { %2457 = vmatprep.subr.bf16.mxu0 %v3803_v57  ;;  %2621 = vmatprep.subr.bf16.mxu1 %v3806_v59  ;;  %v1015_v56 = vrot.slane %v1010_v55, %v692_v8  ;;  %v1023_v57 = vrot.slane %v1010_v55, %v700_v29  ;;  %v1019_v59 = vrot.slane %v1010_v55, %v696_v10 }
 0x208   :  { %2458 = vmatpush1.bf16.msra.mxu0 %v3801_v60  ;;  %2622 = vmatpush1.bf16.msra.mxu1 %v3804_v61  ;;  %v1027_v60 = vrot.slane %v1010_v55, %v704_v14 }
 0x209   :  { %2459 = vmatprep.subr.bf16.mxu0 %v3809_v62  ;;  %2623 = vmatprep.subr.bf16.mxu1 %v3812_v63 }
 0x20c   :  { %2460 = vmatpush1.bf16.msra.mxu0 %v3807_v1  ;;  %2624 = vmatpush1.bf16.msra.mxu1 %v3810_v3 }
 0x20d   :  { %2461 = vmatprep.subr.bf16.mxu0 %v3815_v5  ;;  %2625 = vmatprep.subr.bf16.mxu1 %v3818_v11 }
 0x210   :  { %2462 = vmatpush1.bf16.msra.mxu0 %v3813_v12  ;;  %2626 = vmatpush1.bf16.msra.mxu1 %v3816_v58 }
 0x211   :  { %2463 = vmatprep.subr.bf16.mxu0 %v3821_v16  ;;  %2627 = vmatprep.subr.bf16.mxu1 %v3824_v17 }
 0x214   :  { %2464 = vmatpush1.bf16.msra.mxu0 %v3819_v18  ;;  %2628 = vmatpush1.bf16.msra.mxu1 %v3822_v19 }
 0x215   :  { %2465 = vmatprep.subr.bf16.mxu0 %v3827_v20  ;;  %2629 = vmatprep.subr.bf16.mxu1 %v3830_v21  ;;  %v3329_v21 = vld [vmem:[%s4201_s6] ss:$0 sm:$0xff] }
 0x218   :  { %2466 = vmatpush1.bf16.msra.mxu0 %v3825_v22  ;;  %2630 = vmatpush1.bf16.msra.mxu1 %v3828_v23 }
 0x219   :  { %3362 = vmatprep.subr.bf16.mxu0 %v3831_v9  ;;  %3384 = vmatprep.subr.bf16.mxu1 %v3832_v24 }
 0x21b   :  { %2468 = vmatmul.mubr.bf16.vlgmr.msra.gmra.mrb[8].mxu0 %v752_v28  ;;  %2632 = vmatmul.mubr.bf16.vlgmr.msra.gmra.mrb[8].mxu1 %v752_v28 }
 0x21c   :  { %3363 = vmatpush3.bf16.msra.mxu0 %v3833_v26  ;;  %3385 = vmatpush3.bf16.msra.mxu1 %v3834_v27 }
 0x21d   :  { %3364 = vmatprep.subr.bf16.mxu0 %v3835_v6  ;;  %3386 = vmatprep.subr.bf16.mxu1 %v3836_v30 }
 0x220   :  { %3365 = vmatpush3.bf16.msra.mxu0 %v3837_v31  ;;  %3387 = vmatpush3.bf16.msra.mxu1 %v3838_v32 }
 0x221   :  { %3366 = vmatprep.subr.bf16.mxu0 %v3839_v33  ;;  %3388 = vmatprep.subr.bf16.mxu1 %v3840_v34 }
 0x224   :  { %3367 = vmatpush3.bf16.msra.mxu0 %v3841_v35  ;;  %3389 = vmatpush3.bf16.msra.mxu1 %v3842_v36 }
 0x225   :  { %3368 = vmatprep.subr.bf16.mxu0 %v3843_v37  ;;  %3390 = vmatprep.subr.bf16.mxu1 %v3844_v38 }
 0x228   :  { %3369 = vmatpush3.bf16.msra.mxu0 %v3845_v39  ;;  %3391 = vmatpush3.bf16.msra.mxu1 %v3846_v40 }
 0x229   :  { %3370 = vmatprep.subr.bf16.mxu0 %v3847_v41  ;;  %3392 = vmatprep.subr.bf16.mxu1 %v3848_v0 }
 0x22c   :  { %3371 = vmatpush3.bf16.msra.mxu0 %v3849_v42  ;;  %3393 = vmatpush3.bf16.msra.mxu1 %v3850_v43 }
 0x22d   :  { %3372 = vmatprep.subr.bf16.mxu0 %v3851_v44  ;;  %3394 = vmatprep.subr.bf16.mxu1 %v3852_v45 }
 0x230   :  { %3373 = vmatpush3.bf16.msra.mxu0 %v3853_v46  ;;  %3395 = vmatpush3.bf16.msra.mxu1 %v3854_v47 }
 0x231   :  { %3374 = vmatprep.subr.bf16.mxu0 %v3855_v48  ;;  %3396 = vmatprep.subr.bf16.mxu1 %v3856_v49 }
 0x234   :  { %3375 = vmatpush3.bf16.msra.mxu0 %v3857_v50  ;;  %3397 = vmatpush3.bf16.msra.mxu1 %v3858_v25 }
 0x235   :  { %3376 = vmatprep.subr.bf16.mxu0 %v3859_v51  ;;  %3398 = vmatprep.subr.bf16.mxu1 %v3860_v52 }
 0x238   :  { %3377 = vmatpush3.bf16.msra.mxu0 %v3861_v53  ;;  %3399 = vmatpush3.bf16.msra.mxu1 %v3862_v54 }
 0x2ee   :  { %v2469_v61 = vpop.f32.mrb[8].mxu0  ;;  %v2633_v62 = vpop.f32.mrb[8].mxu1 }
 0x2ef   :  { %v3406_v63 = vadd.f32 %v2469_v61, %v1015_v56  ;;  %v3408_v1 = vadd.f32 %v2633_v62, %v1023_v57  ;;  %v2471_v3 = vpop.f32.mrb[9].mxu0  ;;  %v2635_v4 = vpop.f32.mrb[9].mxu1 }
 0x2f0   :  { %v3407_v5 = vadd.f32 %v2471_v3, %v1019_v59  ;;  %v3409_v11 = vadd.f32 %v2635_v4, %v1027_v60  ;;  %v2473_v12 = vpop.f32.mrb[10].mxu0  ;;  %v2637_v58 = vpop.f32.mrb[10].mxu1 }
 0x2f1   :  { %v2640_v8 = vmax.f32 %v3406_v63, 0.0  ;;  %v2642_v15 = vmax.f32 %v3408_v1, 0.0  ;;  %v2474_v16 = vpop.f32.mrb[11].mxu0  ;;  %v2638_v29 = vpop.f32.mrb[11].mxu1 }
 0x2f2   :  { %v2641_v17 = vmax.f32 %v3407_v5, 0.0  ;;  %v2643_v18 = vmax.f32 %v3409_v11, 0.0 }
 0x2f3   :  { %v2644_v7 = vpack.c.bf16 %v2640_v8, %v2640_v8  ;;  %v2646_v14 = vpack.c.bf16 %v2642_v15, %v2642_v15 }
 0x2f4   :  { %v2645_v10 = vpack.c.bf16 %v2641_v17, %v2641_v17  ;;  %v2647_v19 = vpack.c.bf16 %v2643_v18, %v2643_v18 }
 0x2f6   :  { %2943 = vmatprep.mubr.bf16.mxu0 %v2645_v10  ;;  %2983 = vmatprep.mubr.bf16.mxu1 %v2647_v19 }
 0x2f7   :  { %2944 = vmatmul.mubr.bf16.vlgmr.msra.gmra.mrb[12].mxu0 %v2644_v7  ;;  %2984 = vmatmul.mubr.bf16.vlgmr.msra.gmra.mrb[12].mxu1 %v2646_v14 }
 0x3ca   :  { %v3378_v13 = vpop.f32.mrb[12].mxu0  ;;  %v3400_v20 = vpop.f32.mrb[12].mxu1 }
 0x3cb   :  { %v3379_v22 = vpop.f32.mrb[13].mxu0  ;;  %v3401_v23 = vpop.f32.mrb[13].mxu1 }
 0x3cc   :  { %v3380_v2 = vadd.f32 %v3379_v22, %v3378_v13  ;;  %v3402_v9 = vadd.f32 %v3401_v23, %v3400_v20  ;;  %v3381_v24 = vpop.f32.mrb[14].mxu0  ;;  %v3403_v26 = vpop.f32.mrb[14].mxu1 }
 0x3cd   :  { %v3382_v27 = vpop.f32.mrb[15].mxu0  ;;  %v3404_v28 = vpop.f32.mrb[15].mxu1 }
 0x3ce   :  { %v2946_v6 = vadd.f32 %v3380_v2, %v3329_v21 }
 0x3d0   :  { %v2986_v30 = vadd.f32 %v3402_v9, %v2946_v6 }
 0x3d2   :  { %2991 = vst [vmem:[#allocation12] sm:$0xff] %v2986_v30 }
 0x3d3   :  { %3984 = shalt.err (!%p3981_p2)
}
 0x3d4   :  { %s3985_s21 = scalar_lea.hbm %s4202_s7, 128 }
 0x3d5   :  { %p3986_p3 = scmp.ne.s32.totalorder %s4202_s7, %s3985_s21  ;;  %p3989_p4 = scmp.lt.u32.totalorder %s3985_s21, %s4202_s7 }
 0x3d7   :  { %p3991_p5 = pnand %p3989_p4, %p3986_p3 }
 0x3d9   :  { %3994 = shalt.err (!%p3991_p5)
}
 0x3da   :  { %3001 = dma.vmem_to_hbm [thread:$0]  %s2999_s18, 128, %s4202_s7, [#allocation5]  }
 0x3db   :  { %4001 = dma.done.wait [#allocation5], 128  }
 0x3dc   :  { %4002 = vsyncadd [#allocation5], 4294967168 }
 0x3dd   :  { %3005 = vsyncpa [#allocation4], 1 }
 0x3de   :  { %3006 = vsyncpa [#allocation7], 1 }
 0x3df   :  { %3007 = vsyncpa [#allocation10], 1 }
 0x3e0   :  { %3008 = vsyncpa [#allocation5], 1 }

</bundles_post_ra>
